<compile_context>
chip_gen: v6e
topology: v6e:2x2x1
jax: 0.10.0
libtpu: 0.0.40
codegen_flags: <defaults>
</compile_context>

<pallas_src>
import functools

import numpy as np
import jax
import jax.numpy as jnp
from jax.experimental import pallas as pl
from jax.experimental.pallas import tpu as pltpu

VMEM_SPEC = pl.BlockSpec(memory_space=pltpu.MemorySpace.VMEM)


# ---------------------------------------------------------------------------
# The single fused Pallas kernel: conv1 -> relu -> pool -> conv2 -> relu ->
# pool -> fc1 -> relu -> fc2 -> log_softmax.   Four bf16 MXU matmuls total.
# ---------------------------------------------------------------------------
def _fused_net_kernel(xs_ref, B1_ref, b1_ref, B2_ref, b2_ref,
                      Wf1_ref, bf1_ref, Wf2_ref, bf2_ref, out_ref, *, np_pad):
    f32, bf16 = jnp.float32, jnp.bfloat16

    # ---- conv1: one banded matmul, K = 5 row-offsets x 128 (w_in) lanes ----
    # xs rows = h_in*np + n, lanes = w_in (28 valid of 128).
    xs = xs_ref[...]                                                  # (28*np, 128) bf16
    lhs1 = jnp.concatenate(
        [xs[i * np_pad:(i + 24) * np_pad] for i in range(5)], axis=1)  # (24*np, 640)
    # c1 lanes = parity*128 + (w_out//2)*10 + oc   (w_out = 2*half + parity)
    c1 = jnp.dot(lhs1, B1_ref[...], preferred_element_type=f32)       # (24*np, 256)
    c1 = jnp.maximum(c1 + b1_ref[...], 0.0)

    # ---- 2x2 max-pool #1: h in rows (VPU max), w-parity in 128-lane halves -
    t = c1.reshape(12, 2, np_pad, 256)
    t = jnp.maximum(t[:, 0], t[:, 1]).reshape(12 * np_pad, 256)
    h1 = jnp.maximum(t[:, :128], t[:, 128:]).astype(bf16)             # (12*np, 128)
    # h1 lanes = w1*10 + ci  (w1 < 12, ci < 10)

    # ---- conv2: one banded matmul, K = 5 row-offsets x 128 (w1,ci) lanes ----
    lhs2 = jnp.concatenate(
        [h1[i * np_pad:(i + 8) * np_pad] for i in range(5)], axis=1)   # (8*np, 640)
    # c2 lanes = parity*128 + (w_out//2)*20 + co
    c2 = jnp.dot(lhs2, B2_ref[...], preferred_element_type=f32)       # (8*np, 256)
    c2 = jnp.maximum(c2 + b2_ref[...], 0.0)                           # dropout2d: identity (eval)

    # ---- 2x2 max-pool #2 ----------------------------------------------------
    u = c2.reshape(4, 2, np_pad, 256)
    u = jnp.maximum(u[:, 0], u[:, 1]).reshape(4 * np_pad, 256)
    h2 = jnp.maximum(u[:, :128], u[:, 128:]).astype(bf16)             # (4*np, 128)
    # h2 lanes = w3*20 + co  (w3 < 4, co < 20)

    # ---- fc1: one matmul, K = 4 h-blocks x 128 lanes ------------------------
    lhs3 = jnp.concatenate(
        [h2[h * np_pad:(h + 1) * np_pad] for h in range(4)], axis=1)   # (np, 512)
    f1 = jnp.dot(lhs3, Wf1_ref[...], preferred_element_type=f32)      # (np, 128)
    f1 = jnp.maximum(f1 + bf1_ref[...], 0.0).astype(bf16)             # dropout: identity (eval)

    # ---- fc2 + log_softmax over the 10 valid lanes (f32) --------------------
    f2 = jnp.dot(f1, Wf2_ref[...], preferred_element_type=f32) + bf2_ref[...]
    lane = jax.lax.broadcasted_iota(jnp.int32, f2.shape, 1)
    logits = jnp.where(lane < 10, f2, -1e30)
    m = jnp.max(logits, axis=-1, keepdims=True)
    s = logits - m
    lse = jnp.log(jnp.sum(jnp.exp(s), axis=-1, keepdims=True))
    out_ref[...] = s - lse                                            # (np, 128) f32


# ---------------------------------------------------------------------------
# Wrapper: single pallas_call; only input glue is a tiny pad/transpose fusion.
# ---------------------------------------------------------------------------
def make_forward(n_batch):
    np_pad = max(16, ((n_batch + 15) // 16) * 16)   # batch padded to bf16 sublane tile

    call = pl.pallas_call(
        functools.partial(_fused_net_kernel, np_pad=np_pad),
        out_shape=jax.ShapeDtypeStruct((np_pad, 128), jnp.float32),
        in_specs=[VMEM_SPEC] * 9,
        out_specs=VMEM_SPEC,
        compiler_params=pltpu.CompilerParams(vmem_limit_bytes=32 * 1024 * 1024),
    )

    @jax.jit
    def forward(x, pp):
        n, c, h, w = x.shape
        assert c == 1 and h == 28 and w == 28 and n <= np_pad
        xs = jnp.pad(x[:, 0], ((0, np_pad - n), (0, 0), (0, 0)))      # (np, 28, 28)
        xs = xs.transpose(1, 0, 2)                                     # (28, np, 28)
        xs = jnp.pad(xs, ((0, 0), (0, 0), (0, 128 - 28)))              # (28, np, 128)
        xs = xs.reshape(28 * np_pad, 128).astype(jnp.bfloat16)
        out = call(xs, pp["B1"], pp["b1"], pp["B2"], pp["b2"],
                   pp["Wf1"], pp["bf1"], pp["Wf2"], pp["bf2"])
        return out[:n, :10]

    return forward


# ---------------------------------------------------------------------------
# Parameter setup: raw (PyTorch-shaped) params + one-time banded repacking.
# ---------------------------------------------------------------------------
def init_params(key):
    """Deterministic synthetic parameters (same shapes as the PyTorch module)."""
    k = jax.random.split(key, 8)
    return {
        "w1": jax.random.normal(k[0], (10, 1, 5, 5), jnp.float32) * 0.1,    # conv1
        "b1": jax.random.normal(k[1], (10,), jnp.float32) * 0.1,
        "w2": jax.random.normal(k[2], (20, 10, 5, 5), jnp.float32) * 0.05,  # conv2
        "b2": jax.random.normal(k[3], (20,), jnp.float32) * 0.05,
        "wf1": jax.random.normal(k[4], (50, 320), jnp.float32) * 0.05,      # fc1
        "bf1": jax.random.normal(k[5], (50,), jnp.float32) * 0.05,
        "wf2": jax.random.normal(k[6], (10, 50), jnp.float32) * 0.1,        # fc2
        "bf2": jax.random.normal(k[7], (10,), jnp.float32) * 0.1,
    }


def prepare_params(params):
    """Build compact bf16 banded weight matrices + lane-tiled f32 biases (runs once)."""
    w1 = np.asarray(params["w1"], np.float32)    # (oc=10, 1, ki, kj)
    b1 = np.asarray(params["b1"], np.float32)
    w2 = np.asarray(params["w2"], np.float32)    # (co=20, ci=10, ki, kj)
    b2 = np.asarray(params["b2"], np.float32)
    wf1 = np.asarray(params["wf1"], np.float32)  # (50, 320), f = co*16 + h*4 + w
    bf1 = np.asarray(params["bf1"], np.float32)
    wf2 = np.asarray(params["wf2"], np.float32)  # (10, 50)
    bf2 = np.asarray(params["bf2"], np.float32)

    # conv1 band: row = ki*128 + w_in ; col = (w_out%2)*128 + (w_out//2)*10 + oc
    B1 = np.zeros((5 * 128, 256), np.float32)
    b1t = np.zeros((1, 256), np.float32)
    for w_out in range(24):
        lane0 = (w_out % 2) * 128 + (w_out // 2) * 10
        b1t[0, lane0:lane0 + 10] = b1
        for ki in range(5):
            for kj in range(5):
                B1[ki * 128 + w_out + kj, lane0:lane0 + 10] = w1[:, 0, ki, kj]

    # conv2 band: row = ki*128 + w_in*10 + ci ; col = (w_out%2)*128 + (w_out//2)*20 + co
    B2 = np.zeros((5 * 128, 256), np.float32)
    b2t = np.zeros((1, 256), np.float32)
    for w_out in range(8):
        lane0 = (w_out % 2) * 128 + (w_out // 2) * 20
        b2t[0, lane0:lane0 + 20] = b2
        for ki in range(5):
            for kj in range(5):
                r0 = ki * 128 + (w_out + kj) * 10
                B2[r0:r0 + 10, lane0:lane0 + 20] = w2[:, :, ki, kj].T   # (ci, co)

    # fc1: row = h*128 + w*20 + co ; col = output feature (50 valid of 128)
    Wf1 = np.zeros((4 * 128, 128), np.float32)
    for h in range(4):
        for w in range(4):
            for co in range(20):
                Wf1[h * 128 + w * 20 + co, :50] = wf1[:, co * 16 + h * 4 + w]
    bf1t = np.zeros((1, 128), np.float32)
    bf1t[0, :50] = bf1

    # fc2
    Wf2 = np.zeros((128, 128), np.float32)
    Wf2[:50, :10] = wf2.T
    bf2t = np.zeros((1, 128), np.float32)
    bf2t[0, :10] = bf2

    bf16 = jnp.bfloat16
    return {"B1": jnp.asarray(B1, bf16), "b1": jnp.asarray(b1t),
            "B2": jnp.asarray(B2, bf16), "b2": jnp.asarray(b2t),
            "Wf1": jnp.asarray(Wf1, bf16), "bf1": jnp.asarray(bf1t),
            "Wf2": jnp.asarray(Wf2, bf16), "bf2": jnp.asarray(bf2t)}


# ---------------------------------------------------------------------------
# Pure-JAX reference (matches the PyTorch module in eval mode)
# ---------------------------------------------------------------------------
def reference_forward(x, params):
    dn = ("NCHW", "OIHW", "NCHW")
    hi = jax.lax.Precision.HIGHEST
    a = jax.lax.conv_general_dilated(x, params["w1"], (1, 1), "VALID",
                                     dimension_numbers=dn, precision=hi)
    a = jax.nn.relu(a + params["b1"][None, :, None, None])
    a = jax.lax.reduce_window(a, -jnp.inf, jax.lax.max,
                              (1, 1, 2, 2), (1, 1, 2, 2), "VALID")
    a = jax.lax.conv_general_dilated(a, params["w2"], (1, 1), "VALID",
                                     dimension_numbers=dn, precision=hi)
    a = jax.nn.relu(a + params["b2"][None, :, None, None])
    a = jax.lax.reduce_window(a, -jnp.inf, jax.lax.max,
                              (1, 1, 2, 2), (1, 1, 2, 2), "VALID")
    a = a.reshape(x.shape[0], 320)
    a = jax.nn.relu(jnp.dot(a, params["wf1"].T, precision=hi) + params["bf1"])
    a = jnp.dot(a, params["wf2"].T, precision=hi) + params["bf2"]
    return jax.nn.log_softmax(a, axis=-1)


if __name__ == "__main__":
    key = jax.random.PRNGKey(0)
    pkey, xkey = jax.random.split(key)
    params = init_params(pkey)
    packed_params = prepare_params(params)
    x = jax.random.normal(xkey, (2, 1, 28, 28), jnp.float32)   # MNIST-shaped input

    forward = make_forward(x.shape[0])
    out = forward(x, packed_params)
    jax.block_until_ready(out)
    assert out.shape == (2, 10) and out.dtype == jnp.float32

    ref = reference_forward(x, params)
    max_err = float(jnp.max(jnp.abs(out - ref)))
    assert jnp.allclose(out, ref, atol=5e-2, rtol=5e-2), f"max abs err {max_err}"
    print("KERNEL_OK")
</pallas_src>

<mosaic_0001>
module attributes {stable_mosaic.version = 11 : i64} {
  func.func @_fused_net_kernel(%arg0: memref<448x128xbf16, #tpu.memory_space<vmem>>, %arg1: memref<640x256xbf16, #tpu.memory_space<vmem>>, %arg2: memref<1x256xf32, #tpu.memory_space<vmem>>, %arg3: memref<640x256xbf16, #tpu.memory_space<vmem>>, %arg4: memref<1x256xf32, #tpu.memory_space<vmem>>, %arg5: memref<512x128xbf16, #tpu.memory_space<vmem>>, %arg6: memref<1x128xf32, #tpu.memory_space<vmem>>, %arg7: memref<128x128xbf16, #tpu.memory_space<vmem>>, %arg8: memref<1x128xf32, #tpu.memory_space<vmem>>, %arg9: memref<16x128xf32, #tpu.memory_space<vmem>>) attributes {dimension_semantics = [], scalar_prefetch = 0 : i64, scratch_operands = 0 : i64, tpu.core_type = #tpu.core_type<tc>} {
    %c0 = arith.constant 0 : index
    %c0_0 = arith.constant 0 : index
    %0 = vector.load %arg0[%c0, %c0_0] : memref<448x128xbf16, #tpu.memory_space<vmem>>, vector<448x128xbf16>
    %1 = vector.extract_strided_slice %0 {offsets = [0, 0], sizes = [384, 128], strides = [1, 1]} : vector<448x128xbf16> to vector<384x128xbf16>
    %2 = vector.extract_strided_slice %0 {offsets = [16, 0], sizes = [384, 128], strides = [1, 1]} : vector<448x128xbf16> to vector<384x128xbf16>
    %3 = vector.extract_strided_slice %0 {offsets = [32, 0], sizes = [384, 128], strides = [1, 1]} : vector<448x128xbf16> to vector<384x128xbf16>
    %4 = vector.extract_strided_slice %0 {offsets = [48, 0], sizes = [384, 128], strides = [1, 1]} : vector<448x128xbf16> to vector<384x128xbf16>
    %5 = vector.extract_strided_slice %0 {offsets = [64, 0], sizes = [384, 128], strides = [1, 1]} : vector<448x128xbf16> to vector<384x128xbf16>
    %6 = tpu.concatenate %1, %2, %3, %4, %5 in 1 : vector<384x128xbf16>, vector<384x128xbf16>, vector<384x128xbf16>, vector<384x128xbf16>, vector<384x128xbf16> -> vector<384x640xbf16>
    %c0_1 = arith.constant 0 : index
    %c0_2 = arith.constant 0 : index
    %7 = vector.load %arg1[%c0_1, %c0_2] : memref<640x256xbf16, #tpu.memory_space<vmem>>, vector<640x256xbf16>
    %cst = arith.constant dense<0.000000e+00> : vector<384x256xf32>
    %8 = tpu.matmul %6, %7, %cst {dimension_numbers = #tpu.dot_dimension_numbers<[1], [0], [0], [1], [0, 0, 1, 1], [], []>} : vector<384x640xbf16>, vector<640x256xbf16>, vector<384x256xf32> -> vector<384x256xf32>
    %c0_3 = arith.constant 0 : index
    %c0_4 = arith.constant 0 : index
    %9 = vector.load %arg2[%c0_3, %c0_4] : memref<1x256xf32, #tpu.memory_space<vmem>>, vector<1x256xf32>
    %10 = vector.broadcast %9 : vector<1x256xf32> to vector<384x256xf32>
    %11 = arith.addf %8, %10 : vector<384x256xf32>
    %cst_5 = arith.constant 0.000000e+00 : f32
    %12 = vector.broadcast %cst_5 : f32 to vector<384x256xf32>
    %13 = arith.maximumf %11, %12 : vector<384x256xf32>
    %14 = vector.shape_cast %13 : vector<384x256xf32> to vector<12x2x16x256xf32>
    %15 = vector.extract_strided_slice %14 {offsets = [0, 0, 0, 0], sizes = [12, 1, 16, 256], strides = [1, 1, 1, 1]} : vector<12x2x16x256xf32> to vector<12x1x16x256xf32>
    %16 = vector.shape_cast %15 : vector<12x1x16x256xf32> to vector<12x16x256xf32>
    %17 = vector.extract_strided_slice %14 {offsets = [0, 1, 0, 0], sizes = [12, 1, 16, 256], strides = [1, 1, 1, 1]} : vector<12x2x16x256xf32> to vector<12x1x16x256xf32>
    %18 = vector.shape_cast %17 : vector<12x1x16x256xf32> to vector<12x16x256xf32>
    %19 = arith.maximumf %16, %18 : vector<12x16x256xf32>
    %20 = vector.shape_cast %19 : vector<12x16x256xf32> to vector<192x256xf32>
    %21 = vector.extract_strided_slice %20 {offsets = [0, 0], sizes = [192, 128], strides = [1, 1]} : vector<192x256xf32> to vector<192x128xf32>
    %22 = vector.extract_strided_slice %20 {offsets = [0, 128], sizes = [192, 128], strides = [1, 1]} : vector<192x256xf32> to vector<192x128xf32>
    %23 = arith.maximumf %21, %22 : vector<192x128xf32>
    %24 = arith.truncf %23 : vector<192x128xf32> to vector<192x128xbf16>
    %25 = vector.extract_strided_slice %24 {offsets = [0, 0], sizes = [128, 128], strides = [1, 1]} : vector<192x128xbf16> to vector<128x128xbf16>
    %26 = vector.extract_strided_slice %24 {offsets = [16, 0], sizes = [128, 128], strides = [1, 1]} : vector<192x128xbf16> to vector<128x128xbf16>
    %27 = vector.extract_strided_slice %24 {offsets = [32, 0], sizes = [128, 128], strides = [1, 1]} : vector<192x128xbf16> to vector<128x128xbf16>
    %28 = vector.extract_strided_slice %24 {offsets = [48, 0], sizes = [128, 128], strides = [1, 1]} : vector<192x128xbf16> to vector<128x128xbf16>
    %29 = vector.extract_strided_slice %24 {offsets = [64, 0], sizes = [128, 128], strides = [1, 1]} : vector<192x128xbf16> to vector<128x128xbf16>
    %30 = tpu.concatenate %25, %26, %27, %28, %29 in 1 : vector<128x128xbf16>, vector<128x128xbf16>, vector<128x128xbf16>, vector<128x128xbf16>, vector<128x128xbf16> -> vector<128x640xbf16>
    %c0_6 = arith.constant 0 : index
    %c0_7 = arith.constant 0 : index
    %31 = vector.load %arg3[%c0_6, %c0_7] : memref<640x256xbf16, #tpu.memory_space<vmem>>, vector<640x256xbf16>
    %cst_8 = arith.constant dense<0.000000e+00> : vector<128x256xf32>
    %32 = tpu.matmul %30, %31, %cst_8 {dimension_numbers = #tpu.dot_dimension_numbers<[1], [0], [0], [1], [0, 0, 1, 1], [], []>} : vector<128x640xbf16>, vector<640x256xbf16>, vector<128x256xf32> -> vector<128x256xf32>
    %c0_9 = arith.constant 0 : index
    %c0_10 = arith.constant 0 : index
    %33 = vector.load %arg4[%c0_9, %c0_10] : memref<1x256xf32, #tpu.memory_space<vmem>>, vector<1x256xf32>
    %34 = vector.broadcast %33 : vector<1x256xf32> to vector<128x256xf32>
    %35 = arith.addf %32, %34 : vector<128x256xf32>
    %cst_11 = arith.constant 0.000000e+00 : f32
    %36 = vector.broadcast %cst_11 : f32 to vector<128x256xf32>
    %37 = arith.maximumf %35, %36 : vector<128x256xf32>
    %38 = vector.shape_cast %37 : vector<128x256xf32> to vector<4x2x16x256xf32>
    %39 = vector.extract_strided_slice %38 {offsets = [0, 0, 0, 0], sizes = [4, 1, 16, 256], strides = [1, 1, 1, 1]} : vector<4x2x16x256xf32> to vector<4x1x16x256xf32>
    %40 = vector.shape_cast %39 : vector<4x1x16x256xf32> to vector<4x16x256xf32>
    %41 = vector.extract_strided_slice %38 {offsets = [0, 1, 0, 0], sizes = [4, 1, 16, 256], strides = [1, 1, 1, 1]} : vector<4x2x16x256xf32> to vector<4x1x16x256xf32>
    %42 = vector.shape_cast %41 : vector<4x1x16x256xf32> to vector<4x16x256xf32>
    %43 = arith.maximumf %40, %42 : vector<4x16x256xf32>
    %44 = vector.shape_cast %43 : vector<4x16x256xf32> to vector<64x256xf32>
    %45 = vector.extract_strided_slice %44 {offsets = [0, 0], sizes = [64, 128], strides = [1, 1]} : vector<64x256xf32> to vector<64x128xf32>
    %46 = vector.extract_strided_slice %44 {offsets = [0, 128], sizes = [64, 128], strides = [1, 1]} : vector<64x256xf32> to vector<64x128xf32>
    %47 = arith.maximumf %45, %46 : vector<64x128xf32>
    %48 = arith.truncf %47 : vector<64x128xf32> to vector<64x128xbf16>
    %49 = vector.extract_strided_slice %48 {offsets = [0, 0], sizes = [16, 128], strides = [1, 1]} : vector<64x128xbf16> to vector<16x128xbf16>
    %50 = vector.extract_strided_slice %48 {offsets = [16, 0], sizes = [16, 128], strides = [1, 1]} : vector<64x128xbf16> to vector<16x128xbf16>
    %51 = vector.extract_strided_slice %48 {offsets = [32, 0], sizes = [16, 128], strides = [1, 1]} : vector<64x128xbf16> to vector<16x128xbf16>
    %52 = vector.extract_strided_slice %48 {offsets = [48, 0], sizes = [16, 128], strides = [1, 1]} : vector<64x128xbf16> to vector<16x128xbf16>
    %53 = tpu.concatenate %49, %50, %51, %52 in 1 : vector<16x128xbf16>, vector<16x128xbf16>, vector<16x128xbf16>, vector<16x128xbf16> -> vector<16x512xbf16>
    %c0_12 = arith.constant 0 : index
    %c0_13 = arith.constant 0 : index
    %54 = vector.load %arg5[%c0_12, %c0_13] : memref<512x128xbf16, #tpu.memory_space<vmem>>, vector<512x128xbf16>
    %cst_14 = arith.constant dense<0.000000e+00> : vector<16x128xf32>
    %55 = tpu.matmul %53, %54, %cst_14 {dimension_numbers = #tpu.dot_dimension_numbers<[1], [0], [0], [1], [0, 0, 1, 1], [], []>} : vector<16x512xbf16>, vector<512x128xbf16>, vector<16x128xf32> -> vector<16x128xf32>
    %c0_15 = arith.constant 0 : index
    %c0_16 = arith.constant 0 : index
    %56 = vector.load %arg6[%c0_15, %c0_16] : memref<1x128xf32, #tpu.memory_space<vmem>>, vector<1x128xf32>
    %57 = vector.broadcast %56 : vector<1x128xf32> to vector<16x128xf32>
    %58 = arith.addf %55, %57 : vector<16x128xf32>
    %cst_17 = arith.constant 0.000000e+00 : f32
    %59 = vector.broadcast %cst_17 : f32 to vector<16x128xf32>
    %60 = arith.maximumf %58, %59 : vector<16x128xf32>
    %61 = arith.truncf %60 : vector<16x128xf32> to vector<16x128xbf16>
    %c0_18 = arith.constant 0 : index
    %c0_19 = arith.constant 0 : index
    %62 = vector.load %arg7[%c0_18, %c0_19] : memref<128x128xbf16, #tpu.memory_space<vmem>>, vector<128x128xbf16>
    %cst_20 = arith.constant dense<0.000000e+00> : vector<16x128xf32>
    %63 = tpu.matmul %61, %62, %cst_20 {dimension_numbers = #tpu.dot_dimension_numbers<[1], [0], [0], [1], [0, 0, 1, 1], [], []>} : vector<16x128xbf16>, vector<128x128xbf16>, vector<16x128xf32> -> vector<16x128xf32>
    %c0_21 = arith.constant 0 : index
    %c0_22 = arith.constant 0 : index
    %64 = vector.load %arg8[%c0_21, %c0_22] : memref<1x128xf32, #tpu.memory_space<vmem>>, vector<1x128xf32>
    %65 = vector.broadcast %64 : vector<1x128xf32> to vector<16x128xf32>
    %66 = arith.addf %63, %65 : vector<16x128xf32>
    %67 = tpu.iota {dimensions = array<i32: 1>} : vector<16x128xi32>
    %c10_i32 = arith.constant 10 : i32
    %68 = vector.broadcast %c10_i32 : i32 to vector<16x128xi32>
    %69 = arith.cmpi slt, %67, %68 : vector<16x128xi32>
    %cst_23 = arith.constant -1.000000e+30 : f32
    %70 = vector.broadcast %cst_23 : f32 to vector<16x128xf32>
    %71 = arith.select %69, %66, %70 : vector<16x128xi1>, vector<16x128xf32>
    %cst_24 = arith.constant dense<0xFF800000> : vector<16xf32>
    %72 = vector.multi_reduction <maximumf>, %71, %cst_24 [1] : vector<16x128xf32> to vector<16xf32>
    %73 = vector.shape_cast %72 : vector<16xf32> to vector<16x1xf32>
    %74 = vector.broadcast %73 : vector<16x1xf32> to vector<16x128xf32>
    %75 = arith.subf %71, %74 : vector<16x128xf32>
    %76 = math.exp %75 : vector<16x128xf32>
    %cst_25 = arith.constant dense<0.000000e+00> : vector<16xf32>
    %77 = vector.multi_reduction <add>, %76, %cst_25 [1] : vector<16x128xf32> to vector<16xf32>
    %78 = vector.shape_cast %77 : vector<16xf32> to vector<16x1xf32>
    %79 = math.log %78 : vector<16x1xf32>
    %80 = vector.broadcast %79 : vector<16x1xf32> to vector<16x128xf32>
    %81 = arith.subf %75, %80 : vector<16x128xf32>
    %c0_26 = arith.constant 0 : index
    %c0_27 = arith.constant 0 : index
    %82 = vector.load %arg9[%c0_26, %c0_27] : memref<16x128xf32, #tpu.memory_space<vmem>>, vector<16x128xf32>
    tpu.vector_store %arg9[%c0_26, %c0_27], %81 {strides = array<i32>} : memref<16x128xf32, #tpu.memory_space<vmem>>, vector<16x128xf32>,
    return
  }
}

</mosaic_0001>

<bundles_post_ra>
// kernel: forward.1
= control target key start
LH: loop header
LB: loop body
LE: loop exit
PB: predicated region body
PF: predicated region fallthrough
CT: control target
= control target key end

     0   :  { %14 = vsyncpa [#allocation3], 0  ;;  %s5495_s0 = inlined_call_operand.vmem [shape: bf16[448,128], index: 0, kind: input, shape index: {}]   ;;  %s5496_s1 = inlined_call_operand.vmem [shape: bf16[640,256], index: 1, kind: input, shape index: {}]   ;;  %s5497_s2 = inlined_call_operand.vmem [shape: f32[1,256], index: 2, kind: input, shape index: {}]   ;;  %s5498_s3 = inlined_call_operand.hbm [shape: bf16[640,256], index: 3, kind: input, shape index: {}]   ;;  %s5499_s4 = inlined_call_operand.vmem [shape: f32[1,256], index: 4, kind: input, shape index: {}]   ;;  %s5500_s5 = inlined_call_operand.vmem [shape: bf16[512,128], index: 5, kind: input, shape index: {}]   ;;  %s5501_s6 = inlined_call_operand.vmem [shape: f32[1,128], index: 6, kind: input, shape index: {}]   ;;  %s5502_s7 = inlined_call_operand.hbm [shape: bf16[128,128], index: 7, kind: input, shape index: {}]   ;;  %s5503_s8 = inlined_call_operand.vmem [shape: f32[1,128], index: 8, kind: input, shape index: {}]   ;;  %s5504_s9 = inlined_call_operand.vmem [shape: f32[16,128], index: 9, kind: output, shape index: {}]  }
   0x1   :  { %15 = vsyncpa [#allocation5], 0  ;;  %s3832_s30 = smov [#allocation2]  }
   0x2   :  { %s27_s10 = sshll.u32 %s3832_s30, 4  ;;  %s28_s10 = int_to_ptr.vmem [resolvable:$true] %s27_s10 }
   0x3   :  { %s3796_s11 = scalar_lea.vmem %s28_s10, 10240  ;;  %p3801_p1 = scmp.lt.s32.totalorder %s28_s10, %s28_s10 }
   0x4   :  { %p3797_p0 = scmp.ne.s32.totalorder %s28_s10, %s3796_s11  ;;  %p3802_p2 = scmp.lt.s32.totalorder %s3796_s11, %s3796_s11 }
   0x6   :  { %p3803_p3 = por %p3802_p2, %p3801_p1 }
   0x8   :  { %p3804_p4 = pnand %p3803_p3, %p3797_p0 }
   0xa   :  { %3807 = shalt.err (!%p3804_p4)
}
   0xb   :  { %s3833_s12 = smov 128   ;;  %s3834_s13 = smov 8  }
   0xc   :  { %33 = dma.hbm_to_vmem [thread:$0]  %s5498_s3, 10240, %s28_s10, [#allocation3], %s3833_s12, %s3833_s12, %s3834_s13  }
   0xd   :  { %s3835_s16 = smov [#allocation4]  }
   0xe   :  { %s45_s17 = sshll.u32 %s3835_s16, 4  ;;  %s46_s17 = int_to_ptr.vmem [resolvable:$true] %s45_s17 }
   0xf   :  { %s3816_s18 = scalar_lea.vmem %s46_s17, 1024  ;;  %p3821_p6 = scmp.lt.s32.totalorder %s46_s17, %s46_s17 }
  0x10   :  { %p3817_p5 = scmp.ne.s32.totalorder %s46_s17, %s3816_s18  ;;  %p3822_p7 = scmp.lt.s32.totalorder %s3816_s18, %s3816_s18 }
  0x12   :  { %p3823_p8 = por %p3822_p7, %p3821_p6 }
  0x14   :  { %p3824_p9 = pnand %p3823_p8, %p3817_p5 }
  0x16   :  { %3827 = shalt.err (!%p3824_p9)
}
  0x17   :  { %s3836_s19 = smov 64   ;;  %s3837_s20 = smov 4  }
  0x18   :  { %51 = dma.hbm_to_vmem [thread:$0]  %s5502_s7, 1024, %s46_s17, [#allocation5], %s3836_s19, %s3836_s19, %s3837_s20  }
  0x19   :  { %3828 = dma.done.wait [#allocation3], 10240  }
  0x1a   :  { %3829 = vsyncadd [#allocation3], 4294957056 }
  0x1b   :  { %3830 = dma.done.wait [#allocation5], 1024  }
  0x1c   :  { %3831 = vsyncadd [#allocation5], 4294966272  ;;  %v3472_v0 = vld [vmem:[%s5496_s1 + $0x74] ss:$8 sps:$4 sm:$0xff]   ;;  %v3474_v1 = vld [vmem:[%s5496_s1 + $0x70] ss:$8 sps:$4 sm:$0xff]  }
  0x1d   :  { %777 = vmatprep.subr.bf16.mxu0 %v3472_v0  ;;  %v3475_v2 = vld [vmem:[%s5496_s1 + $0x174] ss:$8 sps:$4 sm:$0xff]   ;;  %v3477_v3 = vld [vmem:[%s5496_s1 + $0x170] ss:$8 sps:$4 sm:$0xff]   ;;  %v3478_v4 = vld [vmem:[%s5496_s1 + $0x64] ss:$8 sps:$4 sm:$0xff]  }
  0x1e   :  { %778 = vmatpush1.bf16.msra.mxu0 %v3474_v1  ;;  %v3480_v5 = vld [vmem:[%s5496_s1 + $0x60] ss:$8 sps:$4 sm:$0xff]   ;;  %1050 = vmatprep.subr.bf16.mxu1 %v3475_v2  ;;  %v3481_v6 = vld [vmem:[%s5496_s1 + $0x164] ss:$8 sps:$4 sm:$0xff]   ;;  %v3484_v8 = vld [vmem:[%s5496_s1 + $0x54] ss:$8 sps:$4 sm:$0xff]  }
  0x1f   :  { %1051 = vmatpush1.bf16.msra.mxu1 %v3477_v3  ;;  %779 = vmatprep.subr.bf16.mxu0 %v3478_v4  ;;  %v3483_v7 = vld [vmem:[%s5496_s1 + $0x160] ss:$8 sps:$4 sm:$0xff]   ;;  %v3486_v9 = vld [vmem:[%s5496_s1 + $0x50] ss:$8 sps:$4 sm:$0xff]   ;;  %v3487_v10 = vld [vmem:[%s5496_s1 + $0x154] ss:$8 sps:$4 sm:$0xff]  }
  0x20   :  { %1052 = vmatprep.subr.bf16.mxu1 %v3481_v6  ;;  %v3490_v11 = vld [vmem:[%s5496_s1 + $0x44] ss:$8 sps:$4 sm:$0xff]   ;;  %v3489_v12 = vld [vmem:[%s5496_s1 + $0x150] ss:$8 sps:$4 sm:$0xff]   ;;  %v3492_v14 = vld [vmem:[%s5496_s1 + $0x40] ss:$8 sps:$4 sm:$0xff]  }
  0x21   :  { %v3493_v13 = vld [vmem:[%s5496_s1 + $0x144] ss:$8 sps:$4 sm:$0xff]   ;;  %v3496_v15 = vld [vmem:[%s5496_s1 + $0x34] ss:$8 sps:$4 sm:$0xff]   ;;  %v3495_v16 = vld [vmem:[%s5496_s1 + $0x140] ss:$8 sps:$4 sm:$0xff]  }
  0x22   :  { %780 = vmatpush1.bf16.msra.mxu0 %v3480_v5  ;;  %v3499_v17 = vld [vmem:[%s5496_s1 + $0x134] ss:$8 sps:$4 sm:$0xff]   ;;  %v3498_v18 = vld [vmem:[%s5496_s1 + $0x30] ss:$8 sps:$4 sm:$0xff]   ;;  %v3502_v19 = vld [vmem:[%s5496_s1 + $0x24] ss:$8 sps:$4 sm:$0xff]  }
  0x23   :  { %781 = vmatprep.subr.bf16.mxu0 %v3484_v8  ;;  %1053 = vmatpush1.bf16.msra.mxu1 %v3483_v7  ;;  %v3501_v20 = vld [vmem:[%s5496_s1 + $0x130] ss:$8 sps:$4 sm:$0xff]   ;;  %v3505_v21 = vld [vmem:[%s5496_s1 + $0x124] ss:$8 sps:$4 sm:$0xff]   ;;  %v3504_v22 = vld [vmem:[%s5496_s1 + $0x20] ss:$8 sps:$4 sm:$0xff]  }
  0x24   :  { %1054 = vmatprep.subr.bf16.mxu1 %v3487_v10  ;;  %v3508_v23 = vld [vmem:[%s5496_s1 + $0x14] ss:$8 sps:$4 sm:$0xff]   ;;  %v3507_v24 = vld [vmem:[%s5496_s1 + $0x120] ss:$8 sps:$4 sm:$0xff]   ;;  %v3510_v26 = vld [vmem:[%s5496_s1 + $0x10] ss:$8 sps:$4 sm:$0xff]  }
  0x25   :  { %v3511_v25 = vld [vmem:[%s5496_s1 + $0x114] ss:$8 sps:$4 sm:$0xff]   ;;  %v3514_v27 = vld [vmem:[%s5496_s1 + $0x4] ss:$8 sps:$4 sm:$0xff]   ;;  %v3513_v28 = vld [vmem:[%s5496_s1 + $0x110] ss:$8 sps:$4 sm:$0xff]  }
  0x26   :  { %782 = vmatpush1.bf16.msra.mxu0 %v3486_v9  ;;  %v3517_v29 = vld [vmem:[%s5496_s1 + $0x104] ss:$8 sps:$4 sm:$0xff]   ;;  %v3516_v30 = vld [vmem:[%s5496_s1] ss:$8 sps:$4 sm:$0xff]   ;;  %v3520_v31 = vld [vmem:[%s5496_s1 + $0xf4] ss:$8 sps:$4 sm:$0xff]  }
  0x27   :  { %783 = vmatprep.subr.bf16.mxu0 %v3490_v11  ;;  %1055 = vmatpush1.bf16.msra.mxu1 %v3489_v12  ;;  %v3519_v32 = vld [vmem:[%s5496_s1 + $0x100] ss:$8 sps:$4 sm:$0xff]   ;;  %v3523_v33 = vld [vmem:[%s5496_s1 + $0x1f4] ss:$8 sps:$4 sm:$0xff]   ;;  %v3522_v34 = vld [vmem:[%s5496_s1 + $0xf0] ss:$8 sps:$4 sm:$0xff]  }
  0x28   :  { %1056 = vmatprep.subr.bf16.mxu1 %v3493_v13  ;;  %v3526_v35 = vld [vmem:[%s5496_s1 + $0xe4] ss:$8 sps:$4 sm:$0xff]   ;;  %v3525_v36 = vld [vmem:[%s5496_s1 + $0x1f0] ss:$8 sps:$4 sm:$0xff]   ;;  %v3528_v38 = vld [vmem:[%s5496_s1 + $0xe0] ss:$8 sps:$4 sm:$0xff]  }
  0x29   :  { %v3529_v37 = vld [vmem:[%s5496_s1 + $0x1e4] ss:$8 sps:$4 sm:$0xff]   ;;  %v3532_v39 = vld [vmem:[%s5496_s1 + $0xd4] ss:$8 sps:$4 sm:$0xff]   ;;  %v3531_v40 = vld [vmem:[%s5496_s1 + $0x1e0] ss:$8 sps:$4 sm:$0xff]  }
  0x2a   :  { %784 = vmatpush1.bf16.msra.mxu0 %v3492_v14  ;;  %v3535_v41 = vld [vmem:[%s5496_s1 + $0x1d4] ss:$8 sps:$4 sm:$0xff]   ;;  %v3534_v42 = vld [vmem:[%s5496_s1 + $0xd0] ss:$8 sps:$4 sm:$0xff]   ;;  %v3538_v43 = vld [vmem:[%s5496_s1 + $0xc4] ss:$8 sps:$4 sm:$0xff]  }
  0x2b   :  { %785 = vmatprep.subr.bf16.mxu0 %v3496_v15  ;;  %1057 = vmatpush1.bf16.msra.mxu1 %v3495_v16  ;;  %v3537_v44 = vld [vmem:[%s5496_s1 + $0x1d0] ss:$8 sps:$4 sm:$0xff]   ;;  %v3541_v45 = vld [vmem:[%s5496_s1 + $0x1c4] ss:$8 sps:$4 sm:$0xff]   ;;  %v3540_v46 = vld [vmem:[%s5496_s1 + $0xc0] ss:$8 sps:$4 sm:$0xff]  }
  0x2c   :  { %1058 = vmatprep.subr.bf16.mxu1 %v3499_v17  ;;  %v3567_v47 = vld [vmem:[%s5495_s0 + $0x8] sm:$0xff]   ;;  %v3544_v48 = vld [vmem:[%s5496_s1 + $0xb4] ss:$8 sps:$4 sm:$0xff]   ;;  %v3546_v52 = vld [vmem:[%s5496_s1 + $0xb0] ss:$8 sps:$4 sm:$0xff]   ;;  %vm3840_vm0 = vmmov 0  }
  0x2d   :  { %v3543_v49 = vld [vmem:[%s5496_s1 + $0x1c0] ss:$8 sps:$4 sm:$0xff]   ;;  %v3547_v50 = vld [vmem:[%s5496_s1 + $0x1b4] ss:$8 sps:$4 sm:$0xff]   ;;  %809 = vmatprep.mubr.bf16.mxu0 %v3567_v47  ;;  %v3550_v53 = vld [vmem:[%s5496_s1 + $0xa4] ss:$8 sps:$4 sm:$0xff]  }
  0x2e   :  { %786 = vmatpush1.bf16.msra.mxu0 %v3498_v18  ;;  %v4053_v51 = vld [vmem:[%s5495_s0 + $0x18] sm:$0xff]   ;;  %v3553_v55 = vld [vmem:[%s5496_s1 + $0x1a4] ss:$8 sps:$4 sm:$0xff]   ;;  %v3552_v56 = vld [vmem:[%s5496_s1 + $0xa0] ss:$8 sps:$4 sm:$0xff]  }
  0x2f   :  { %787 = vmatprep.subr.bf16.mxu0 %v3502_v19  ;;  %1059 = vmatpush1.bf16.msra.mxu1 %v3501_v20  ;;  %v3549_v54 = vld [vmem:[%s5496_s1 + $0x1b0] ss:$8 sps:$4 sm:$0xff]   ;;  %v3556_v57 = vld [vmem:[%s5496_s1 + $0x94] ss:$8 sps:$4 sm:$0xff]   ;;  %v3555_v58 = vld [vmem:[%s5496_s1 + $0x1a0] ss:$8 sps:$4 sm:$0xff]  }
  0x30   :  { %1060 = vmatprep.subr.bf16.mxu1 %v3505_v21  ;;  %1082 = vmatprep.mubr.bf16.mxu1 %v4053_v51  ;;  %v3559_v59 = vld [vmem:[%s5496_s1 + $0x194] ss:$8 sps:$4 sm:$0xff]   ;;  %v3558_v60 = vld [vmem:[%s5496_s1 + $0x90] ss:$8 sps:$4 sm:$0xff]   ;;  %v3562_v61 = vld [vmem:[%s5496_s1 + $0x84] ss:$8 sps:$4 sm:$0xff]  }
  0x31   :  { %v3561_v62 = vld [vmem:[%s5496_s1 + $0x190] ss:$8 sps:$4 sm:$0xff]   ;;  %v3565_v63 = vld [vmem:[%s5496_s1 + $0x184] ss:$8 sps:$4 sm:$0xff]   ;;  %v3564_v0 = vld [vmem:[%s5496_s1 + $0x80] ss:$8 sps:$4 sm:$0xff]  }
  0x32   :  { %788 = vmatpush1.bf16.msra.mxu0 %v3504_v22  ;;  %v3568_v1 = vld [vmem:[%s5496_s1 + $0x180] ss:$8 sps:$4 sm:$0xff]   ;;  %v3572_v2 = vld [vmem:[%s5496_s1 + $0x274] ss:$8 sps:$4 sm:$0xff]   ;;  %v3570_v4 = vld [vmem:[%s5496_s1 + $0x270] ss:$8 sps:$4 sm:$0xff]  }
  0x33   :  { %789 = vmatprep.subr.bf16.mxu0 %v3508_v23  ;;  %1061 = vmatpush1.bf16.msra.mxu1 %v3507_v24  ;;  %v3569_v3 = vld [vmem:[%s5495_s0] sm:$0xff]   ;;  %v3574_v5 = vld [vmem:[%s5495_s0 + $0x10] sm:$0xff]   ;;  %v4134_v12 = vld [vmem:[%s5495_s0 + $0x28] sm:$0xff]  }
  0x34   :  { %1062 = vmatprep.subr.bf16.mxu1 %v3511_v25  ;;  %v3579_v6 = vld [vmem:[%s5496_s1 + $0x264] ss:$8 sps:$4 sm:$0xff]   ;;  %v3577_v8 = vld [vmem:[%s5496_s1 + $0x260] ss:$8 sps:$4 sm:$0xff]   ;;  %v3585_v9 = vld [vmem:[%s5496_s1 + $0x254] ss:$8 sps:$4 sm:$0xff]  }
  0x35   :  { %v4116_v7 = vld [vmem:[%s5495_s0 + $0x20] sm:$0xff]   ;;  %v3583_v10 = vld [vmem:[%s5496_s1 + $0x250] ss:$8 sps:$4 sm:$0xff]   ;;  %v3597_v14 = vld [vmem:[%s5496_s1 + $0x234] ss:$8 sps:$4 sm:$0xff]  }
  0x36   :  { %790 = vmatpush1.bf16.msra.mxu0 %v3510_v26  ;;  %v3591_v11 = vld [vmem:[%s5496_s1 + $0x244] ss:$8 sps:$4 sm:$0xff]   ;;  %v3589_v13 = vld [vmem:[%s5496_s1 + $0x240] ss:$8 sps:$4 sm:$0xff]   ;;  %v3595_v15 = vld [vmem:[%s5496_s1 + $0x230] ss:$8 sps:$4 sm:$0xff]  }
  0x37   :  { %791 = vmatprep.subr.bf16.mxu0 %v3514_v27  ;;  %1063 = vmatpush1.bf16.msra.mxu1 %v3513_v28  ;;  %v3603_v16 = vld [vmem:[%s5496_s1 + $0x224] ss:$8 sps:$4 sm:$0xff]   ;;  %v4154_v17 = vld [vmem:[%s5495_s0 + $0x30] sm:$0xff]   ;;  %v3601_v18 = vld [vmem:[%s5496_s1 + $0x220] ss:$8 sps:$4 sm:$0xff]  }
  0x38   :  { %1064 = vmatprep.subr.bf16.mxu1 %v3517_v29  ;;  %v3609_v19 = vld [vmem:[%s5496_s1 + $0x214] ss:$8 sps:$4 sm:$0xff]   ;;  %v3607_v20 = vld [vmem:[%s5496_s1 + $0x210] ss:$8 sps:$4 sm:$0xff]   ;;  %v4180_v22 = vld [vmem:[%s5495_s0 + $0x40] sm:$0xff]  }
  0x39   :  { %v4171_v21 = vld [vmem:[%s5495_s0 + $0x38] sm:$0xff]   ;;  %v4189_v23 = vld [vmem:[%s5495_s0 + $0x48] sm:$0xff]   ;;  %v4204_v26 = vld [vmem:[%s5495_s0 + $0x50] sm:$0xff]  }
  0x3a   :  { %792 = vmatpush1.bf16.msra.mxu0 %v3516_v30  ;;  %v3613_v24 = vld [vmem:[%s5496_s1 + $0x200] ss:$8 sps:$4 sm:$0xff]   ;;  %v3615_v25 = vld [vmem:[%s5496_s1 + $0x204] ss:$8 sps:$4 sm:$0xff]   ;;  %v4213_v27 = vld [vmem:[%s5495_s0 + $0x58] sm:$0xff]  }
  0x3b   :  { %793 = vmatprep.subr.bf16.mxu0 %v3520_v31  ;;  %1065 = vmatpush1.bf16.msra.mxu1 %v3519_v32  ;;  %v4222_v28 = vld [vmem:[%s5495_s0 + $0x60] sm:$0xff]   ;;  %v4231_v29 = vld [vmem:[%s5495_s0 + $0x68] sm:$0xff]   ;;  %v4240_v30 = vld [vmem:[%s5495_s0 + $0x70] sm:$0xff]  }
  0x3c   :  { %1066 = vmatprep.subr.bf16.mxu1 %v3523_v33  ;;  %v4249_v31 = vld [vmem:[%s5495_s0 + $0x78] sm:$0xff]   ;;  %v4258_v32 = vld [vmem:[%s5495_s0 + $0x80] sm:$0xff]   ;;  %v4267_v33 = vld [vmem:[%s5495_s0 + $0x88] sm:$0xff]  }
  0x3e   :  { %794 = vmatpush2.bf16.msra.mxu0 %v3522_v34  ;;  %v4276_v34 = vld [vmem:[%s5495_s0 + $0x90] sm:$0xff]  }
  0x3f   :  { %795 = vmatprep.subr.bf16.mxu0 %v3526_v35  ;;  %1067 = vmatpush2.bf16.msra.mxu1 %v3525_v36  ;;  %v4285_v35 = vld [vmem:[%s5495_s0 + $0x98] sm:$0xff]   ;;  %v4294_v36 = vld [vmem:[%s5495_s0 + $0xa0] sm:$0xff]  }
  0x40   :  { %1068 = vmatprep.subr.bf16.mxu1 %v3529_v37  ;;  %v4303_v37 = vld [vmem:[%s5495_s0 + $0xa8] sm:$0xff]  }
  0x42   :  { %796 = vmatpush2.bf16.msra.mxu0 %v3528_v38  ;;  %v4312_v38 = vld [vmem:[%s5495_s0 + $0xb0] sm:$0xff]  }
  0x43   :  { %797 = vmatprep.subr.bf16.mxu0 %v3532_v39  ;;  %1069 = vmatpush2.bf16.msra.mxu1 %v3531_v40  ;;  %v4321_v39 = vld [vmem:[%s5495_s0 + $0xb8] sm:$0xff]   ;;  %v4330_v40 = vld [vmem:[%s5495_s0 + $0xc0] sm:$0xff]  }
  0x44   :  { %1070 = vmatprep.subr.bf16.mxu1 %v3535_v41  ;;  %v3619_v41 = vld [vmem:[#allocation2 + $0x70] ss:$8 sps:$4 sm:$0xff]  }
  0x46   :  { %798 = vmatpush2.bf16.msra.mxu0 %v3534_v42  ;;  %v3621_v42 = vld [vmem:[#allocation2 + $0x74] ss:$8 sps:$4 sm:$0xff]  }
  0x47   :  { %799 = vmatprep.subr.bf16.mxu0 %v3538_v43  ;;  %1071 = vmatpush2.bf16.msra.mxu1 %v3537_v44  ;;  %v4339_v43 = vld [vmem:[%s5495_s0 + $0xc8] sm:$0xff]   ;;  %v4348_v44 = vld [vmem:[%s5495_s0 + $0xd0] sm:$0xff]  }
  0x48   :  { %1072 = vmatprep.subr.bf16.mxu1 %v3541_v45  ;;  %v3622_v45 = vld [vmem:[#allocation2 + $0x60] ss:$8 sps:$4 sm:$0xff]  }
  0x4a   :  { %800 = vmatpush2.bf16.msra.mxu0 %v3540_v46  ;;  %v3624_v46 = vld [vmem:[#allocation2 + $0x64] ss:$8 sps:$4 sm:$0xff]  }
  0x4b   :  { %801 = vmatprep.subr.bf16.mxu0 %v3544_v48  ;;  %1073 = vmatpush2.bf16.msra.mxu1 %v3543_v49  ;;  %v3625_v48 = vld [vmem:[#allocation2 + $0x50] ss:$8 sps:$4 sm:$0xff]   ;;  %v3627_v49 = vld [vmem:[#allocation2 + $0x54] ss:$8 sps:$4 sm:$0xff]  }
  0x4c   :  { %1074 = vmatprep.subr.bf16.mxu1 %v3547_v50 }
  0x4e   :  { %802 = vmatpush2.bf16.msra.mxu0 %v3546_v52 }
  0x4f   :  { %803 = vmatprep.subr.bf16.mxu0 %v3550_v53  ;;  %1075 = vmatpush2.bf16.msra.mxu1 %v3549_v54 }
  0x50   :  { %1076 = vmatprep.subr.bf16.mxu1 %v3553_v55 }
  0x52   :  { %804 = vmatpush2.bf16.msra.mxu0 %v3552_v56 }
  0x53   :  { %805 = vmatprep.subr.bf16.mxu0 %v3556_v57  ;;  %1077 = vmatpush2.bf16.msra.mxu1 %v3555_v58  ;;  %v3628_v57 = vld [vmem:[#allocation2 + $0x40] ss:$8 sps:$4 sm:$0xff]   ;;  %v3630_v58 = vld [vmem:[#allocation2 + $0x44] ss:$8 sps:$4 sm:$0xff]  }
  0x54   :  { %1078 = vmatprep.subr.bf16.mxu1 %v3559_v59 }
  0x56   :  { %806 = vmatpush2.bf16.msra.mxu0 %v3558_v60 }
  0x57   :  { %807 = vmatprep.subr.bf16.mxu0 %v3562_v61  ;;  %1079 = vmatpush2.bf16.msra.mxu1 %v3561_v62 }
  0x58   :  { %1080 = vmatprep.subr.bf16.mxu1 %v3565_v63 }
  0x5a   :  { %808 = vmatpush2.bf16.msra.mxu0 %v3564_v0 }
  0x5b   :  { %1323 = vmatprep.subr.bf16.mxu0 %v3572_v2  ;;  %1081 = vmatpush2.bf16.msra.mxu1 %v3568_v1 }
  0x5c   :  { %2268 = vmatprep.subr.bf16.mxu1 %v3621_v42  ;;  %v3637_v42 = vld [vmem:[#allocation2 + $0x10] ss:$8 sps:$4 sm:$0xff]  }
  0x5d   :  { %810 = vmatmul.mubr.bf16.vlgmr.msra.gmra.mxu0 %v3569_v3 }
  0x5e   :  { %1324 = vmatpush1.bf16.msra.mxu0 %v3570_v4  ;;  %819 = vmatprep.mubr.bf16.mxu0 %v3574_v5  ;;  %v3631_v4 = vld [vmem:[#allocation2 + $0x30] ss:$8 sps:$4 sm:$0xff]  }
  0x5f   :  { %1083 = vmatmul.mubr.bf16.vlgmr.msra.gmra.mxu1 %v3574_v5  ;;  %1325 = vmatprep.subr.bf16.mxu0 %v3579_v6 }
  0x60   :  { %1092 = vmatprep.mubr.bf16.mxu1 %v4116_v7  ;;  %2269 = vmatpush1.bf16.msra.mxu1 %v3619_v41 }
  0x61   :  { %2270 = vmatprep.subr.bf16.mxu1 %v3624_v46 }
  0x62   :  { %1326 = vmatpush1.bf16.msra.mxu0 %v3577_v8 }
  0x63   :  { %1327 = vmatprep.subr.bf16.mxu0 %v3585_v9 }
  0x64   :  { %2271 = vmatpush1.bf16.msra.mxu1 %v3622_v45  ;;  %v3639_v45 = vld [vmem:[#allocation2 + $0x14] ss:$8 sps:$4 sm:$0xff]  }
  0x65   :  { %820 = vmatmul.mubr.bf16.gmra.mxu0 %v3567_v47  ;;  %v5505_v47 = vmov 0   ;;  %2272 = vmatprep.subr.bf16.mxu1 %v3627_v49 }
  0x66   :  { %829 = vmatprep.mubr.bf16.mxu0 %v4053_v51  ;;  %1328 = vmatpush1.bf16.msra.mxu0 %v3583_v10 }
  0x67   :  { %1093 = vmatmul.mubr.bf16.gmra.mxu1 %v4053_v51  ;;  %1329 = vmatprep.subr.bf16.mxu0 %v3591_v11 }
  0x68   :  { %1102 = vmatprep.mubr.bf16.mxu1 %v4134_v12  ;;  %2273 = vmatpush1.bf16.msra.mxu1 %v3625_v48 }
  0x69   :  { %2274 = vmatprep.subr.bf16.mxu1 %v3630_v58 }
  0x6a   :  { %1330 = vmatpush1.bf16.msra.mxu0 %v3589_v13 }
  0x6b   :  { %1331 = vmatprep.subr.bf16.mxu0 %v3597_v14 }
  0x6c   :  { %2275 = vmatpush1.bf16.msra.mxu1 %v3628_v57 }
  0x6d   :  { %830 = vmatmul.mubr.bf16.gmra.mxu0 %v3574_v5  ;;  %v3633_v5 = vld [vmem:[#allocation2 + $0x34] ss:$8 sps:$4 sm:$0xff]  }
  0x6e   :  { %839 = vmatprep.mubr.bf16.mxu0 %v4116_v7  ;;  %1332 = vmatpush1.bf16.msra.mxu0 %v3595_v15  ;;  %v3634_v15 = vld [vmem:[#allocation2 + $0x20] ss:$8 sps:$4 sm:$0xff]  }
  0x6f   :  { %1103 = vmatmul.mubr.bf16.gmra.mxu1 %v4116_v7  ;;  %1333 = vmatprep.subr.bf16.mxu0 %v3603_v16  ;;  %v3636_v16 = vld [vmem:[#allocation2 + $0x24] ss:$8 sps:$4 sm:$0xff]  }
  0x70   :  { %1112 = vmatprep.mubr.bf16.mxu1 %v4154_v17  ;;  %2276 = vmatprep.subr.bf16.mxu1 %v3633_v5 }
  0x71   :  { %2277 = vmatpush1.bf16.msra.mxu1 %v3631_v4 }
  0x72   :  { %1334 = vmatpush1.bf16.msra.mxu0 %v3601_v18  ;;  %2278 = vmatprep.subr.bf16.mxu1 %v3636_v16  ;;  %v3640_v16 = vld [vmem:[#allocation2] ss:$8 sps:$4 sm:$0xff]  }
  0x73   :  { %1335 = vmatprep.subr.bf16.mxu0 %v3609_v19 }
  0x75   :  { %840 = vmatmul.mubr.bf16.gmra.mxu0 %v4053_v51  ;;  %2279 = vmatpush1.bf16.msra.mxu1 %v3634_v15 }
  0x76   :  { %849 = vmatprep.mubr.bf16.mxu0 %v4134_v12  ;;  %1336 = vmatpush1.bf16.msra.mxu0 %v3607_v20 }
  0x77   :  { %1113 = vmatmul.mubr.bf16.gmra.mxu1 %v4134_v12  ;;  %1337 = vmatprep.subr.bf16.mxu0 %v3615_v25 }
  0x78   :  { %1122 = vmatprep.mubr.bf16.mxu1 %v4171_v21  ;;  %2280 = vmatprep.subr.bf16.mxu1 %v3639_v45  ;;  %v3642_v45 = vld [vmem:[#allocation2 + $0x4] ss:$8 sps:$4 sm:$0xff]  }
  0x79   :  { %2281 = vmatpush1.bf16.msra.mxu1 %v3637_v42 }
  0x7a   :  { %1338 = vmatpush1.bf16.msra.mxu0 %v3613_v24  ;;  %2282 = vmatprep.subr.bf16.mxu1 %v3642_v45 }
  0x7d   :  { %850 = vmatmul.mubr.bf16.gmra.mxu0 %v4116_v7  ;;  %2283 = vmatpush1.bf16.msra.mxu1 %v3640_v16  ;;  %v3644_v16 = vld [vmem:[#allocation2 + $0xf0] ss:$8 sps:$4 sm:$0xff]  }
  0x7e   :  { %859 = vmatprep.mubr.bf16.mxu0 %v4154_v17 }
  0x7f   :  { %1123 = vmatmul.mubr.bf16.gmra.mxu1 %v4154_v17 }
  0x80   :  { %1132 = vmatprep.mubr.bf16.mxu1 %v4180_v22 }
  0x85   :  { %860 = vmatmul.mubr.bf16.gmra.mxu0 %v4134_v12 }
  0x86   :  { %869 = vmatprep.mubr.bf16.mxu0 %v4171_v21 }
  0x87   :  { %1133 = vmatmul.mubr.bf16.gmra.mxu1 %v4171_v21 }
  0x88   :  { %1142 = vmatprep.mubr.bf16.mxu1 %v4189_v23 }
  0x8d   :  { %870 = vmatmul.mubr.bf16.gmra.mxu0 %v4154_v17 }
  0x8e   :  { %879 = vmatprep.mubr.bf16.mxu0 %v4180_v22 }
  0x8f   :  { %1143 = vmatmul.mubr.bf16.gmra.mxu1 %v4180_v22 }
  0x90   :  { %1152 = vmatprep.mubr.bf16.mxu1 %v4204_v26 }
  0x95   :  { %880 = vmatmul.mubr.bf16.gmra.mxu0 %v4171_v21 }
  0x96   :  { %889 = vmatprep.mubr.bf16.mxu0 %v4189_v23 }
  0x97   :  { %1153 = vmatmul.mubr.bf16.gmra.mxu1 %v4189_v23 }
  0x98   :  { %1162 = vmatprep.mubr.bf16.mxu1 %v4213_v27 }
  0x9d   :  { %890 = vmatmul.mubr.bf16.gmra.mxu0 %v4180_v22 }
  0x9e   :  { %899 = vmatprep.mubr.bf16.mxu0 %v4204_v26 }
  0x9f   :  { %1163 = vmatmul.mubr.bf16.gmra.mxu1 %v4204_v26 }
  0xa0   :  { %1172 = vmatprep.mubr.bf16.mxu1 %v4222_v28 }
  0xa5   :  { %900 = vmatmul.mubr.bf16.gmra.mxu0 %v4189_v23 }
  0xa6   :  { %909 = vmatprep.mubr.bf16.mxu0 %v4213_v27 }
  0xa7   :  { %1173 = vmatmul.mubr.bf16.gmra.mxu1 %v4213_v27 }
  0xa8   :  { %1182 = vmatprep.mubr.bf16.mxu1 %v4231_v29 }
  0xad   :  { %910 = vmatmul.mubr.bf16.gmra.mxu0 %v4204_v26 }
  0xae   :  { %919 = vmatprep.mubr.bf16.mxu0 %v4222_v28 }
  0xaf   :  { %1183 = vmatmul.mubr.bf16.gmra.mxu1 %v4222_v28 }
  0xb0   :  { %1192 = vmatprep.mubr.bf16.mxu1 %v4240_v30 }
  0xb5   :  { %920 = vmatmul.mubr.bf16.gmra.mxu0 %v4213_v27 }
  0xb6   :  { %929 = vmatprep.mubr.bf16.mxu0 %v4231_v29 }
  0xb7   :  { %1193 = vmatmul.mubr.bf16.gmra.mxu1 %v4231_v29 }
  0xb8   :  { %1202 = vmatprep.mubr.bf16.mxu1 %v4249_v31 }
  0xbd   :  { %930 = vmatmul.mubr.bf16.gmra.mxu0 %v4222_v28 }
  0xbe   :  { %939 = vmatprep.mubr.bf16.mxu0 %v4240_v30 }
  0xbf   :  { %1203 = vmatmul.mubr.bf16.gmra.mxu1 %v4240_v30 }
  0xc0   :  { %1212 = vmatprep.mubr.bf16.mxu1 %v4258_v32 }
  0xc5   :  { %940 = vmatmul.mubr.bf16.gmra.mxu0 %v4231_v29 }
  0xc6   :  { %949 = vmatprep.mubr.bf16.mxu0 %v4249_v31 }
  0xc7   :  { %1213 = vmatmul.mubr.bf16.gmra.mxu1 %v4249_v31 }
  0xc8   :  { %1222 = vmatprep.mubr.bf16.mxu1 %v4267_v33 }
  0xcd   :  { %950 = vmatmul.mubr.bf16.gmra.mxu0 %v4240_v30 }
  0xce   :  { %959 = vmatprep.mubr.bf16.mxu0 %v4258_v32 }
  0xcf   :  { %1223 = vmatmul.mubr.bf16.gmra.mxu1 %v4258_v32 }
  0xd0   :  { %1232 = vmatprep.mubr.bf16.mxu1 %v4276_v34 }
  0xd5   :  { %960 = vmatmul.mubr.bf16.gmra.mxu0 %v4249_v31 }
  0xd6   :  { %969 = vmatprep.mubr.bf16.mxu0 %v4267_v33 }
  0xd7   :  { %1233 = vmatmul.mubr.bf16.gmra.mxu1 %v4267_v33 }
  0xd8   :  { %1242 = vmatprep.mubr.bf16.mxu1 %v4285_v35 }
  0xdd   :  { %970 = vmatmul.mubr.bf16.gmra.mxu0 %v4258_v32 }
  0xde   :  { %979 = vmatprep.mubr.bf16.mxu0 %v4276_v34 }
  0xdf   :  { %1243 = vmatmul.mubr.bf16.gmra.mxu1 %v4276_v34 }
  0xe0   :  { %1252 = vmatprep.mubr.bf16.mxu1 %v4294_v36 }
  0xe5   :  { %980 = vmatmul.mubr.bf16.gmra.mxu0 %v4267_v33 }
  0xe6   :  { %989 = vmatprep.mubr.bf16.mxu0 %v4285_v35 }
  0xe7   :  { %1253 = vmatmul.mubr.bf16.gmra.mxu1 %v4285_v35 }
  0xe8   :  { %1262 = vmatprep.mubr.bf16.mxu1 %v4303_v37 }
  0xed   :  { %990 = vmatmul.mubr.bf16.gmra.mxu0 %v4276_v34 }
  0xee   :  { %999 = vmatprep.mubr.bf16.mxu0 %v4294_v36 }
  0xef   :  { %1263 = vmatmul.mubr.bf16.gmra.mxu1 %v4294_v36 }
  0xf0   :  { %1272 = vmatprep.mubr.bf16.mxu1 %v4312_v38 }
  0xf5   :  { %1000 = vmatmul.mubr.bf16.gmra.mxu0 %v4285_v35 }
  0xf6   :  { %1009 = vmatprep.mubr.bf16.mxu0 %v4303_v37 }
  0xf7   :  { %1273 = vmatmul.mubr.bf16.gmra.mxu1 %v4303_v37 }
  0xf8   :  { %1282 = vmatprep.mubr.bf16.mxu1 %v4321_v39 }
  0xfd   :  { %1010 = vmatmul.mubr.bf16.gmra.mxu0 %v4294_v36 }
  0xfe   :  { %1019 = vmatprep.mubr.bf16.mxu0 %v4312_v38 }
  0xff   :  { %1283 = vmatmul.mubr.bf16.gmra.mxu1 %v4312_v38 }
 0x100   :  { %1292 = vmatprep.mubr.bf16.mxu1 %v4330_v40 }
 0x105   :  { %1020 = vmatmul.mubr.bf16.gmra.mxu0 %v4303_v37 }
 0x106   :  { %1029 = vmatprep.mubr.bf16.mxu0 %v4321_v39 }
 0x107   :  { %1293 = vmatmul.mubr.bf16.gmra.mxu1 %v4321_v39 }
 0x108   :  { %1302 = vmatprep.mubr.bf16.mxu1 %v4339_v43 }
 0x10d   :  { %1030 = vmatmul.mubr.bf16.gmra.mxu0 %v4312_v38 }
 0x10e   :  { %1039 = vmatprep.mubr.bf16.mxu0 %v4330_v40 }
 0x10f   :  { %1303 = vmatmul.mubr.bf16.gmra.mxu1 %v4330_v40 }
 0x110   :  { %1312 = vmatprep.mubr.bf16.mxu1 %v4348_v44 }
 0x115   :  { %1040 = vmatmul.mubr.bf16.gmra.mxu0 %v4321_v39 }
 0x116   :  { %1355 = vmatprep.mubr.bf16.mxu0 %v5505_v47 }
 0x117   :  { %1313 = vmatmul.mubr.bf16.gmra.mxu1 %v4339_v43 }
 0x11d   :  { %v4357_v50 = vpop.f32.mrf.mxu0  ;;  %1356 = vmatmul.mubr.bf16.vlgmr.msra.gmra.mxu0 %v4116_v7 }
 0x11e   :  { %1365 = vmatprep.mubr.bf16.mxu0 %v5505_v47 }
 0x11f   :  { %v4361_v51 = vpop.f32.mrf.mxu0  ;;  %v4363_v52 = vpop.f32.mrf.mxu1 }
 0x121   :  { %v4365_v53 = vpop.f32.mrf.mxu0  ;;  %v4367_v54 = vpop.f32.mrf.mxu1 }
 0x123   :  { %v4369_v55 = vpop.f32.mrf.mxu0  ;;  %v4371_v56 = vpop.f32.mrf.mxu1 }
 0x125   :  { %v4373_v59 = vpop.f32.mrf.mxu0  ;;  %1366 = vmatmul.mubr.bf16.gmra.mxu0 %v4134_v12  ;;  %v4376_v60 = vpop.f32.mrf.mxu1 }
 0x126   :  { %1375 = vmatprep.mubr.bf16.mxu0 %v5505_v47 }
 0x127   :  { %v4379_v61 = vpop.f32.mrf.mxu0  ;;  %v4383_v63 = vpop.f32.mrf.mxu1 }
 0x129   :  { %v4381_v62 = vpop.f32.mrf.mxu0  ;;  %v4390_v2 = vpop.f32.mrf.mxu1 }
 0x12b   :  { %v4385_v0 = vpop.f32.mrf.mxu0  ;;  %v4397_v7 = vpop.f32.mrf.mxu1 }
 0x12d   :  { %v4387_v1 = vpop.f32.mrf.mxu0  ;;  %1376 = vmatmul.mubr.bf16.gmra.mxu0 %v4154_v17  ;;  %v4404_v10 = vpop.f32.mrf.mxu1 }
 0x12e   :  { %1385 = vmatprep.mubr.bf16.mxu0 %v5505_v47 }
 0x12f   :  { %v4393_v3 = vpop.f32.mrf.mxu0  ;;  %v4411_v13 = vpop.f32.mrf.mxu1 }
 0x131   :  { %v4395_v6 = vpop.f32.mrf.mxu0  ;;  %v4418_v18 = vpop.f32.mrf.mxu1 }
 0x133   :  { %v4399_v8 = vpop.f32.mrf.mxu0 }
 0x135   :  { %v4401_v9 = vpop.f32.mrf.mxu0  ;;  %1386 = vmatmul.mubr.bf16.gmra.mxu0 %v4171_v21  ;;  %v4425_v21 = vpop.f32.mrf.mxu1 }
 0x136   :  { %1395 = vmatprep.mubr.bf16.mxu0 %v5505_v47 }
 0x137   :  { %v4407_v11 = vpop.f32.mrf.mxu0  ;;  %v4432_v41 = vpop.f32.mrf.mxu1 }
 0x139   :  { %v4409_v12 = vpop.f32.mrf.mxu0  ;;  %v4439_v48 = vpop.f32.mrf.mxu1 }
 0x13b   :  { %v4413_v14 = vpop.f32.mrf.mxu0 }
 0x13d   :  { %v4415_v17 = vpop.f32.mrf.mxu0  ;;  %1396 = vmatmul.mubr.bf16.gmra.mxu0 %v4180_v22 }
 0x13e   :  { %1405 = vmatprep.mubr.bf16.mxu0 %v5505_v47 }
 0x13f   :  { %v4421_v19 = vpop.f32.mrf.mxu0 }
 0x141   :  { %v4423_v20 = vpop.f32.mrf.mxu0 }
 0x143   :  { %v4427_v24 = vpop.f32.mrf.mxu0 }
 0x144   :  { %5513 = vst [vmem:[#allocation8_spill] sm:$0xff] %v4427_v24  ;;  %v3647_v24 = vld [vmem:[#allocation2 + $0xe0] ss:$8 sps:$4 sm:$0xff]  }
 0x145   :  { %v4429_v25 = vpop.f32.mrf.mxu0  ;;  %1406 = vmatmul.mubr.bf16.gmra.mxu0 %v4189_v23  ;;  %v4446_v23 = vpop.f32.mrf.mxu1 }
 0x146   :  { %1415 = vmatprep.mubr.bf16.mxu0 %v5505_v47 }
 0x147   :  { %v4435_v22 = vpop.f32.mrf.mxu0  ;;  %v4453_v5 = vpop.f32.mrf.mxu1 }
 0x149   :  { %v4437_v46 = vpop.f32.mrf.mxu0  ;;  %v4460_v42 = vpop.f32.mrf.mxu1 }
 0x14a   :  { %5514 = vst [vmem:[#allocation9_spill] sm:$0xff] %v4437_v46 }
 0x14b   :  { %v4441_v49 = vpop.f32.mrf.mxu0 }
 0x14c   :  { %5515 = vst [vmem:[#allocation10_spill] sm:$0xff] %v4441_v49 }
 0x14d   :  { %v4443_v57 = vpop.f32.mrf.mxu0  ;;  %1416 = vmatmul.mubr.bf16.gmra.mxu0 %v4204_v26 }
 0x14e   :  { %5516 = vst [vmem:[#allocation11_spill] sm:$0xff] %v4443_v57  ;;  %1425 = vmatprep.mubr.bf16.mxu0 %v5505_v47 }
 0x14f   :  { %v4449_v58 = vpop.f32.mrf.mxu0 }
 0x150   :  { %5517 = vst [vmem:[#allocation12_spill] sm:$0xff] %v4449_v58 }
 0x151   :  { %v4451_v4 = vpop.f32.mrf.mxu0 }
 0x152   :  { %5518 = vst [vmem:[#allocation13_spill] sm:$0xff] %v4451_v4  ;;  %v4467_v4 = vpop.f32.mrf.mxu1 }
 0x153   :  { %v4455_v15 = vpop.f32.mrf.mxu0 }
 0x154   :  { %5519 = vst [vmem:[#allocation14_spill] sm:$0xff] %v4455_v15 }
 0x155   :  { %v4457_v49 = vpop.f32.mrf.mxu0  ;;  %1426 = vmatmul.mubr.bf16.gmra.mxu0 %v4213_v27 }
 0x156   :  { %5520 = vst [vmem:[#allocation15_spill] sm:$0xff] %v4457_v49  ;;  %1435 = vmatprep.mubr.bf16.mxu0 %v5505_v47  ;;  %v4474_v49 = vpop.f32.mrf.mxu1 }
 0x157   :  { %v4463_v26 = vpop.f32.mrf.mxu0  ;;  %5525 = vst [vmem:[#allocation20_spill] sm:$0xff] %v4474_v49 }
 0x158   :  { %5521 = vst [vmem:[#allocation16_spill] sm:$0xff] %v4463_v26  ;;  %v4481_v26 = vpop.f32.mrf.mxu1 }
 0x159   :  { %v4465_v58 = vpop.f32.mrf.mxu0  ;;  %5528 = vst [vmem:[#allocation23_spill] sm:$0xff] %v4481_v26 }
 0x15a   :  { %5522 = vst [vmem:[#allocation17_spill] sm:$0xff] %v4465_v58  ;;  %v3646_v58 = vld [vmem:[#allocation2 + $0xf4] ss:$8 sps:$4 sm:$0xff]  }
 0x15b   :  { %v4469_v57 = vpop.f32.mrf.mxu0  ;;  %2284 = vmatprep.subr.bf16.mxu1 %v3646_v58 }
 0x15c   :  { %5523 = vst [vmem:[#allocation18_spill] sm:$0xff] %v4469_v57  ;;  %2285 = vmatpush2.bf16.msra.mxu1 %v3644_v16 }
 0x15d   :  { %v4471_v15 = vpop.f32.mrf.mxu0  ;;  %1436 = vmatmul.mubr.bf16.gmra.mxu0 %v4222_v28  ;;  %v4488_v28 = vpop.f32.mrf.mxu1 }
 0x15e   :  { %5524 = vst [vmem:[#allocation19_spill] sm:$0xff] %v4471_v15  ;;  %1445 = vmatprep.mubr.bf16.mxu0 %v5505_v47 }
 0x15f   :  { %v4477_v27 = vpop.f32.mrf.mxu0  ;;  %v4495_v26 = vpop.f32.mrf.mxu1 }
 0x160   :  { %5526 = vst [vmem:[#allocation21_spill] sm:$0xff] %v4477_v27 }
 0x161   :  { %v4479_v45 = vpop.f32.mrf.mxu0  ;;  %v4502_v16 = vpop.f32.mrf.mxu1 }
 0x162   :  { %5527 = vst [vmem:[#allocation22_spill] sm:$0xff] %v4479_v45  ;;  %v3649_v45 = vld [vmem:[#allocation2 + $0xe4] ss:$8 sps:$4 sm:$0xff]  }
 0x163   :  { %v4483_v46 = vpop.f32.mrf.mxu0  ;;  %2286 = vmatprep.subr.bf16.mxu1 %v3649_v45 }
 0x164   :  { %5529 = vst [vmem:[#allocation24_spill] sm:$0xff] %v4483_v46  ;;  %2287 = vmatpush2.bf16.msra.mxu1 %v3647_v24  ;;  %v3650_v46 = vld [vmem:[#allocation2 + $0xd0] ss:$8 sps:$4 sm:$0xff]   ;;  %v3653_v24 = vld [vmem:[#allocation2 + $0xc0] ss:$8 sps:$4 sm:$0xff]  }
 0x165   :  { %v4485_v57 = vpop.f32.mrf.mxu0  ;;  %1446 = vmatmul.mubr.bf16.gmra.mxu0 %v4231_v29  ;;  %v3652_v29 = vld [vmem:[#allocation2 + $0xd4] ss:$8 sps:$4 sm:$0xff]  }
 0x166   :  { %5530 = vst [vmem:[#allocation25_spill] sm:$0xff] %v4485_v57  ;;  %1455 = vmatprep.mubr.bf16.mxu0 %v5505_v47  ;;  %2288 = vmatprep.subr.bf16.mxu1 %v3652_v29  ;;  %v3655_v57 = vld [vmem:[#allocation2 + $0xc4] ss:$8 sps:$4 sm:$0xff]  }
 0x167   :  { %v4491_v15 = vpop.f32.mrf.mxu0 }
 0x168   :  { %5531 = vst [vmem:[#allocation26_spill] sm:$0xff] %v4491_v15  ;;  %2289 = vmatpush2.bf16.msra.mxu1 %v3650_v46  ;;  %v3656_v46 = vld [vmem:[#allocation2 + $0xb0] ss:$8 sps:$4 sm:$0xff]  }
 0x169   :  { %v4493_v27 = vpop.f32.mrf.mxu0  ;;  %2290 = vmatprep.subr.bf16.mxu1 %v3655_v57  ;;  %v3659_v57 = vld [vmem:[#allocation2 + $0xa0] ss:$8 sps:$4 sm:$0xff]  }
 0x16a   :  { %5532 = vst [vmem:[#allocation27_spill] sm:$0xff] %v4493_v27 }
 0x16b   :  { %v4497_v49 = vpop.f32.mrf.mxu0 }
 0x16c   :  { %5533 = vst [vmem:[#allocation28_spill] sm:$0xff] %v4497_v49  ;;  %v4509_v49 = vpop.f32.mrf.mxu1  ;;  %2291 = vmatpush2.bf16.msra.mxu1 %v3653_v24 }
 0x16d   :  { %v4499_v58 = vpop.f32.mrf.mxu0  ;;  %1456 = vmatmul.mubr.bf16.gmra.mxu0 %v4240_v30  ;;  %5537 = vst [vmem:[#allocation32_spill] sm:$0xff] %v4509_v49  ;;  %v3661_v49 = vld [vmem:[#allocation2 + $0xa4] ss:$8 sps:$4 sm:$0xff]  }
 0x16e   :  { %5534 = vst [vmem:[#allocation29_spill] sm:$0xff] %v4499_v58  ;;  %1465 = vmatprep.mubr.bf16.mxu0 %v5505_v47  ;;  %v3658_v47 = vld [vmem:[#allocation2 + $0xb4] ss:$8 sps:$4 sm:$0xff]   ;;  %v4516_v58 = vpop.f32.mrf.mxu1 }
 0x16f   :  { %v4505_v15 = vpop.f32.mrf.mxu0  ;;  %5540 = vst [vmem:[#allocation35_spill] sm:$0xff] %v4516_v58  ;;  %2292 = vmatprep.subr.bf16.mxu1 %v3658_v47  ;;  %v3662_v47 = vld [vmem:[#allocation2 + $0x90] ss:$8 sps:$4 sm:$0xff]  }
 0x170   :  { %5535 = vst [vmem:[#allocation30_spill] sm:$0xff] %v4505_v15  ;;  %v5541_v15 = vmov 0   ;;  %2293 = vmatpush2.bf16.msra.mxu1 %v3656_v46 }
 0x171   :  { %v4507_v27 = vpop.f32.mrf.mxu0  ;;  %2294 = vmatprep.subr.bf16.mxu1 %v3661_v49  ;;  %v3665_v49 = vld [vmem:[#allocation2 + $0x80] ss:$8 sps:$4 sm:$0xff]  }
 0x172   :  { %5536 = vst [vmem:[#allocation31_spill] sm:$0xff] %v4507_v27 }
 0x173   :  { %v4511_v45 = vpop.f32.mrf.mxu0 }
 0x174   :  { %5538 = vst [vmem:[#allocation33_spill] sm:$0xff] %v4511_v45  ;;  %v4523_v45 = vpop.f32.mrf.mxu1  ;;  %2295 = vmatpush2.bf16.msra.mxu1 %v3659_v57 }
 0x175   :  { %v4513_v30 = vpop.f32.mrf.mxu0  ;;  %1466 = vmatmul.mubr.bf16.gmra.mxu0 %v4249_v31 }
 0x176   :  { %5539 = vst [vmem:[#allocation34_spill] sm:$0xff] %v4513_v30  ;;  %1475 = vmatprep.mubr.bf16.mxu0 %v5541_v15  ;;  %v3664_v30 = vld [vmem:[#allocation2 + $0x94] ss:$8 sps:$4 sm:$0xff]   ;;  %v4530_v58 = vpop.f32.mrf.mxu1 }
 0x177   :  { %v4519_v29 = vpop.f32.mrf.mxu0  ;;  %2296 = vmatprep.subr.bf16.mxu1 %v3664_v30 }
 0x178   :  { %5542 = vst [vmem:[#allocation36_spill] sm:$0xff] %v4519_v29  ;;  %2297 = vmatpush2.bf16.msra.mxu1 %v3662_v47  ;;  %v3667_v29 = vld [vmem:[#allocation2 + $0x84] ss:$8 sps:$4 sm:$0xff]  }
 0x179   :  { %v4521_v27 = vpop.f32.mrf.mxu0  ;;  %2298 = vmatprep.subr.bf16.mxu1 %v3667_v29 }
 0x17a   :  { %5543 = vst [vmem:[#allocation37_spill] sm:$0xff] %v4521_v27 }
 0x17b   :  { %v4525_v24 = vpop.f32.mrf.mxu0 }
 0x17c   :  { %5544 = vst [vmem:[#allocation38_spill] sm:$0xff] %v4525_v24  ;;  %v4537_v24 = vpop.f32.mrf.mxu1  ;;  %2299 = vmatpush2.bf16.msra.mxu1 %v3665_v49 }
 0x17d   :  { %v4527_v31 = vpop.f32.mrf.mxu0  ;;  %1476 = vmatmul.mubr.bf16.gmra.mxu0 %v4258_v32  ;;  %5548 = vst [vmem:[#allocation42_spill] sm:$0xff] %v4537_v24 }
 0x17e   :  { %5545 = vst [vmem:[#allocation39_spill] sm:$0xff] %v4527_v31  ;;  %1485 = vmatprep.mubr.bf16.mxu0 %v5541_v15  ;;  %v4544_v31 = vpop.f32.mrf.mxu1 }
 0x17f   :  { %v4533_v46 = vpop.f32.mrf.mxu0 }
 0x180   :  { %5546 = vst [vmem:[#allocation40_spill] sm:$0xff] %v4533_v46 }
 0x181   :  { %v4535_v27 = vpop.f32.mrf.mxu0 }
 0x182   :  { %5547 = vst [vmem:[#allocation41_spill] sm:$0xff] %v4535_v27  ;;  %v4551_v27 = vpop.f32.mrf.mxu1 }
 0x183   :  { %v4539_v57 = vpop.f32.mrf.mxu0 }
 0x184   :  { %5549 = vst [vmem:[#allocation43_spill] sm:$0xff] %v4539_v57  ;;  %v4558_v29 = vpop.f32.mrf.mxu1 }
 0x185   :  { %v4541_v32 = vpop.f32.mrf.mxu0  ;;  %1486 = vmatmul.mubr.bf16.gmra.mxu0 %v4267_v33 }
 0x186   :  { %5550 = vst [vmem:[#allocation44_spill] sm:$0xff] %v4541_v32  ;;  %1495 = vmatprep.mubr.bf16.mxu0 %v5541_v15  ;;  %v4565_v57 = vpop.f32.mrf.mxu1 }
 0x187   :  { %v4547_v30 = vpop.f32.mrf.mxu0 }
 0x188   :  { %5551 = vst [vmem:[#allocation45_spill] sm:$0xff] %v4547_v30 }
 0x189   :  { %v4549_v47 = vpop.f32.mrf.mxu0 }
 0x18a   :  { %5552 = vst [vmem:[#allocation46_spill] sm:$0xff] %v4549_v47 }
 0x18b   :  { %v4553_v46 = vpop.f32.mrf.mxu0 }
 0x18c   :  { %5553 = vst [vmem:[#allocation47_spill] sm:$0xff] %v4553_v46  ;;  %v4572_v46 = vpop.f32.mrf.mxu1 }
 0x18d   :  { %v4555_v24 = vpop.f32.mrf.mxu0  ;;  %1496 = vmatmul.mubr.bf16.gmra.mxu0 %v4276_v34  ;;  %5559 = vst [vmem:[#allocation53_spill] sm:$0xff] %v4572_v46 }
 0x18e   :  { %5554 = vst [vmem:[#allocation48_spill] sm:$0xff] %v4555_v24  ;;  %1505 = vmatprep.mubr.bf16.mxu0 %v5541_v15  ;;  %v4579_v32 = vpop.f32.mrf.mxu1 }
 0x18f   :  { %v4561_v33 = vpop.f32.mrf.mxu0  ;;  %5562 = vst [vmem:[#allocation56_spill] sm:$0xff] %v4579_v32 }
 0x190   :  { %5555 = vst [vmem:[#allocation49_spill] sm:$0xff] %v4561_v33 }
 0x191   :  { %v4563_v49 = vpop.f32.mrf.mxu0 }
 0x192   :  { %5556 = vst [vmem:[#allocation50_spill] sm:$0xff] %v4563_v49 }
 0x193   :  { %v4567_v30 = vpop.f32.mrf.mxu0 }
 0x194   :  { %5557 = vst [vmem:[#allocation51_spill] sm:$0xff] %v4567_v30  ;;  %v4586_v30 = vpop.f32.mrf.mxu1 }
 0x195   :  { %v4569_v47 = vpop.f32.mrf.mxu0  ;;  %1506 = vmatmul.mubr.bf16.gmra.mxu0 %v4285_v35  ;;  %5565 = vst [vmem:[#allocation59_spill] sm:$0xff] %v4586_v30 }
 0x196   :  { %5558 = vst [vmem:[#allocation52_spill] sm:$0xff] %v4569_v47  ;;  %1515 = vmatprep.mubr.bf16.mxu0 %v5541_v15  ;;  %v4593_v46 = vpop.f32.mrf.mxu1 }
 0x197   :  { %v4575_v34 = vpop.f32.mrf.mxu0  ;;  %5568 = vst [vmem:[#allocation62_spill] sm:$0xff] %v4593_v46 }
 0x198   :  { %5560 = vst [vmem:[#allocation54_spill] sm:$0xff] %v4575_v34 }
 0x199   :  { %v4577_v24 = vpop.f32.mrf.mxu0 }
 0x19a   :  { %5561 = vst [vmem:[#allocation55_spill] sm:$0xff] %v4577_v24 }
 0x19b   :  { %v4581_v33 = vpop.f32.mrf.mxu0 }
 0x19c   :  { %5563 = vst [vmem:[#allocation57_spill] sm:$0xff] %v4581_v33  ;;  %v4600_v33 = vpop.f32.mrf.mxu1 }
 0x19d   :  { %v4583_v49 = vpop.f32.mrf.mxu0  ;;  %1516 = vmatmul.mubr.bf16.gmra.mxu0 %v4294_v36  ;;  %5571 = vst [vmem:[#allocation65_spill] sm:$0xff] %v4600_v33 }
 0x19e   :  { %5564 = vst [vmem:[#allocation58_spill] sm:$0xff] %v4583_v49  ;;  %1525 = vmatprep.mubr.bf16.mxu0 %v5541_v15  ;;  %v4607_v30 = vpop.f32.mrf.mxu1 }
 0x19f   :  { %v4589_v35 = vpop.f32.mrf.mxu0  ;;  %5574 = vst [vmem:[#allocation68_spill] sm:$0xff] %v4607_v30 }
 0x1a0   :  { %5566 = vst [vmem:[#allocation60_spill] sm:$0xff] %v4589_v35 }
 0x1a1   :  { %v4591_v47 = vpop.f32.mrf.mxu0 }
 0x1a2   :  { %5567 = vst [vmem:[#allocation61_spill] sm:$0xff] %v4591_v47 }
 0x1a3   :  { %v4595_v34 = vpop.f32.mrf.mxu0 }
 0x1a4   :  { %5569 = vst [vmem:[#allocation63_spill] sm:$0xff] %v4595_v34  ;;  %v4614_v34 = vpop.f32.mrf.mxu1 }
 0x1a5   :  { %v4597_v24 = vpop.f32.mrf.mxu0  ;;  %1526 = vmatmul.mubr.bf16.gmra.mxu0 %v4303_v37  ;;  %5577 = vst [vmem:[#allocation71_spill] sm:$0xff] %v4614_v34 }
 0x1a6   :  { %5570 = vst [vmem:[#allocation64_spill] sm:$0xff] %v4597_v24  ;;  %1535 = vmatprep.mubr.bf16.mxu0 %v5541_v15  ;;  %v4621_v33 = vpop.f32.mrf.mxu1 }
 0x1a7   :  { %v4603_v36 = vpop.f32.mrf.mxu0  ;;  %5580 = vst [vmem:[#allocation74_spill] sm:$0xff] %v4621_v33 }
 0x1a8   :  { %5572 = vst [vmem:[#allocation66_spill] sm:$0xff] %v4603_v36 }
 0x1a9   :  { %v4605_v49 = vpop.f32.mrf.mxu0 }
 0x1aa   :  { %5573 = vst [vmem:[#allocation67_spill] sm:$0xff] %v4605_v49 }
 0x1ab   :  { %v4609_v35 = vpop.f32.mrf.mxu0 }
 0x1ac   :  { %5575 = vst [vmem:[#allocation69_spill] sm:$0xff] %v4609_v35  ;;  %v4628_v35 = vpop.f32.mrf.mxu1 }
 0x1ad   :  { %v4611_v47 = vpop.f32.mrf.mxu0  ;;  %1536 = vmatmul.mubr.bf16.gmra.mxu0 %v4312_v38  ;;  %5583 = vst [vmem:[#allocation77_spill] sm:$0xff] %v4628_v35 }
 0x1ae   :  { %5576 = vst [vmem:[#allocation70_spill] sm:$0xff] %v4611_v47  ;;  %1545 = vmatprep.mubr.bf16.mxu0 %v5541_v15  ;;  %v4635_v34 = vpop.f32.mrf.mxu1 }
 0x1af   :  { %v4617_v37 = vpop.f32.mrf.mxu0  ;;  %5586 = vst [vmem:[#allocation80_spill] sm:$0xff] %v4635_v34 }
 0x1b0   :  { %5578 = vst [vmem:[#allocation72_spill] sm:$0xff] %v4617_v37 }
 0x1b1   :  { %v4619_v24 = vpop.f32.mrf.mxu0 }
 0x1b2   :  { %5579 = vst [vmem:[#allocation73_spill] sm:$0xff] %v4619_v24 }
 0x1b3   :  { %v4623_v36 = vpop.f32.mrf.mxu0 }
 0x1b4   :  { %5581 = vst [vmem:[#allocation75_spill] sm:$0xff] %v4623_v36  ;;  %v3670_v36 = vld [vmem:[#allocation2 + $0x174] ss:$8 sps:$4 sm:$0xff]  }
 0x1b5   :  { %v4625_v49 = vpop.f32.mrf.mxu0  ;;  %1546 = vmatmul.mubr.bf16.gmra.mxu0 %v4321_v39  ;;  %2381 = vmatprep.subr.bf16.mxu1 %v3670_v36 }
 0x1b6   :  { %5582 = vst [vmem:[#allocation76_spill] sm:$0xff] %v4625_v49  ;;  %1555 = vmatprep.mubr.bf16.mxu0 %v5541_v15  ;;  %v4642_v49 = vpop.f32.mrf.mxu1 }
 0x1b7   :  { %v4631_v38 = vpop.f32.mrf.mxu0  ;;  %5589 = vst [vmem:[#allocation83_spill] sm:$0xff] %v4642_v49 }
 0x1b8   :  { %5584 = vst [vmem:[#allocation78_spill] sm:$0xff] %v4631_v38  ;;  %v4649_v38 = vpop.f32.mrf.mxu1 }
 0x1b9   :  { %v4633_v47 = vpop.f32.mrf.mxu0  ;;  %5592 = vst [vmem:[#allocation86_spill] sm:$0xff] %v4649_v38 }
 0x1ba   :  { %5585 = vst [vmem:[#allocation79_spill] sm:$0xff] %v4633_v47 }
 0x1bb   :  { %v4637_v37 = vpop.f32.mrf.mxu0 }
 0x1bc   :  { %5587 = vst [vmem:[#allocation81_spill] sm:$0xff] %v4637_v37 }
 0x1bd   :  { %v4639_v24 = vpop.f32.mrf.mxu0  ;;  %1556 = vmatmul.mubr.bf16.gmra.mxu0 %v4330_v40 }
 0x1be   :  { %5588 = vst [vmem:[#allocation82_spill] sm:$0xff] %v4639_v24  ;;  %1565 = vmatprep.mubr.bf16.mxu0 %v5541_v15  ;;  %v4656_v24 = vpop.f32.mrf.mxu1 }
 0x1bf   :  { %v4645_v39 = vpop.f32.mrf.mxu0  ;;  %5595 = vst [vmem:[#allocation89_spill] sm:$0xff] %v4656_v24 }
 0x1c0   :  { %5590 = vst [vmem:[#allocation84_spill] sm:$0xff] %v4645_v39  ;;  %v4663_v39 = vpop.f32.mrf.mxu1 }
 0x1c1   :  { %v4647_v35 = vpop.f32.mrf.mxu0  ;;  %5598 = vst [vmem:[#allocation92_spill] sm:$0xff] %v4663_v39 }
 0x1c2   :  { %5591 = vst [vmem:[#allocation85_spill] sm:$0xff] %v4647_v35 }
 0x1c3   :  { %v4651_v47 = vpop.f32.mrf.mxu0 }
 0x1c4   :  { %5593 = vst [vmem:[#allocation87_spill] sm:$0xff] %v4651_v47  ;;  %v5508_v47 = vlaneseq }
 0x1c5   :  { %v4653_v34 = vpop.f32.mrf.mxu0  ;;  %1566 = vmatmul.mubr.bf16.gmra.mxu0 %v4339_v43 }
 0x1c6   :  { %5594 = vst [vmem:[#allocation88_spill] sm:$0xff] %v4653_v34  ;;  %1575 = vmatprep.mubr.bf16.mxu0 %v5541_v15  ;;  %v4670_v34 = vpop.f32.mrf.mxu1 }
 0x1c7   :  { %v4659_v40 = vpop.f32.mrf.mxu0  ;;  %5601 = vst [vmem:[#allocation95_spill] sm:$0xff] %v4670_v34 }
 0x1c8   :  { %5596 = vst [vmem:[#allocation90_spill] sm:$0xff] %v4659_v40  ;;  %v4681_v40 = vshrl.u32 %v5508_v47, 7 }
 0x1c9   :  { %v4661_v37 = vpop.f32.mrf.mxu0 }
 0x1ca   :  { %5597 = vst [vmem:[#allocation91_spill] sm:$0xff] %v4661_v37  ;;  %v3643_v37 = vld [vmem:[%s5495_s0 + $0xd8] sm:$0xff]   ;;  %5604 = vst [vmem:[#allocation98_spill] sm:$0xff] %v4681_v40 }
 0x1cb   :  { %v4665_v36 = vpop.f32.mrf.mxu0 }
 0x1cc   :  { %5599 = vst [vmem:[#allocation93_spill] sm:$0xff] %v4665_v36  ;;  %v4683_v36 = vpop.f32.mrf.mxu1 }
 0x1cd   :  { %v4667_v35 = vpop.f32.mrf.mxu0  ;;  %1576 = vmatmul.mubr.bf16.gmra.mxu0 %v4348_v44  ;;  %5605 = vst [vmem:[#allocation99_spill] sm:$0xff] %v4683_v36 }
 0x1ce   :  { %5600 = vst [vmem:[#allocation94_spill] sm:$0xff] %v4667_v35  ;;  %1585 = vmatprep.mubr.bf16.mxu0 %v5541_v15  ;;  %v5509_v15 = vsub.s32 0, %v4681_v40  ;;  %v4690_v34 = vpop.f32.mrf.mxu1 }
 0x1cf   :  { %v4673_v43 = vpop.f32.mrf.mxu0  ;;  %5608 = vst [vmem:[#allocation102_spill] sm:$0xff] %v4690_v34 }
 0x1d0   :  { %5602 = vst [vmem:[#allocation96_spill] sm:$0xff] %v4673_v43  ;;  %v5512_v43 = vsub.s32 1, %v4681_v40 }
 0x1d1   :  { %v4675_v24 = vpop.f32.mrf.mxu0 }
 0x1d2   :  { %5603 = vst [vmem:[#allocation97_spill] sm:$0xff] %v4675_v24  ;;  %v365_v24 = vld [vmem:[%s5497_s2] sm:$0x3] }
 0x1d3   :  { %v4685_v35 = vpop.f32.mrf.mxu0 }
 0x1d4   :  { %5606 = vst [vmem:[#allocation100_spill] sm:$0xff] %v4685_v35  ;;  %v4702_v35 = vrot.slane %v365_v24, %v5509_v15 }
 0x1d5   :  { %v4687_v44 = vpop.f32.mrf.mxu0  ;;  %1586 = vmatmul.mubr.bf16.gmra.mxu0 %v3643_v37  ;;  %v4708_v37 = vrot.slane %v365_v24, %v5512_v43 }
 0x1d6   :  { %5607 = vst [vmem:[#allocation101_spill] sm:$0xff] %v4687_v44  ;;  %v4704_v44 = vpop.f32.mrf.mxu1  ;;  %v812_v39 = vadd.f32 %v4357_v50, %v4702_v35  ;;  %v822_v15 = vadd.f32 %v4373_v59, %v4702_v35  ;;  %v816_v24 = vadd.f32 %v4365_v53, %v4702_v35 }
 0x1d7   :  { %v4696_v38 = vpop.f32.mrf.mxu0  ;;  %5611 = vst [vmem:[#allocation105_spill] sm:$0xff] %v4704_v44  ;;  %v824_v43 = vadd.f32 %v4379_v61, %v4708_v37  ;;  %v828_v53 = vadd.f32 %v4385_v0, %v4708_v37 }
 0x1d8   :  { %5609 = vst [vmem:[#allocation103_spill] sm:$0xff] %v4696_v38  ;;  %v4714_v49 = vpop.f32.mrf.mxu1  ;;  %v1085_v40 = vadd.f32 %v4363_v52, %v812_v39  ;;  %v1095_v33 = vadd.f32 %v4383_v63, %v822_v15  ;;  %v1089_v61 = vadd.f32 %v4371_v56, %v816_v24 }
 0x1d9   :  { %v4698_v47 = vpop.f32.mrf.mxu0  ;;  %5613 = vst [vmem:[#allocation107_spill] sm:$0xff] %v4714_v49  ;;  %v826_v49 = vadd.f32 %v4381_v62, %v4702_v35  ;;  %v1101_v0 = vadd.f32 %v4404_v10, %v828_v53 }
 0x1da   :  { %5610 = vst [vmem:[#allocation104_spill] sm:$0xff] %v4698_v47  ;;  %v814_v47 = vadd.f32 %v4361_v51, %v4708_v37  ;;  %v818_v51 = vadd.f32 %v4369_v55, %v4708_v37 }
 0x1db   :  { %v4710_v34 = vpop.f32.mrf.mxu0  ;;  %v1099_v62 = vadd.f32 %v4397_v7, %v826_v49  ;;  %v832_v49 = vadd.f32 %v4387_v1, %v4702_v35  ;;  %v836_v1 = vadd.f32 %v4395_v6, %v4702_v35 }
 0x1dc   :  { %5612 = vst [vmem:[#allocation106_spill] sm:$0xff] %v4710_v34  ;;  %v4725_v34 = vpop.f32.mrf.mxu1  ;;  %v1087_v50 = vadd.f32 %v4367_v54, %v814_v47  ;;  %v1091_v55 = vadd.f32 %v4376_v60, %v818_v51 }
 0x1dd   :  { %v1357_v36 = vpop.f32.mrf.mxu0  ;;  %5614 = vst [vmem:[#allocation108_spill] sm:$0xff] %v4725_v34  ;;  %v1097_v34 = vadd.f32 %v4390_v2, %v824_v43 }
 0x1de   :  { %v1358_v52 = vadd.f32 %v1357_v36, %v1085_v40  ;;  %v4737_v54 = vpop.f32.mrf.mxu1 }
 0x1df   :  { %v1359_v38 = vpop.f32.mrf.mxu0 }
 0x1e0   :  { %v1360_v39 = vadd.f32 %v1359_v38, %v1087_v50  ;;  %v1596_v32 = vmax.f32 %v1358_v52, 0.0  ;;  %v4742_v50 = vpop.f32.mrf.mxu1 }
 0x1e1   :  { %v1361_v44 = vpop.f32.mrf.mxu0 }
 0x1e2   :  { %v1362_v63 = vadd.f32 %v1361_v44, %v1089_v61  ;;  %v1597_v38 = vmax.f32 %v1360_v39, 0.0  ;;  %v842_v39 = vadd.f32 %v4401_v9, %v4702_v35  ;;  %v846_v9 = vadd.f32 %v4409_v12, %v4702_v35 }
 0x1e3   :  { %v1363_v59 = vpop.f32.mrf.mxu0 }
 0x1e4   :  { %v1364_v56 = vadd.f32 %v1363_v59, %v1091_v55  ;;  %v1105_v55 = vadd.f32 %v4411_v13, %v832_v49  ;;  %v1115_v13 = vadd.f32 %v4439_v48, %v842_v39 }
 0x1e5   :  { %v1367_v46 = vpop.f32.mrf.mxu0 }
 0x1e6   :  { %v1368_v47 = vadd.f32 %v1367_v46, %v1095_v33  ;;  %v1598_v33 = vmax.f32 %v1362_v63, 0.0  ;;  %v1599_v10 = vmax.f32 %v1364_v56, 0.0 }
 0x1e7   :  { %v1369_v30 = vpop.f32.mrf.mxu0 }
 0x1e8   :  { %v1600_v15 = vmax.f32 %v1368_v47, 0.0  ;;  %v1370_v40 = vadd.f32 %v1369_v30, %v1097_v34  ;;  %v4746_v30 = vpop.f32.mrf.mxu1 }
 0x1e9   :  { %v1371_v36 = vpop.f32.mrf.mxu0 }
 0x1ea   :  { %v1692_v2 = vmax.f32 %v1596_v32, %v1600_v15  ;;  %v1601_v43 = vmax.f32 %v1370_v40, 0.0  ;;  %v1372_v24 = vadd.f32 %v1371_v36, %v1099_v62  ;;  %v834_v32 = vadd.f32 %v4393_v3, %v4708_v37  ;;  %v4757_v63 = vpop.f32.mrf.mxu1 }
 0x1eb   :  { %v1373_v46 = vpop.f32.mrf.mxu0  ;;  %v844_v62 = vadd.f32 %v4407_v11, %v4708_v37  ;;  %v838_v3 = vadd.f32 %v4399_v8, %v4708_v37  ;;  %v848_v11 = vadd.f32 %v4413_v14, %v4708_v37 }
 0x1ec   :  { %v1693_v60 = vmax.f32 %v1597_v38, %v1601_v43  ;;  %v1602_v51 = vmax.f32 %v1372_v24, 0.0  ;;  %v1374_v7 = vadd.f32 %v1373_v46, %v1101_v0  ;;  %v1107_v40 = vadd.f32 %v4418_v18, %v834_v32  ;;  %v4771_v43 = vpop.f32.mrf.mxu1 }
 0x1ed   :  { %v1377_v44 = vpop.f32.mrf.mxu0  ;;  %v1117_v18 = vadd.f32 %v4446_v23, %v844_v62  ;;  %v1111_v12 = vadd.f32 %v4432_v41, %v838_v3  ;;  %v1119_v24 = vadd.f32 %v4453_v5, %v846_v9  ;;  %v1121_v14 = vadd.f32 %v4460_v42, %v848_v11 }
 0x1ee   :  { %v1740_v34 = vmax.f32 %v1692_v2, %v1693_v60  ;;  %v1694_v52 = vmax.f32 %v1598_v33, %v1602_v51  ;;  %v1603_v53 = vmax.f32 %v1374_v7, 0.0  ;;  %v1378_v6 = vadd.f32 %v1377_v44, %v1105_v55  ;;  %v4776_v44 = vpop.f32.mrf.mxu1 }
 0x1ef   :  { %v1379_v59 = vpop.f32.mrf.mxu0  ;;  %v1109_v2 = vadd.f32 %v4425_v21, %v836_v1  ;;  %v854_v62 = vadd.f32 %v4421_v19, %v4708_v37  ;;  %v5616_v19 = vld [vmem:[#allocation8_spill] sm:$0xff] }
 0x1f0   :  { %v1695_v61 = vmax.f32 %v1599_v10, %v1603_v53  ;;  %v1380_v36 = vadd.f32 %v1379_v59, %v1107_v40  ;;  %v1604_v46 = vmax.f32 %v1378_v6, 0.0  ;;  %v852_v59 = vadd.f32 %v4415_v17, %v4702_v35 }
 0x1f1   :  { %v1381_v47 = vpop.f32.mrf.mxu0  ;;  %v862_v40 = vadd.f32 %v4429_v25, %v4702_v35  ;;  %v856_v17 = vadd.f32 %v4423_v20, %v4702_v35  ;;  %v5617_v25 = vld [vmem:[#allocation9_spill] sm:$0xff]  ;;  %v3668_v20 = vld [vmem:[#allocation2 + $0x170] ss:$8 sps:$4 sm:$0xff]  }
 0x1f2   :  { %v1741_v15 = vmax.f32 %v1694_v52, %v1695_v61  ;;  %v1382_v33 = vadd.f32 %v1381_v47, %v1109_v2  ;;  %v1605_v7 = vmax.f32 %v1380_v36, 0.0  ;;  %v4780_v61 = vpop.f32.mrf.mxu1  ;;  %v5615_v36 = vld [vmem:[#allocation20_spill] sm:$0xff]  ;;  %v858_v2 = vadd.f32 %v5616_v19, %v4708_v37 }
 0x1f3   :  { %v1383_v0 = vpop.f32.mrf.mxu0 }
 0x1f4   :  { %v4765_v38 = vpack.c.bf16 %v1741_v15, %v1740_v34  ;;  %v1384_v21 = vadd.f32 %v1383_v0, %v1111_v12  ;;  %v1606_v53 = vmax.f32 %v1382_v33, 0.0  ;;  %v1125_v0 = vadd.f32 %v4467_v4, %v852_v59  ;;  %v4791_v6 = vpop.f32.mrf.mxu1  ;;  %v5621_v59 = vld [vmem:[#allocation35_spill] sm:$0xff] }
 0x1f5   :  { %v1387_v56 = vpop.f32.mrf.mxu0  ;;  %v1135_v4 = vadd.f32 %v4495_v26, %v862_v40  ;;  %v1131_v26 = vadd.f32 %v4488_v28, %v858_v2 }
 0x1f6   :  { %v1388_v8 = vadd.f32 %v1387_v56, %v1115_v13  ;;  %v1607_v42 = vmax.f32 %v1384_v21, 0.0  ;;  %v864_v13 = vadd.f32 %v4435_v22, %v4708_v37  ;;  %v1127_v56 = vadd.f32 %v5615_v36, %v854_v62  ;;  %v5618_v22 = vld [vmem:[#allocation10_spill] sm:$0xff] }
 0x1f7   :  { %v1389_v48 = vpop.f32.mrf.mxu0 }
 0x1f8   :  { %v1608_v60 = vmax.f32 %v1388_v8, 0.0  ;;  %v1390_v51 = vadd.f32 %v1389_v48, %v1117_v18  ;;  %v866_v18 = vadd.f32 %v5617_v25, %v4702_v35  ;;  %v868_v48 = vadd.f32 %v5618_v22, %v4708_v37  ;;  %v5624_v22 = vld [vmem:[#allocation15_spill] sm:$0xff] }
 0x1f9   :  { %v1391_v49 = vpop.f32.mrf.mxu0 }
 0x1fa   :  { %v1696_v23 = vmax.f32 %v1604_v46, %v1608_v60  ;;  %v1609_v10 = vmax.f32 %v1390_v51, 0.0  ;;  %v1392_v34 = vadd.f32 %v1391_v49, %v1119_v24  ;;  %v3673_v60 = vld [vmem:[#allocation2 + $0x164] ss:$8 sps:$4 sm:$0xff]   ;;  %v5619_v51 = vld [vmem:[#allocation23_spill] sm:$0xff]  ;;  %v4805_v49 = vpop.f32.mrf.mxu1 }
 0x1fb   :  { %v1393_v52 = vpop.f32.mrf.mxu0 }
 0x1fc   :  { %v1697_v41 = vmax.f32 %v1605_v7, %v1609_v10  ;;  %v1610_v32 = vmax.f32 %v1392_v34, 0.0  ;;  %v1394_v5 = vadd.f32 %v1393_v52, %v1121_v14  ;;  %v1129_v14 = vadd.f32 %v5619_v51, %v856_v17  ;;  %v3674_v17 = vld [vmem:[#allocation2 + $0x150] ss:$8 sps:$4 sm:$0xff]   ;;  %v3682_v51 = vld [vmem:[#allocation2 + $0x134] ss:$8 sps:$4 sm:$0xff]  }
 0x1fd   :  { %v1397_v39 = vpop.f32.mrf.mxu0  ;;  %v1137_v7 = vadd.f32 %v4502_v16, %v864_v13  ;;  %v1141_v16 = vadd.f32 %v5621_v59, %v868_v48  ;;  %v5622_v13 = vld [vmem:[#allocation11_spill] sm:$0xff]  ;;  %v882_v48 = vadd.f32 %v5624_v22, %v4702_v35 }
 0x1fe   :  { %v1742_v47 = vmax.f32 %v1696_v23, %v1697_v41  ;;  %v1698_v55 = vmax.f32 %v1606_v53, %v1610_v32  ;;  %v1611_v1 = vmax.f32 %v1394_v5, 0.0  ;;  %v1398_v12 = vadd.f32 %v1397_v39, %v1125_v0  ;;  %v5620_v23 = vld [vmem:[#allocation32_spill] sm:$0xff] }
 0x1ff   :  { %v1399_v15 = vpop.f32.mrf.mxu0  ;;  %v1139_v10 = vadd.f32 %v5620_v23, %v866_v18  ;;  %v3671_v5 = vld [vmem:[#allocation2 + $0x160] ss:$8 sps:$4 sm:$0xff]  }
 0x200   :  { %v1699_v3 = vmax.f32 %v1607_v42, %v1611_v1  ;;  %v1400_v46 = vadd.f32 %v1399_v15, %v1127_v56  ;;  %v1612_v52 = vmax.f32 %v1398_v12, 0.0  ;;  %v3679_v56 = vld [vmem:[#allocation2 + $0x144] ss:$8 sps:$4 sm:$0xff]  }
 0x201   :  { %v1401_v9 = vpop.f32.mrf.mxu0 }
 0x202   :  { %v1743_v11 = vmax.f32 %v1698_v55, %v1699_v3  ;;  %v1402_v53 = vadd.f32 %v1401_v9, %v1129_v14  ;;  %v1613_v39 = vmax.f32 %v1400_v46, 0.0  ;;  %v4812_v55 = vpop.f32.mrf.mxu1 }
 0x203   :  { %v1403_v8 = vpop.f32.mrf.mxu0 }
 0x204   :  { %v4799_v24 = vpack.c.bf16 %v1743_v11, %v1742_v47  ;;  %v3676_v47 = vld [vmem:[#allocation2 + $0x154] ss:$8 sps:$4 sm:$0xff]   ;;  %v1404_v28 = vadd.f32 %v1403_v8, %v1131_v26  ;;  %v872_v11 = vadd.f32 %v5622_v13, %v4702_v35  ;;  %v4816_v19 = vpop.f32.mrf.mxu1  ;;  %v5626_v26 = vld [vmem:[#allocation16_spill] sm:$0xff] }
 0x205   :  { %v1407_v33 = vpop.f32.mrf.mxu0  ;;  %v884_v23 = vadd.f32 %v5626_v26, %v4708_v37  ;;  %v3691_v26 = vld [vmem:[#allocation2 + $0x104] ss:$8 sps:$4 sm:$0xff]  }
 0x206   :  { %v1408_v21 = vadd.f32 %v1407_v33, %v1135_v4  ;;  %2300 = vmatprep.mubr.bf16.mxu1 %v4799_v24  ;;  %v1615_v2 = vmax.f32 %v1404_v28, 0.0  ;;  %v5623_v4 = vld [vmem:[#allocation12_spill] sm:$0xff]  ;;  %v1145_v14 = vadd.f32 %v4523_v45, %v872_v11  ;;  %v1155_v45 = vadd.f32 %v4551_v27, %v882_v48 }
 0x207   :  { %v1409_v34 = vpop.f32.mrf.mxu0  ;;  %2301 = vmatmul.mubr.bf16.vlgmr.msra.gmra.mxu1 %v4765_v38  ;;  %v1614_v38 = vmax.f32 %v1402_v53, 0.0  ;;  %v874_v12 = vadd.f32 %v5623_v4, %v4708_v37  ;;  %v3677_v33 = vld [vmem:[#allocation2 + $0x140] ss:$8 sps:$4 sm:$0xff]   ;;  %v5627_v53 = vld [vmem:[#allocation14_spill] sm:$0xff] }
 0x208   :  { %v1616_v41 = vmax.f32 %v1408_v21, 0.0  ;;  %v1410_v32 = vadd.f32 %v1409_v34, %v1137_v7  ;;  %2382 = vmatpush1.bf16.msra.mxu1 %v3668_v20  ;;  %v5625_v7 = vld [vmem:[#allocation13_spill] sm:$0xff]  ;;  %v3688_v4 = vld [vmem:[#allocation2 + $0x114] ss:$8 sps:$4 sm:$0xff]  }
 0x209   :  { %v1411_v42 = vpop.f32.mrf.mxu0  ;;  %2383 = vmatprep.subr.bf16.mxu1 %v3673_v60  ;;  %v876_v21 = vadd.f32 %v5625_v7, %v4702_v35 }
 0x20a   :  { %v1700_v1 = vmax.f32 %v1612_v52, %v1616_v41  ;;  %v1617_v62 = vmax.f32 %v1410_v32, 0.0  ;;  %v1412_v15 = vadd.f32 %v1411_v42, %v1139_v10  ;;  %v4827_v10 = vpop.f32.mrf.mxu1  ;;  %v1147_v52 = vadd.f32 %v4530_v58, %v874_v12  ;;  %v5628_v32 = vld [vmem:[#allocation17_spill] sm:$0xff]  ;;  %v3680_v42 = vld [vmem:[#allocation2 + $0x130] ss:$8 sps:$4 sm:$0xff]  }
 0x20b   :  { %v1413_v40 = vpop.f32.mrf.mxu0  ;;  %v878_v41 = vadd.f32 %v5627_v53, %v4708_v37  ;;  %v3685_v58 = vld [vmem:[#allocation2 + $0x124] ss:$8 sps:$4 sm:$0xff]  }
 0x20c   :  { %v1701_v3 = vmax.f32 %v1613_v39, %v1617_v62  ;;  %v1618_v9 = vmax.f32 %v1412_v15, 0.0  ;;  %v1414_v0 = vadd.f32 %v1413_v40, %v1141_v16  ;;  %2384 = vmatpush1.bf16.msra.mxu1 %v3671_v5  ;;  %v886_v5 = vadd.f32 %v5628_v32, %v4702_v35  ;;  %v5630_v15 = vld [vmem:[#allocation42_spill] sm:$0xff]  ;;  %v5633_v32 = vld [vmem:[#allocation21_spill] sm:$0xff] }
 0x20d   :  { %v1417_v36 = vpop.f32.mrf.mxu0  ;;  %2385 = vmatprep.subr.bf16.mxu1 %v3676_v47  ;;  %v5629_v47 = vld [vmem:[#allocation18_spill] sm:$0xff]  ;;  %v1149_v40 = vadd.f32 %v5630_v15, %v876_v21  ;;  %v1151_v27 = vadd.f32 %v4544_v31, %v878_v41 }
 0x20e   :  { %v1744_v25 = vmax.f32 %v1700_v1, %v1701_v3  ;;  %v1702_v18 = vmax.f32 %v1614_v38, %v1618_v9  ;;  %v1619_v8 = vmax.f32 %v1414_v0, 0.0  ;;  %v1418_v16 = vadd.f32 %v1417_v36, %v1145_v14  ;;  %v4841_v3 = vpop.f32.mrf.mxu1  ;;  %v5632_v14 = vld [vmem:[#allocation19_spill] sm:$0xff]  ;;  %v5636_v15 = vld [vmem:[#allocation22_spill] sm:$0xff] }
 0x20f   :  { %v1419_v20 = vpop.f32.mrf.mxu0  ;;  %v888_v28 = vadd.f32 %v5629_v47, %v4708_v37  ;;  %v1157_v38 = vadd.f32 %v4558_v29, %v884_v23  ;;  %v1159_v0 = vadd.f32 %v4565_v57, %v886_v5  ;;  %v892_v7 = vadd.f32 %v5632_v14, %v4702_v35  ;;  %v3689_v47 = vld [vmem:[#allocation2 + $0x100] ss:$8 sps:$4 sm:$0xff]  }
 0x210   :  { %v1703_v46 = vmax.f32 %v1615_v2, %v1619_v8  ;;  %2386 = vmatpush1.bf16.msra.mxu1 %v3674_v17  ;;  %v1420_v1 = vadd.f32 %v1419_v20, %v1147_v52  ;;  %v1620_v13 = vmax.f32 %v1418_v16, 0.0  ;;  %v3683_v2 = vld [vmem:[#allocation2 + $0x120] ss:$8 sps:$4 sm:$0xff]   ;;  %v4848_v12 = vpop.f32.mrf.mxu1  ;;  %v894_v5 = vadd.f32 %v5633_v32, %v4708_v37 }
 0x211   :  { %v1421_v60 = vpop.f32.mrf.mxu0  ;;  %2387 = vmatprep.subr.bf16.mxu1 %v3679_v56 }
 0x212   :  { %v1745_v34 = vmax.f32 %v1702_v18, %v1703_v46  ;;  %v1422_v11 = vadd.f32 %v1421_v60, %v1149_v40  ;;  %v1621_v18 = vmax.f32 %v1420_v1, 0.0  ;;  %v4852_v23 = vpop.f32.mrf.mxu1  ;;  %v3694_v1 = vld [vmem:[#allocation2 + $0x1f4] ss:$8 sps:$4 sm:$0xff]   ;;  %v896_v40 = vadd.f32 %v5636_v15, %v4702_v35 }
 0x213   :  { %v1423_v59 = vpop.f32.mrf.mxu0 }
 0x214   :  { %v4835_v39 = vpack.c.bf16 %v1745_v34, %v1744_v25  ;;  %2388 = vmatpush1.bf16.msra.mxu1 %v3677_v33  ;;  %v5631_v25 = vld [vmem:[#allocation53_spill] sm:$0xff]  ;;  %v1424_v31 = vadd.f32 %v1423_v59, %v1151_v27  ;;  %v4863_v27 = vpop.f32.mrf.mxu1 }
 0x215   :  { %v1427_v62 = vpop.f32.mrf.mxu0  ;;  %2389 = vmatprep.subr.bf16.mxu1 %v3682_v51  ;;  %v1161_v29 = vadd.f32 %v5631_v25, %v888_v28  ;;  %v3686_v51 = vld [vmem:[#allocation2 + $0x110] ss:$8 sps:$4 sm:$0xff]  }
 0x216   :  { %v1428_v9 = vadd.f32 %v1427_v62, %v1155_v45  ;;  %2310 = vmatprep.mubr.bf16.mxu1 %v4835_v39  ;;  %v1623_v34 = vmax.f32 %v1424_v31, 0.0  ;;  %v5634_v45 = vld [vmem:[#allocation25_spill] sm:$0xff]  ;;  %v5635_v62 = vld [vmem:[#allocation56_spill] sm:$0xff]  ;;  %v3692_v31 = vld [vmem:[#allocation2 + $0x1f0] ss:$8 sps:$4 sm:$0xff]   ;;  %v4877_v14 = vpop.f32.mrf.mxu1 }
 0x217   :  { %v1429_v17 = vpop.f32.mrf.mxu0  ;;  %2311 = vmatmul.mubr.bf16.gmra.mxu1 %v4799_v24  ;;  %v1622_v24 = vmax.f32 %v1422_v11, 0.0  ;;  %v902_v16 = vadd.f32 %v5634_v45, %v4702_v35  ;;  %v5639_v11 = vld [vmem:[#allocation24_spill] sm:$0xff] }
 0x218   :  { %v1624_v36 = vmax.f32 %v1428_v9, 0.0  ;;  %v1430_v56 = vadd.f32 %v1429_v17, %v1157_v38  ;;  %2390 = vmatpush1.bf16.msra.mxu1 %v3680_v42  ;;  %v5637_v38 = vld [vmem:[#allocation26_spill] sm:$0xff]  ;;  %v5638_v17 = vld [vmem:[#allocation59_spill] sm:$0xff]  ;;  %v3695_v45 = vld [vmem:[#allocation2 + $0x1e0] ss:$8 sps:$4 sm:$0xff]  }
 0x219   :  { %v1431_v8 = vpop.f32.mrf.mxu0  ;;  %2391 = vmatprep.subr.bf16.mxu1 %v3685_v58  ;;  %v1165_v58 = vadd.f32 %v5635_v62, %v892_v7  ;;  %v904_v9 = vadd.f32 %v5637_v38, %v4708_v37  ;;  %v3700_v62 = vld [vmem:[#allocation2 + $0x1d4] ss:$8 sps:$4 sm:$0xff]  }
 0x21a   :  { %v1704_v20 = vmax.f32 %v1620_v13, %v1624_v36  ;;  %v1625_v57 = vmax.f32 %v1430_v56, 0.0  ;;  %v1432_v22 = vadd.f32 %v1431_v8, %v1159_v0  ;;  %v1167_v13 = vadd.f32 %v5638_v17, %v894_v5  ;;  %v5640_v56 = vld [vmem:[#allocation27_spill] sm:$0xff] }
 0x21b   :  { %v1433_v48 = vpop.f32.mrf.mxu0  ;;  %v898_v36 = vadd.f32 %v5639_v11, %v4708_v37 }
 0x21c   :  { %v1705_v46 = vmax.f32 %v1621_v18, %v1625_v57  ;;  %v1626_v33 = vmax.f32 %v1432_v22, 0.0  ;;  %v1434_v60 = vadd.f32 %v1433_v48, %v1161_v29  ;;  %2392 = vmatpush1.bf16.msra.mxu1 %v3683_v2  ;;  %v906_v2 = vadd.f32 %v5640_v56, %v4702_v35  ;;  %v5641_v29 = vld [vmem:[#allocation68_spill] sm:$0xff]  ;;  %v5648_v56 = vld [vmem:[#allocation29_spill] sm:$0xff] }
 0x21d   :  { %v1437_v21 = vpop.f32.mrf.mxu0  ;;  %2393 = vmatprep.subr.bf16.mxu1 %v3688_v4  ;;  %v1175_v18 = vadd.f32 %v5641_v29, %v902_v16  ;;  %v5647_v16 = vld [vmem:[#allocation77_spill] sm:$0xff] }
 0x21e   :  { %v1746_v52 = vmax.f32 %v1704_v20, %v1705_v46  ;;  %v1706_v53 = vmax.f32 %v1622_v24, %v1626_v33  ;;  %v1627_v41 = vmax.f32 %v1434_v60, 0.0  ;;  %v1438_v4 = vadd.f32 %v1437_v21, %v1165_v58  ;;  %v5642_v20 = vld [vmem:[#allocation28_spill] sm:$0xff]  ;;  %v5643_v46 = vld [vmem:[#allocation62_spill] sm:$0xff]  ;;  %v5644_v60 = vld [vmem:[#allocation71_spill] sm:$0xff]  ;;  %v4884_v58 = vpop.f32.mrf.mxu1 }
 0x21f   :  { %v1439_v59 = vpop.f32.mrf.mxu0  ;;  %v908_v57 = vadd.f32 %v5642_v20, %v4708_v37  ;;  %v3697_v24 = vld [vmem:[#allocation2 + $0x1e4] ss:$8 sps:$4 sm:$0xff]   ;;  %v1169_v33 = vadd.f32 %v5643_v46, %v896_v40  ;;  %v5650_v46 = vld [vmem:[#allocation34_spill] sm:$0xff] }
 0x220   :  { %v1707_v42 = vmax.f32 %v1623_v34, %v1627_v41  ;;  %2394 = vmatpush1.bf16.msra.mxu1 %v3686_v51  ;;  %v1440_v22 = vadd.f32 %v1439_v59, %v1167_v13  ;;  %v1177_v51 = vadd.f32 %v5644_v60, %v904_v9  ;;  %v5646_v34 = vld [vmem:[#allocation74_spill] sm:$0xff]  ;;  %v1628_v41 = vmax.f32 %v1438_v4, 0.0  ;;  %v4888_v4 = vpop.f32.mrf.mxu1 }
 0x221   :  { %v1441_v28 = vpop.f32.mrf.mxu0  ;;  %2395 = vmatprep.subr.bf16.mxu1 %v3691_v26  ;;  %v5645_v26 = vld [vmem:[#allocation65_spill] sm:$0xff] }
 0x222   :  { %v1747_v0 = vmax.f32 %v1706_v53, %v1707_v42  ;;  %v1171_v21 = vadd.f32 %v5645_v26, %v898_v36  ;;  %v1442_v32 = vadd.f32 %v1441_v28, %v1169_v33  ;;  %v1181_v42 = vadd.f32 %v5647_v16, %v908_v57  ;;  %v3698_v36 = vld [vmem:[#allocation2 + $0x1d0] ss:$8 sps:$4 sm:$0xff]   ;;  %v3706_v26 = vld [vmem:[#allocation2 + $0x1b4] ss:$8 sps:$4 sm:$0xff]  }
 0x223   :  { %v1443_v25 = vpop.f32.mrf.mxu0  ;;  %v922_v33 = vadd.f32 %v5650_v46, %v4702_v35 }
 0x224   :  { %v4871_v8 = vpack.c.bf16 %v1747_v0, %v1746_v52  ;;  %2396 = vmatpush1.bf16.msra.mxu1 %v3689_v47  ;;  %v1179_v52 = vadd.f32 %v5646_v34, %v906_v2  ;;  %v1629_v47 = vmax.f32 %v1440_v22, 0.0  ;;  %v1444_v15 = vadd.f32 %v1443_v25, %v1171_v21  ;;  %v5649_v22 = vld [vmem:[#allocation30_spill] sm:$0xff]  ;;  %v5651_v21 = vld [vmem:[#allocation80_spill] sm:$0xff] }
 0x225   :  { %v1447_v48 = vpop.f32.mrf.mxu0  ;;  %2397 = vmatprep.subr.bf16.mxu1 %v3694_v1  ;;  %v1630_v17 = vmax.f32 %v1442_v32, 0.0  ;;  %v912_v2 = vadd.f32 %v5648_v56, %v4702_v35  ;;  %v3709_v56 = vld [vmem:[#allocation2 + $0x1a4] ss:$8 sps:$4 sm:$0xff]  }
 0x226   :  { %v1448_v7 = vadd.f32 %v1447_v48, %v1175_v18  ;;  %2320 = vmatprep.mubr.bf16.mxu1 %v4871_v8  ;;  %v3703_v18 = vld [vmem:[#allocation2 + $0x1c4] ss:$8 sps:$4 sm:$0xff]   ;;  %v914_v48 = vadd.f32 %v5649_v22, %v4708_v37 }
 0x227   :  { %v1449_v53 = vpop.f32.mrf.mxu0  ;;  %2321 = vmatmul.mubr.bf16.gmra.mxu1 %v4835_v39  ;;  %v1185_v34 = vadd.f32 %v5651_v21, %v912_v2  ;;  %v5659_v2 = vld [vmem:[#allocation86_spill] sm:$0xff]  ;;  %v3707_v21 = vld [vmem:[#allocation2 + $0x1a0] ss:$8 sps:$4 sm:$0xff]  }
 0x228   :  { %v1632_v5 = vmax.f32 %v1448_v7, 0.0  ;;  %v1450_v59 = vadd.f32 %v1449_v53, %v1177_v51  ;;  %2398 = vmatpush2.bf16.msra.mxu1 %v3692_v31  ;;  %v1631_v31 = vmax.f32 %v1444_v15, 0.0  ;;  %v3701_v51 = vld [vmem:[#allocation2 + $0x1c0] ss:$8 sps:$4 sm:$0xff]  }
 0x229   :  { %v1451_v1 = vpop.f32.mrf.mxu0  ;;  %2399 = vmatprep.subr.bf16.mxu1 %v3697_v24 }
 0x22a   :  { %v1708_v40 = vmax.f32 %v1628_v41, %v1632_v5  ;;  %v1633_v38 = vmax.f32 %v1450_v59, 0.0  ;;  %v1452_v9 = vadd.f32 %v1451_v1, %v1179_v52  ;;  %v5652_v52 = vld [vmem:[#allocation31_spill] sm:$0xff]  ;;  %v5653_v41 = vld [vmem:[#allocation36_spill] sm:$0xff]  ;;  %v4899_v5 = vpop.f32.mrf.mxu1  ;;  %v5656_v1 = vld [vmem:[#allocation37_spill] sm:$0xff] }
 0x22b   :  { %v1453_v0 = vpop.f32.mrf.mxu0  ;;  %v916_v53 = vadd.f32 %v5652_v52, %v4702_v35  ;;  %v924_v32 = vadd.f32 %v5653_v41, %v4708_v37 }
 0x22c   :  { %v1709_v13 = vmax.f32 %v1629_v47, %v1633_v38  ;;  %v1634_v28 = vmax.f32 %v1452_v9, 0.0  ;;  %v1454_v11 = vadd.f32 %v1453_v0, %v1181_v42  ;;  %2400 = vmatpush2.bf16.msra.mxu1 %v3695_v45  ;;  %v5654_v45 = vld [vmem:[#allocation83_spill] sm:$0xff]  ;;  %v5655_v42 = vld [vmem:[#allocation33_spill] sm:$0xff] }
 0x22d   :  { %v1457_v29 = vpop.f32.mrf.mxu0  ;;  %2401 = vmatprep.subr.bf16.mxu1 %v3700_v62  ;;  %v1187_v16 = vadd.f32 %v5654_v45, %v914_v48  ;;  %v918_v47 = vadd.f32 %v5655_v42, %v4708_v37  ;;  %v926_v62 = vadd.f32 %v5656_v1, %v4702_v35  ;;  %v5662_v48 = vld [vmem:[#allocation99_spill] sm:$0xff] }
 0x22e   :  { %v1748_v25 = vmax.f32 %v1708_v40, %v1709_v13  ;;  %v1710_v20 = vmax.f32 %v1630_v17, %v1634_v28  ;;  %v1635_v57 = vmax.f32 %v1454_v11, 0.0  ;;  %v5657_v40 = vld [vmem:[#allocation92_spill] sm:$0xff]  ;;  %v1458_v0 = vadd.f32 %v1457_v29, %v1185_v34  ;;  %v3704_v17 = vld [vmem:[#allocation2 + $0x1b0] ss:$8 sps:$4 sm:$0xff]  }
 0x22f   :  { %v1459_v24 = vpop.f32.mrf.mxu0  ;;  %v1195_v38 = vadd.f32 %v5657_v40, %v922_v33  ;;  %v5658_v13 = vld [vmem:[#allocation38_spill] sm:$0xff]  ;;  %v1199_v46 = vadd.f32 %v5662_v48, %v926_v62 }
 0x230   :  { %v1711_v60 = vmax.f32 %v1631_v31, %v1635_v57  ;;  %2402 = vmatpush2.bf16.msra.mxu1 %v3698_v36  ;;  %v928_v28 = vadd.f32 %v5658_v13, %v4708_v37  ;;  %v1460_v11 = vadd.f32 %v1459_v24, %v1187_v16  ;;  %v5660_v31 = vld [vmem:[#allocation95_spill] sm:$0xff]  ;;  %v4913_v57 = vpop.f32.mrf.mxu1  ;;  %v1636_v24 = vmax.f32 %v1458_v0, 0.0  ;;  %v5663_v34 = vld [vmem:[#allocation102_spill] sm:$0xff] }
 0x231   :  { %v1461_v7 = vpop.f32.mrf.mxu0  ;;  %2403 = vmatprep.subr.bf16.mxu1 %v3703_v18  ;;  %v1189_v18 = vadd.f32 %v5659_v2, %v916_v53  ;;  %v3710_v0 = vld [vmem:[#allocation2 + $0x190] ss:$8 sps:$4 sm:$0xff]  }
 0x232   :  { %v1749_v59 = vmax.f32 %v1710_v20, %v1711_v60  ;;  %v1197_v20 = vadd.f32 %v5660_v31, %v924_v32  ;;  %v1201_v52 = vadd.f32 %v5663_v34, %v928_v28  ;;  %v1637_v53 = vmax.f32 %v1460_v11, 0.0  ;;  %v3712_v32 = vld [vmem:[#allocation2 + $0x194] ss:$8 sps:$4 sm:$0xff]   ;;  %v3715_v11 = vld [vmem:[#allocation2 + $0x184] ss:$8 sps:$4 sm:$0xff]  }
 0x233   :  { %v1463_v15 = vpop.f32.mrf.mxu0  ;;  %v1462_v60 = vadd.f32 %v1461_v7, %v1189_v18  ;;  %v5665_v31 = vld [vmem:[#allocation40_spill] sm:$0xff]  ;;  %v5669_v34 = vld [vmem:[#allocation45_spill] sm:$0xff] }
 0x234   :  { %v4907_v9 = vpack.c.bf16 %v1749_v59, %v1748_v25  ;;  %2404 = vmatpush2.bf16.msra.mxu1 %v3701_v51  ;;  %v5661_v25 = vld [vmem:[#allocation89_spill] sm:$0xff]  ;;  %v4920_v59 = vpop.f32.mrf.mxu1 }
 0x235   :  { %v1467_v36 = vpop.f32.mrf.mxu0  ;;  %2405 = vmatprep.subr.bf16.mxu1 %v3706_v26  ;;  %v1191_v29 = vadd.f32 %v5661_v25, %v918_v47  ;;  %v1638_v62 = vmax.f32 %v1462_v60, 0.0  ;;  %v5666_v25 = vld [vmem:[#allocation44_spill] sm:$0xff]  ;;  %v5667_v60 = vld [vmem:[#allocation105_spill] sm:$0xff] }
 0x236   :  { %v1468_v22 = vadd.f32 %v1467_v36, %v1195_v38  ;;  %2330 = vmatprep.mubr.bf16.mxu1 %v4907_v9  ;;  %v4924_v36 = vpop.f32.mrf.mxu1 }
 0x237   :  { %v1469_v33 = vpop.f32.mrf.mxu0  ;;  %2331 = vmatmul.mubr.bf16.gmra.mxu1 %v4871_v8  ;;  %v1464_v45 = vadd.f32 %v1463_v15, %v1191_v29  ;;  %v942_v29 = vadd.f32 %v5666_v25, %v4702_v35 }
 0x238   :  { %v1640_v51 = vmax.f32 %v1468_v22, 0.0  ;;  %v1470_v26 = vadd.f32 %v1469_v33, %v1197_v20  ;;  %2406 = vmatpush2.bf16.msra.mxu1 %v3704_v17  ;;  %v5664_v17 = vld [vmem:[#allocation39_spill] sm:$0xff]  ;;  %v934_v20 = vadd.f32 %v5665_v31, %v4708_v37 }
 0x239   :  { %v1471_v41 = vpop.f32.mrf.mxu0  ;;  %2407 = vmatprep.subr.bf16.mxu1 %v3709_v56  ;;  %v932_v13 = vadd.f32 %v5664_v17, %v4702_v35  ;;  %v1639_v56 = vmax.f32 %v1464_v45, 0.0 }
 0x23a   :  { %v1712_v16 = vmax.f32 %v1636_v24, %v1640_v51  ;;  %v1641_v42 = vmax.f32 %v1470_v26, 0.0  ;;  %v1472_v47 = vadd.f32 %v1471_v41, %v1199_v46  ;;  %v3713_v46 = vld [vmem:[#allocation2 + $0x180] ss:$8 sps:$4 sm:$0xff]   ;;  %v3718_v24 = vld [vmem:[#allocation2 + $0x274] ss:$8 sps:$4 sm:$0xff]  }
 0x23b   :  { %v1473_v1 = vpop.f32.mrf.mxu0  ;;  %v1205_v51 = vadd.f32 %v5667_v60, %v932_v13  ;;  %v5668_v26 = vld [vmem:[#allocation41_spill] sm:$0xff] }
 0x23c   :  { %v1713_v40 = vmax.f32 %v1637_v53, %v1641_v42  ;;  %v1642_v7 = vmax.f32 %v1472_v47, 0.0  ;;  %v1474_v38 = vadd.f32 %v1473_v1, %v1201_v52  ;;  %2408 = vmatpush2.bf16.msra.mxu1 %v3707_v21  ;;  %v936_v21 = vadd.f32 %v5668_v26, %v4702_v35  ;;  %v4935_v53 = vpop.f32.mrf.mxu1  ;;  %v5672_v47 = vld [vmem:[#allocation46_spill] sm:$0xff] }
 0x23d   :  { %v1477_v28 = vpop.f32.mrf.mxu0  ;;  %2409 = vmatprep.subr.bf16.mxu1 %v3712_v32  ;;  %v944_v52 = vadd.f32 %v5669_v34, %v4708_v37  ;;  %v5670_v32 = vld [vmem:[#allocation107_spill] sm:$0xff]  ;;  %v946_v1 = vadd.f32 %v5672_v47, %v4702_v35 }
 0x23e   :  { %v1750_v15 = vmax.f32 %v1712_v16, %v1713_v40  ;;  %v1714_v2 = vmax.f32 %v1638_v62, %v1642_v7  ;;  %v1643_v18 = vmax.f32 %v1474_v38, 0.0  ;;  %v1207_v45 = vadd.f32 %v5670_v32, %v934_v20  ;;  %v5671_v16 = vld [vmem:[#allocation43_spill] sm:$0xff]  ;;  %v4949_v31 = vpop.f32.mrf.mxu1 }
 0x23f   :  { %v1479_v22 = vpop.f32.mrf.mxu0  ;;  %v938_v42 = vadd.f32 %v5671_v16, %v4708_v37  ;;  %v1215_v40 = vadd.f32 %v4742_v50, %v942_v29  ;;  %v1478_v38 = vadd.f32 %v1477_v28, %v1205_v51  ;;  %v1219_v28 = vadd.f32 %v4757_v63, %v946_v1 }
 0x240   :  { %v1715_v48 = vmax.f32 %v1639_v56, %v1643_v18  ;;  %2410 = vmatpush2.bf16.msra.mxu1 %v3710_v0  ;;  %v5673_v0 = vld [vmem:[#allocation47_spill] sm:$0xff]  ;;  %v1480_v13 = vadd.f32 %v1479_v22, %v1207_v45  ;;  %v5674_v56 = vld [vmem:[#allocation108_spill] sm:$0xff]  ;;  %v1217_v18 = vadd.f32 %v4746_v30, %v944_v52  ;;  %v4956_v60 = vpop.f32.mrf.mxu1 }
 0x241   :  { %v1481_v33 = vpop.f32.mrf.mxu0  ;;  %2411 = vmatprep.subr.bf16.mxu1 %v3715_v11  ;;  %v948_v17 = vadd.f32 %v5673_v0, %v4708_v37  ;;  %v1211_v50 = vadd.f32 %v4737_v54, %v938_v42  ;;  %v1644_v25 = vmax.f32 %v1478_v38, 0.0  ;;  %v5675_v45 = vld [vmem:[#allocation48_spill] sm:$0xff] }
 0x242   :  { %v1751_v41 = vmax.f32 %v1714_v2, %v1715_v48  ;;  %v1209_v2 = vadd.f32 %v5674_v56, %v936_v21  ;;  %v4960_v42 = vpop.f32.mrf.mxu1 }
 0x243   :  { %v1483_v62 = vpop.f32.mrf.mxu0 }
 0x244   :  { %v4943_v7 = vpack.c.bf16 %v1751_v41, %v1750_v15  ;;  %2412 = vmatpush2.bf16.msra.mxu1 %v3713_v46  ;;  %v1482_v22 = vadd.f32 %v1481_v33, %v1209_v2  ;;  %v1221_v46 = vadd.f32 %v4771_v43, %v948_v17  ;;  %v1484_v51 = vadd.f32 %v1483_v62, %v1211_v50  ;;  %v5676_v62 = vld [vmem:[#allocation49_spill] sm:$0xff]  ;;  %v5677_v17 = vld [vmem:[#allocation52_spill] sm:$0xff]  ;;  %v5679_v50 = vld [vmem:[#allocation54_spill] sm:$0xff] }
 0x245   :  { %v1487_v11 = vpop.f32.mrf.mxu0  ;;  %2494 = vmatprep.subr.bf16.mxu1 %v3718_v24  ;;  %v1645_v24 = vmax.f32 %v1480_v13, 0.0  ;;  %v952_v33 = vadd.f32 %v5675_v45, %v4702_v35  ;;  %v954_v38 = vadd.f32 %v5676_v62, %v4708_v37  ;;  %v962_v13 = vadd.f32 %v5677_v17, %v4702_v35 }
 0x246   :  { %v1488_v20 = vadd.f32 %v1487_v11, %v1215_v40  ;;  %2340 = vmatprep.mubr.bf16.mxu1 %v4943_v7  ;;  %v1646_v52 = vmax.f32 %v1482_v22, 0.0  ;;  %v1647_v43 = vmax.f32 %v1484_v51, 0.0 }
 0x247   :  { %v1489_v15 = vpop.f32.mrf.mxu0  ;;  %2341 = vmatmul.mubr.bf16.gmra.mxu1 %v4907_v9  ;;  %v1225_v2 = vadd.f32 %v4776_v44, %v952_v33  ;;  %v1227_v22 = vadd.f32 %v4780_v61, %v954_v38  ;;  %v1235_v44 = vadd.f32 %v4812_v55, %v962_v13 }
 0x248   :  { %v1648_v29 = vmax.f32 %v1488_v20, 0.0  ;;  %v1490_v48 = vadd.f32 %v1489_v15, %v1217_v18  ;;  %v5678_v18 = vld [vmem:[#allocation50_spill] sm:$0xff]  ;;  %v4971_v15 = vpop.f32.mrf.mxu1 }
 0x249   :  { %v1491_v30 = vpop.f32.mrf.mxu0  ;;  %v956_v20 = vadd.f32 %v5678_v18, %v4702_v35 }
 0x24a   :  { %v1716_v26 = vmax.f32 %v1644_v25, %v1648_v29  ;;  %v1649_v21 = vmax.f32 %v1490_v48, 0.0  ;;  %v1492_v34 = vadd.f32 %v1491_v30, %v1219_v28  ;;  %v964_v28 = vadd.f32 %v5679_v50, %v4708_v37  ;;  %v5680_v29 = vld [vmem:[#allocation51_spill] sm:$0xff] }
 0x24b   :  { %v1493_v54 = vpop.f32.mrf.mxu0  ;;  %v958_v48 = vadd.f32 %v5680_v29, %v4708_v37 }
 0x24c   :  { %v1717_v63 = vmax.f32 %v1645_v24, %v1649_v21  ;;  %v1650_v41 = vmax.f32 %v1492_v34, 0.0  ;;  %v1494_v32 = vadd.f32 %v1493_v54, %v1221_v46  ;;  %v5681_v46 = vld [vmem:[#allocation55_spill] sm:$0xff]  ;;  %v5682_v21 = vld [vmem:[#allocation57_spill] sm:$0xff]  ;;  %v1237_v61 = vadd.f32 %v4816_v19, %v964_v28 }
 0x24d   :  { %v1497_v16 = vpop.f32.mrf.mxu0  ;;  %v966_v24 = vadd.f32 %v5681_v46, %v4702_v35  ;;  %v968_v34 = vadd.f32 %v5682_v21, %v4708_v37  ;;  %v1231_v45 = vadd.f32 %v4805_v49, %v958_v48  ;;  %v5684_v48 = vld [vmem:[#allocation60_spill] sm:$0xff] }
 0x24e   :  { %v1752_v47 = vmax.f32 %v1716_v26, %v1717_v63  ;;  %v1718_v1 = vmax.f32 %v1646_v52, %v1650_v41  ;;  %v1651_v40 = vmax.f32 %v1494_v32, 0.0  ;;  %v1498_v26 = vadd.f32 %v1497_v16, %v1225_v2  ;;  %v4985_v41 = vpop.f32.mrf.mxu1 }
 0x24f   :  { %v1499_v0 = vpop.f32.mrf.mxu0  ;;  %v1229_v63 = vadd.f32 %v4791_v6, %v956_v20  ;;  %v1239_v55 = vadd.f32 %v4827_v10, %v966_v24  ;;  %v1241_v6 = vadd.f32 %v4841_v3, %v968_v34  ;;  %v5683_v20 = vld [vmem:[#allocation58_spill] sm:$0xff]  ;;  %v974_v46 = vadd.f32 %v5684_v48, %v4708_v37 }
 0x250   :  { %v1719_v11 = vmax.f32 %v1647_v43, %v1651_v40  ;;  %v1500_v54 = vadd.f32 %v1499_v0, %v1227_v22  ;;  %v1652_v16 = vmax.f32 %v1498_v26, 0.0  ;;  %v4992_v62 = vpop.f32.mrf.mxu1 }
 0x251   :  { %v1501_v56 = vpop.f32.mrf.mxu0 }
 0x252   :  { %v1753_v25 = vmax.f32 %v1718_v1, %v1719_v11  ;;  %v1502_v43 = vadd.f32 %v1501_v56, %v1229_v63  ;;  %v1653_v40 = vmax.f32 %v1500_v54, 0.0  ;;  %v972_v56 = vadd.f32 %v5683_v20, %v4702_v35  ;;  %v4996_v28 = vpop.f32.mrf.mxu1  ;;  %v5686_v54 = vld [vmem:[#allocation61_spill] sm:$0xff]  ;;  %v5687_v63 = vld [vmem:[#allocation66_spill] sm:$0xff] }
 0x253   :  { %v1503_v30 = vpop.f32.mrf.mxu0 }
 0x254   :  { %v4979_v51 = vpack.c.bf16 %v1753_v25, %v1752_v47  ;;  %v1504_v38 = vadd.f32 %v1503_v30, %v1231_v45  ;;  %v1654_v11 = vmax.f32 %v1502_v43, 0.0  ;;  %v5685_v30 = vld [vmem:[#allocation64_spill] sm:$0xff]  ;;  %v1245_v34 = vadd.f32 %v4848_v12, %v972_v56  ;;  %v5689_v43 = vld [vmem:[#allocation67_spill] sm:$0xff] }
 0x255   :  { %v1507_v52 = vpop.f32.mrf.mxu0 }
 0x256   :  { %v1508_v32 = vadd.f32 %v1507_v52, %v1235_v44  ;;  %2350 = vmatprep.mubr.bf16.mxu1 %v4979_v51  ;;  %v1655_v3 = vmax.f32 %v1504_v38, 0.0  ;;  %v982_v44 = vadd.f32 %v5685_v30, %v4702_v35  ;;  %v976_v52 = vadd.f32 %v5686_v54, %v4702_v35 }
 0x257   :  { %v1509_v33 = vpop.f32.mrf.mxu0  ;;  %2351 = vmatmul.mubr.bf16.gmra.mxu1 %v4943_v7 }
 0x258   :  { %v1656_v47 = vmax.f32 %v1508_v32, 0.0  ;;  %v1510_v1 = vadd.f32 %v1509_v33, %v1237_v61  ;;  %v984_v61 = vadd.f32 %v5687_v63, %v4708_v37  ;;  %v5007_v32 = vpop.f32.mrf.mxu1  ;;  %v5688_v33 = vld [vmem:[#allocation63_spill] sm:$0xff]  ;;  %v1255_v12 = vadd.f32 %v4884_v58, %v982_v44 }
 0x259   :  { %v1511_v19 = vpop.f32.mrf.mxu0 }
 0x25a   :  { %v1720_v0 = vmax.f32 %v1652_v16, %v1656_v47  ;;  %v1657_v17 = vmax.f32 %v1510_v1, 0.0  ;;  %v1512_v13 = vadd.f32 %v1511_v19, %v1239_v55  ;;  %v1247_v55 = vadd.f32 %v4852_v23, %v974_v46  ;;  %v5690_v19 = vld [vmem:[#allocation69_spill] sm:$0xff] }
 0x25b   :  { %v1513_v49 = vpop.f32.mrf.mxu0  ;;  %v978_v16 = vadd.f32 %v5688_v33, %v4708_v37  ;;  %v986_v47 = vadd.f32 %v5689_v43, %v4702_v35  ;;  %v988_v38 = vadd.f32 %v5690_v19, %v4708_v37  ;;  %v1257_v23 = vadd.f32 %v4888_v4, %v984_v61 }
 0x25c   :  { %v1721_v10 = vmax.f32 %v1653_v40, %v1657_v17  ;;  %v1658_v2 = vmax.f32 %v1512_v13, 0.0  ;;  %v1514_v18 = vadd.f32 %v1513_v49, %v1241_v6  ;;  %v1249_v13 = vadd.f32 %v4863_v27, %v976_v52  ;;  %v5021_v49 = vpop.f32.mrf.mxu1 }
 0x25d   :  { %v1517_v50 = vpop.f32.mrf.mxu0  ;;  %v1259_v58 = vadd.f32 %v4899_v5, %v986_v47  ;;  %v1261_v27 = vadd.f32 %v4913_v57, %v988_v38  ;;  %v5695_v38 = vld [vmem:[#allocation78_spill] sm:$0xff] }
 0x25e   :  { %v1754_v25 = vmax.f32 %v1720_v0, %v1721_v10  ;;  %v1722_v22 = vmax.f32 %v1654_v11, %v1658_v2  ;;  %v1659_v29 = vmax.f32 %v1514_v18, 0.0  ;;  %v1518_v40 = vadd.f32 %v1517_v50, %v1245_v34 }
 0x25f   :  { %v1519_v24 = vpop.f32.mrf.mxu0  ;;  %v1251_v10 = vadd.f32 %v4877_v14, %v978_v16  ;;  %v5693_v16 = vld [vmem:[#allocation76_spill] sm:$0xff] }
 0x260   :  { %v1723_v26 = vmax.f32 %v1655_v3, %v1659_v29  ;;  %v1520_v0 = vadd.f32 %v1519_v24, %v1247_v55  ;;  %v1660_v18 = vmax.f32 %v1518_v40, 0.0  ;;  %v1002_v43 = vadd.f32 %v5693_v16, %v4702_v35  ;;  %v5694_v40 = vld [vmem:[#allocation73_spill] sm:$0xff]  ;;  %v5699_v16 = vld [vmem:[#allocation82_spill] sm:$0xff] }
 0x261   :  { %v1521_v21 = vpop.f32.mrf.mxu0  ;;  %v996_v19 = vadd.f32 %v5694_v40, %v4702_v35 }
 0x262   :  { %v1755_v45 = vmax.f32 %v1722_v22, %v1723_v26  ;;  %v1522_v20 = vadd.f32 %v1521_v21, %v1249_v13  ;;  %v1661_v3 = vmax.f32 %v1520_v0, 0.0  ;;  %v5691_v26 = vld [vmem:[#allocation70_spill] sm:$0xff]  ;;  %v1004_v0 = vadd.f32 %v5695_v38, %v4708_v37 }
 0x263   :  { %v1523_v1 = vpop.f32.mrf.mxu0  ;;  %v992_v21 = vadd.f32 %v5691_v26, %v4702_v35 }
 0x264   :  { %v5015_v6 = vpack.c.bf16 %v1755_v45, %v1754_v25  ;;  %v5028_v25 = vpop.f32.mrf.mxu1  ;;  %v1524_v22 = vadd.f32 %v1523_v1, %v1251_v10  ;;  %v1662_v24 = vmax.f32 %v1522_v20, 0.0  ;;  %v5692_v45 = vld [vmem:[#allocation72_spill] sm:$0xff] }
 0x265   :  { %v1527_v17 = vpop.f32.mrf.mxu0  ;;  %v994_v55 = vadd.f32 %v5692_v45, %v4708_v37 }
 0x266   :  { %v1528_v11 = vadd.f32 %v1527_v17, %v1255_v12  ;;  %2360 = vmatprep.mubr.bf16.mxu1 %v5015_v6  ;;  %v5032_v54 = vpop.f32.mrf.mxu1  ;;  %v1663_v57 = vmax.f32 %v1524_v22, 0.0  ;;  %v1265_v12 = vadd.f32 %v4920_v59, %v992_v21  ;;  %v1275_v59 = vadd.f32 %v4956_v60, %v1002_v43 }
 0x267   :  { %v1529_v2 = vpop.f32.mrf.mxu0  ;;  %2361 = vmatmul.mubr.bf16.gmra.mxu1 %v4979_v51  ;;  %v1269_v22 = vadd.f32 %v4935_v53, %v996_v19  ;;  %v1012_v43 = vadd.f32 %v5699_v16, %v4702_v35 }
 0x268   :  { %v1664_v56 = vmax.f32 %v1528_v11, 0.0  ;;  %v1530_v50 = vadd.f32 %v1529_v2, %v1257_v23  ;;  %v5043_v17 = vpop.f32.mrf.mxu1  ;;  %v1267_v23 = vadd.f32 %v4924_v36, %v994_v55  ;;  %v5696_v11 = vld [vmem:[#allocation75_spill] sm:$0xff]  ;;  %v1277_v36 = vadd.f32 %v4960_v42, %v1004_v0  ;;  %v5700_v0 = vld [vmem:[#allocation84_spill] sm:$0xff] }
 0x269   :  { %v1531_v4 = vpop.f32.mrf.mxu0  ;;  %v998_v10 = vadd.f32 %v5696_v11, %v4708_v37  ;;  %v5701_v11 = vld [vmem:[#allocation88_spill] sm:$0xff] }
 0x26a   :  { %v1724_v29 = vmax.f32 %v1660_v18, %v1664_v56  ;;  %v1665_v48 = vmax.f32 %v1530_v50, 0.0  ;;  %v1532_v46 = vadd.f32 %v1531_v4, %v1259_v58  ;;  %v5697_v58 = vld [vmem:[#allocation79_spill] sm:$0xff]  ;;  %v5698_v50 = vld [vmem:[#allocation81_spill] sm:$0xff] }
 0x26b   :  { %v1533_v14 = vpop.f32.mrf.mxu0  ;;  %v1006_v2 = vadd.f32 %v5697_v58, %v4702_v35 }
 0x26c   :  { %v1725_v5 = vmax.f32 %v1661_v3, %v1665_v48  ;;  %v1666_v30 = vmax.f32 %v1532_v46, 0.0  ;;  %v1534_v44 = vadd.f32 %v1533_v14, %v1261_v27  ;;  %v1008_v27 = vadd.f32 %v5698_v50, %v4708_v37  ;;  %v5702_v50 = vld [vmem:[#allocation85_spill] sm:$0xff] }
 0x26d   :  { %v1537_v34 = vpop.f32.mrf.mxu0  ;;  %v1271_v46 = vadd.f32 %v4949_v31, %v998_v10  ;;  %v1279_v60 = vadd.f32 %v4971_v15, %v1006_v2  ;;  %v1022_v10 = vadd.f32 %v5701_v11, %v4702_v35  ;;  %v3719_v2 = vld [vmem:[#allocation2 + $0x260] ss:$8 sps:$4 sm:$0xff]  }
 0x26e   :  { %v1756_v52 = vmax.f32 %v1724_v29, %v1725_v5  ;;  %v1726_v63 = vmax.f32 %v1662_v24, %v1666_v30  ;;  %v1667_v61 = vmax.f32 %v1534_v44, 0.0  ;;  %v1538_v56 = vadd.f32 %v1537_v34, %v1265_v12  ;;  %v5057_v29 = vpop.f32.mrf.mxu1 }
 0x26f   :  { %v1539_v33 = vpop.f32.mrf.mxu0  ;;  %v1281_v53 = vadd.f32 %v4985_v41, %v1008_v27  ;;  %v1016_v27 = vadd.f32 %v5702_v50, %v4702_v35 }
 0x270   :  { %v1727_v47 = vmax.f32 %v1663_v57, %v1667_v61  ;;  %v1540_v3 = vadd.f32 %v1539_v33, %v1267_v23  ;;  %v1668_v24 = vmax.f32 %v1538_v56, 0.0  ;;  %v5065_v21 = vpop.f32.mrf.mxu1  ;;  %v3716_v33 = vld [vmem:[#allocation2 + $0x270] ss:$8 sps:$4 sm:$0xff]   ;;  %v1285_v56 = vadd.f32 %v4992_v62, %v1012_v43 }
 0x271   :  { %v1541_v1 = vpop.f32.mrf.mxu0  ;;  %v1295_v62 = vadd.f32 %v5028_v25, %v1022_v10 }
 0x272   :  { %v1757_v13 = vmax.f32 %v1726_v63, %v1727_v47  ;;  %v1542_v5 = vadd.f32 %v1541_v1, %v1269_v22  ;;  %v1669_v42 = vmax.f32 %v1540_v3, 0.0  ;;  %v3721_v1 = vld [vmem:[#allocation2 + $0x264] ss:$8 sps:$4 sm:$0xff]   ;;  %v5069_v41 = vpop.f32.mrf.mxu1  ;;  %v5703_v3 = vld [vmem:[#allocation90_spill] sm:$0xff] }
 0x273   :  { %v1543_v18 = vpop.f32.mrf.mxu0 }
 0x274   :  { %v5051_v20 = vpack.c.bf16 %v1757_v13, %v1756_v52  ;;  %v1544_v34 = vadd.f32 %v1543_v18, %v1271_v46  ;;  %v1670_v63 = vmax.f32 %v1542_v5, 0.0  ;;  %v1014_v13 = vadd.f32 %v5700_v0, %v4708_v37 }
 0x275   :  { %v1547_v4 = vpop.f32.mrf.mxu0 }
 0x276   :  { %v1548_v48 = vadd.f32 %v1547_v4, %v1275_v59  ;;  %2370 = vmatprep.mubr.bf16.mxu1 %v5051_v20  ;;  %v1671_v12 = vmax.f32 %v1544_v34, 0.0  ;;  %v3724_v59 = vld [vmem:[#allocation2 + $0x254] ss:$8 sps:$4 sm:$0xff]   ;;  %v1024_v4 = vadd.f32 %v5703_v3, %v4708_v37 }
 0x277   :  { %v1549_v14 = vpop.f32.mrf.mxu0  ;;  %2371 = vmatmul.mubr.bf16.gmra.mxu1 %v5015_v6 }
 0x278   :  { %v1672_v30 = vmax.f32 %v1548_v48, 0.0  ;;  %v1550_v44 = vadd.f32 %v1549_v14, %v1277_v36  ;;  %2413 = vmatprep.mubr.bf16.mxu1 %v4871_v8  ;;  %v1287_v36 = vadd.f32 %v4996_v28, %v1014_v13  ;;  %v5704_v48 = vld [vmem:[#allocation87_spill] sm:$0xff]  ;;  %v3727_v28 = vld [vmem:[#allocation2 + $0x244] ss:$8 sps:$4 sm:$0xff]  }
 0x279   :  { %v1551_v26 = vpop.f32.mrf.mxu0  ;;  %v1018_v46 = vadd.f32 %v5704_v48, %v4708_v37 }
 0x27a   :  { %v1728_v57 = vmax.f32 %v1668_v24, %v1672_v30  ;;  %v1673_v31 = vmax.f32 %v1550_v44, 0.0  ;;  %v1552_v52 = vadd.f32 %v1551_v26, %v1279_v60  ;;  %v5705_v60 = vld [vmem:[#allocation91_spill] sm:$0xff] }
 0x27b   :  { %v1553_v15 = vpop.f32.mrf.mxu0  ;;  %v1026_v14 = vadd.f32 %v5705_v60, %v4702_v35  ;;  %v3722_v30 = vld [vmem:[#allocation2 + $0x250] ss:$8 sps:$4 sm:$0xff]   ;;  %v1291_v25 = vadd.f32 %v5021_v49, %v1018_v46  ;;  %v5709_v46 = vld [vmem:[#allocation101_spill] sm:$0xff] }
 0x27c   :  { %v1729_v61 = vmax.f32 %v1669_v42, %v1673_v31  ;;  %v1674_v45 = vmax.f32 %v1552_v52, 0.0  ;;  %v1554_v55 = vadd.f32 %v1553_v15, %v1281_v53  ;;  %v5706_v53 = vld [vmem:[#allocation93_spill] sm:$0xff]  ;;  %v1297_v31 = vadd.f32 %v5032_v54, %v1024_v4  ;;  %v3740_v54 = vld [vmem:[%s5500_s5 + $0x78] sm:$0xff]  }
 0x27d   :  { %v1557_v47 = vpop.f32.mrf.mxu0  ;;  %v1028_v42 = vadd.f32 %v5706_v53, %v4708_v37  ;;  %v3741_v49 = vld [vmem:[%s5500_s5 + $0x38] sm:$0xff]   ;;  %3390 = vmatprep.subr.bf16.mxu0 %v3740_v54  ;;  %v1042_v60 = vadd.f32 %v5709_v46, %v4702_v35  ;;  %v5710_v53 = vld [vmem:[#allocation97_spill] sm:$0xff] }
 0x27e   :  { %v1758_v40 = vmax.f32 %v1728_v57, %v1729_v61  ;;  %v1730_v19 = vmax.f32 %v1670_v63, %v1674_v45  ;;  %v1675_v38 = vmax.f32 %v1554_v55, 0.0  ;;  %v1558_v5 = vadd.f32 %v1557_v47, %v1285_v56  ;;  %v3730_v47 = vld [vmem:[#allocation2 + $0x234] ss:$8 sps:$4 sm:$0xff]   ;;  %3391 = vmatpush3.bf16.msra.mxu0 %v3741_v49 }
 0x27f   :  { %v1559_v23 = vpop.f32.mrf.mxu0  ;;  %2414 = vmatmul.mubr.bf16.vlgmr.msra.gmra.mxu1 %v4835_v39  ;;  %v5082_v39 = vpop.f32.mrf.mxu1  ;;  %v1289_v57 = vadd.f32 %v5007_v32, %v1016_v27  ;;  %v1299_v63 = vadd.f32 %v5043_v17, %v1026_v14  ;;  %v3725_v32 = vld [vmem:[#allocation2 + $0x240] ss:$8 sps:$4 sm:$0xff]   ;;  %v1301_v17 = vadd.f32 %v5057_v29, %v1028_v42  ;;  %v5707_v29 = vld [vmem:[#allocation94_spill] sm:$0xff]  ;;  %v1036_v42 = vadd.f32 %v5710_v53, %v4702_v35 }
 0x280   :  { %v1731_v58 = vmax.f32 %v1671_v12, %v1675_v38  ;;  %2423 = vmatprep.mubr.bf16.mxu1 %v4907_v9  ;;  %2495 = vmatpush1.bf16.msra.mxu1 %v3716_v33  ;;  %v1560_v26 = vadd.f32 %v1559_v23, %v1287_v36  ;;  %v1676_v45 = vmax.f32 %v1558_v5, 0.0  ;;  %v3736_v5 = vld [vmem:[#allocation2 + $0x214] ss:$8 sps:$4 sm:$0xff]   ;;  %v3747_v53 = vld [vmem:[%s5500_s5 + $0x20] sm:$0xff]  }
 0x281   :  { %v1561_v18 = vpop.f32.mrf.mxu0  ;;  %2496 = vmatprep.subr.bf16.mxu1 %v3721_v1  ;;  %v5096_v52 = vpop.f32.mrf.mxu1 }
 0x282   :  { %v1759_v22 = vmax.f32 %v1730_v19, %v1731_v58  ;;  %v1562_v55 = vadd.f32 %v1561_v18, %v1289_v57  ;;  %v1677_v43 = vmax.f32 %v1560_v26, 0.0  ;;  %v3728_v58 = vld [vmem:[#allocation2 + $0x230] ss:$8 sps:$4 sm:$0xff]  }
 0x283   :  { %v1563_v24 = vpop.f32.mrf.mxu0  ;;  %v1314_v1 = vpop.f32.mrf.mxu1  ;;  %v5711_v26 = vld [vmem:[#allocation103_spill] sm:$0xff] }
 0x284   :  { %2497 = vmatpush1.bf16.msra.mxu1 %v3719_v2  ;;  %v5090_v44 = vpack.c.bf16 %v1759_v22, %v1758_v40  ;;  %v1564_v12 = vadd.f32 %v1563_v24, %v1291_v25  ;;  %v1678_v13 = vmax.f32 %v1562_v55, 0.0  ;;  %v1032_v2 = vadd.f32 %v5707_v29, %v4702_v35  ;;  %v5708_v22 = vld [vmem:[#allocation96_spill] sm:$0xff] }
 0x285   :  { %v1567_v34 = vpop.f32.mrf.mxu0  ;;  %2498 = vmatprep.subr.bf16.mxu1 %v3724_v59  ;;  %v3733_v59 = vld [vmem:[#allocation2 + $0x224] ss:$8 sps:$4 sm:$0xff]   ;;  %v1316_v56 = vpop.f32.mrf.mxu1  ;;  %v1034_v36 = vadd.f32 %v5708_v22, %v4708_v37  ;;  %v3731_v24 = vld [vmem:[#allocation2 + $0x220] ss:$8 sps:$4 sm:$0xff]   ;;  %v1315_v55 = vadd.f32 %v1314_v1, %v1042_v60 }
 0x286   :  { %v1568_v15 = vadd.f32 %v1567_v34, %v1295_v62  ;;  %v1679_v50 = vmax.f32 %v1564_v12, 0.0  ;;  %v1044_v34 = vadd.f32 %v5711_v26, %v4708_v37 }
 0x287   :  { %v1569_v61 = vpop.f32.mrf.mxu0  ;;  %2424 = vmatmul.mubr.bf16.gmra.mxu1 %v4871_v8 }
 0x288   :  { %v1680_v33 = vmax.f32 %v1568_v15, 0.0  ;;  %v1570_v16 = vadd.f32 %v1569_v61, %v1297_v31  ;;  %2433 = vmatprep.mubr.bf16.mxu1 %v4943_v7  ;;  %2499 = vmatpush1.bf16.msra.mxu1 %v3722_v30  ;;  %v1305_v30 = vadd.f32 %v5065_v21, %v1032_v2  ;;  %v1307_v31 = vadd.f32 %v5069_v41, %v1034_v36  ;;  %v5712_v15 = vld [vmem:[#allocation100_spill] sm:$0xff]  ;;  %v3734_v21 = vld [vmem:[#allocation2 + $0x210] ss:$8 sps:$4 sm:$0xff]  }
 0x289   :  { %v1571_v8 = vpop.f32.mrf.mxu0  ;;  %2500 = vmatprep.subr.bf16.mxu1 %v3727_v28  ;;  %v1318_v28 = vpop.f32.mrf.mxu1  ;;  %v1038_v25 = vadd.f32 %v5712_v15, %v4708_v37  ;;  %v3739_v41 = vld [vmem:[#allocation2 + $0x204] ss:$8 sps:$4 sm:$0xff]   ;;  %v3742_v36 = vld [vmem:[%s5500_s5 + $0x70] sm:$0xff]  }
 0x28a   :  { %v1732_v40 = vmax.f32 %v1676_v45, %v1680_v33  ;;  %v1681_v19 = vmax.f32 %v1570_v16, 0.0  ;;  %v1572_v38 = vadd.f32 %v1571_v8, %v1299_v63  ;;  %v5713_v63 = vld [vmem:[#allocation104_spill] sm:$0xff]  ;;  %v1317_v8 = vadd.f32 %v1316_v56, %v1044_v34  ;;  %3392 = vmatprep.subr.bf16.mxu0 %v3742_v36 }
 0x28b   :  { %v1573_v0 = vpop.f32.mrf.mxu0  ;;  %v1046_v61 = vadd.f32 %v5713_v63, %v4702_v35  ;;  %v1311_v35 = vadd.f32 %v5096_v52, %v1038_v25 }
 0x28c   :  { %v1733_v23 = vmax.f32 %v1677_v43, %v1681_v19  ;;  %v1682_v11 = vmax.f32 %v1572_v38, 0.0  ;;  %v1574_v10 = vadd.f32 %v1573_v0, %v1301_v17  ;;  %2501 = vmatpush1.bf16.msra.mxu1 %v3725_v32  ;;  %v5714_v32 = vld [vmem:[#allocation106_spill] sm:$0xff]  ;;  %v1309_v43 = vadd.f32 %v5082_v39, %v1036_v42 }
 0x28d   :  { %v1577_v18 = vpop.f32.mrf.mxu0  ;;  %2502 = vmatprep.subr.bf16.mxu1 %v3730_v47  ;;  %v1048_v54 = vadd.f32 %v5714_v32, %v4708_v37  ;;  %v1320_v47 = vpop.f32.mrf.mxu1  ;;  %v1319_v1 = vadd.f32 %v1318_v28, %v1046_v61  ;;  %v3737_v37 = vld [vmem:[#allocation2 + $0x200] ss:$8 sps:$4 sm:$0xff]   ;;  %v3750_v61 = vld [vmem:[%s5500_s5 + $0x50] sm:$0xff]   ;;  %v3752_v32 = vld [vmem:[%s5500_s5 + $0xf8] sm:$0xff]  }
 0x28e   :  { %v1760_v27 = vmax.f32 %v1732_v40, %v1733_v23  ;;  %v1734_v3 = vmax.f32 %v1678_v13, %v1682_v11  ;;  %v1683_v4 = vmax.f32 %v1574_v10, 0.0  ;;  %v1578_v33 = vadd.f32 %v1577_v18, %v1305_v30  ;;  %v3746_v30 = vld [vmem:[%s5500_s5 + $0x60] sm:$0xff]  }
 0x28f   :  { %v1579_v48 = vpop.f32.mrf.mxu0  ;;  %2434 = vmatmul.mubr.bf16.gmra.mxu1 %v4907_v9  ;;  %v1321_v23 = vadd.f32 %v1320_v47, %v1048_v54  ;;  %v3753_v54 = vld [vmem:[%s5500_s5 + $0xb8] sm:$0xff]  }
 0x290   :  { %v1735_v14 = vmax.f32 %v1679_v50, %v1683_v4  ;;  %2443 = vmatprep.mubr.bf16.mxu1 %v4979_v51  ;;  %2503 = vmatpush1.bf16.msra.mxu1 %v3728_v58  ;;  %v1580_v49 = vadd.f32 %v1579_v48, %v1307_v31  ;;  %v1684_v19 = vmax.f32 %v1578_v33, 0.0  ;;  %v3743_v48 = vld [vmem:[%s5500_s5 + $0x30] sm:$0xff]  }
 0x291   :  { %v1581_v62 = vpop.f32.mrf.mxu0  ;;  %2504 = vmatprep.subr.bf16.mxu1 %v3733_v59  ;;  %3393 = vmatpush3.bf16.msra.mxu0 %v3743_v48 }
 0x292   :  { %v1761_v57 = vmax.f32 %v1734_v3, %v1735_v14  ;;  %v1582_v38 = vadd.f32 %v1581_v62, %v1309_v43  ;;  %v1685_v11 = vmax.f32 %v1580_v49, 0.0  ;;  %v3744_v62 = vld [vmem:[%s5500_s5 + $0x68] sm:$0xff]   ;;  %v3755_v43 = vld [vmem:[%s5500_s5 + $0xb0] sm:$0xff]  }
 0x293   :  { %v1583_v45 = vpop.f32.mrf.mxu0  ;;  %3394 = vmatprep.subr.bf16.mxu0 %v3744_v62  ;;  %v3768_v62 = vld [vmem:[%s5500_s5 + $0xc8] sm:$0xff]  }
 0x294   :  { %2505 = vmatpush1.bf16.msra.mxu1 %v3731_v24  ;;  %v5127_v16 = vpack.c.bf16 %v1761_v57, %v1760_v27  ;;  %v1584_v10 = vadd.f32 %v1583_v45, %v1311_v35  ;;  %v1686_v18 = vmax.f32 %v1582_v38, 0.0  ;;  %v5715_v24 = vmov 0   ;;  %v3751_v45 = vld [vmem:[%s5500_s5 + $0x10] sm:$0xff]   ;;  %v3757_v35 = vld [vmem:[%s5500_s5 + $0x8] sm:$0xff]  }
 0x295   :  { %v1587_v17 = vpop.f32.mrf.mxu0  ;;  %2506 = vmatprep.subr.bf16.mxu1 %v3736_v5  ;;  %v3745_v5 = vld [vmem:[%s5500_s5 + $0x28] sm:$0xff]  }
 0x296   :  { %v1588_v12 = vadd.f32 %v1587_v17, %v1315_v55  ;;  %v1687_v27 = vmax.f32 %v1584_v10, 0.0  ;;  %3395 = vmatpush3.bf16.msra.mxu0 %v3745_v5 }
 0x297   :  { %v1589_v40 = vpop.f32.mrf.mxu0  ;;  %2444 = vmatmul.mubr.bf16.gmra.mxu1 %v4943_v7  ;;  %3396 = vmatprep.subr.bf16.mxu0 %v3746_v30 }
 0x298   :  { %v1688_v0 = vmax.f32 %v1588_v12, 0.0  ;;  %v1590_v13 = vadd.f32 %v1589_v40, %v1317_v8  ;;  %2453 = vmatprep.mubr.bf16.mxu1 %v5015_v6  ;;  %2507 = vmatpush1.bf16.msra.mxu1 %v3734_v21  ;;  %v3756_v12 = vld [vmem:[%s5500_s5 + $0x48] sm:$0xff]  }
 0x299   :  { %v1591_v39 = vpop.f32.mrf.mxu0  ;;  %2508 = vmatprep.subr.bf16.mxu1 %v3739_v41  ;;  %v3754_v41 = vld [vmem:[%s5500_s5 + $0xf0] sm:$0xff]   ;;  %v3758_v40 = vld [vmem:[%s5500_s5 + $0xe8] sm:$0xff]  }
 0x29a   :  { %v1736_v58 = vmax.f32 %v1684_v19, %v1688_v0  ;;  %v1689_v29 = vmax.f32 %v1590_v13, 0.0  ;;  %v1592_v52 = vadd.f32 %v1591_v39, %v1319_v1  ;;  %3397 = vmatpush3.bf16.msra.mxu0 %v3747_v53  ;;  %v3759_v19 = vld [vmem:[%s5500_s5 + $0xa8] sm:$0xff]   ;;  %v3762_v0 = vld [vmem:[%s5500_s5 + $0x40] sm:$0xff]  }
 0x29b   :  { %v1593_v2 = vpop.f32.mrf.mxu0  ;;  %v3760_v13 = vld [vmem:[%s5500_s5 + $0xe0] sm:$0xff]   ;;  %v3769_v53 = vld [vmem:[%s5500_s5 + $0x88] sm:$0xff]  }
 0x29c   :  { %v1737_v59 = vmax.f32 %v1685_v11, %v1689_v29  ;;  %v1690_v56 = vmax.f32 %v1592_v52, 0.0  ;;  %v1594_v50 = vadd.f32 %v1593_v2, %v1321_v23  ;;  %2509 = vmatpush1.bf16.msra.mxu1 %v3737_v37  ;;  %v3761_v37 = vld [vmem:[%s5500_s5 + $0xa0] sm:$0xff]   ;;  %v3765_v29 = vld [vmem:[%s5500_s5 + $0x98] sm:$0xff]  }
 0x29d   :  { %3412 = vmatprep.subr.bf16.mxu1 %v3752_v32  ;;  %v3763_v23 = vld [vmem:[%s5500_s5] sm:$0xff]  }
 0x29e   :  { %v1762_v3 = vmax.f32 %v1736_v58, %v1737_v59  ;;  %v1738_v4 = vmax.f32 %v1686_v18, %v1690_v56  ;;  %v1691_v22 = vmax.f32 %v1594_v50, 0.0  ;;  %v3764_v58 = vld [vmem:[%s5500_s5 + $0xd8] sm:$0xff]   ;;  %v3766_v18 = vld [vmem:[%s5500_s5 + $0xd0] sm:$0xff]   ;;  %v1856_v56 = vld [vmem:[%s5499_s4] sm:$0x3] }
 0x29f   :  { %2454 = vmatmul.mubr.bf16.gmra.mxu1 %v4979_v51  ;;  %v3767_v59 = vld [vmem:[%s5500_s5 + $0x90] sm:$0xff]  }
 0x2a0   :  { %v1739_v46 = vmax.f32 %v1687_v27, %v1691_v22  ;;  %2463 = vmatprep.mubr.bf16.mxu1 %v5051_v20 }
 0x2a2   :  { %v1763_v60 = vmax.f32 %v1738_v4, %v1739_v46 }
 0x2a4   :  { %v1775_v14 = vpack.c.bf16 %v1763_v60, %v1762_v3  ;;  %v5716_v3 = vld [vmem:[#allocation98_spill] sm:$0xff] }
 0x2a5   :  { %v5717_v4 = vsub.s32 0, %v5716_v3  ;;  %v5718_v48 = vsub.s32 1, %v5716_v3 }
 0x2a7   :  { %2464 = vmatmul.mubr.bf16.gmra.mxu1 %v5015_v6  ;;  %v5300_v22 = vrot.slane %v1856_v56, %v5717_v4  ;;  %v5306_v46 = vrot.slane %v1856_v56, %v5718_v48 }
 0x2a8   :  { %2473 = vmatprep.mubr.bf16.mxu1 %v5090_v44 }
 0x2af   :  { %2474 = vmatmul.mubr.bf16.gmra.mxu1 %v5051_v20 }
 0x2b0   :  { %2483 = vmatprep.mubr.bf16.mxu1 %v5127_v16 }
 0x2b7   :  { %2484 = vmatmul.mubr.bf16.gmra.mxu1 %v5090_v44 }
 0x2b8   :  { %2526 = vmatprep.mubr.bf16.mxu1 %v5715_v24 }
 0x2bf   :  { %2527 = vmatmul.mubr.bf16.vlgmr.msra.gmra.mxu1 %v4907_v9 }
 0x2c0   :  { %2536 = vmatprep.mubr.bf16.mxu1 %v5715_v24  ;;  %3413 = vmatpush3.bf16.msra.mxu1 %v3753_v54  ;;  %v3771_v54 = vld [vmem:[%s5500_s5 + $0x80] sm:$0xff]  }
 0x2c1   :  { %3414 = vmatprep.subr.bf16.mxu1 %v3754_v41 }
 0x2c4   :  { %3415 = vmatpush3.bf16.msra.mxu1 %v3755_v43 }
 0x2c5   :  { %3416 = vmatprep.subr.bf16.mxu1 %v3758_v40 }
 0x2c7   :  { %2537 = vmatmul.mubr.bf16.gmra.mxu1 %v4943_v7  ;;  %v5167_v9 = vpop.f32.mrf.mxu1 }
 0x2c8   :  { %2546 = vmatprep.mubr.bf16.mxu1 %v5715_v24  ;;  %3417 = vmatpush3.bf16.msra.mxu1 %v3759_v19 }
 0x2c9   :  { %v5171_v7 = vpop.f32.mrf.mxu1  ;;  %3418 = vmatprep.subr.bf16.mxu1 %v3760_v13 }
 0x2ca   :  { %v2305_v5 = vadd.f32 %v5171_v7, %v5306_v46 }
 0x2cc   :  { %3419 = vmatpush3.bf16.msra.mxu1 %v3761_v37 }
 0x2cd   :  { %3420 = vmatprep.subr.bf16.mxu1 %v3764_v58 }
 0x2cf   :  { %2547 = vmatmul.mubr.bf16.gmra.mxu1 %v4979_v51  ;;  %v5173_v51 = vpop.f32.mrf.mxu1 }
 0x2d0   :  { %2556 = vmatprep.mubr.bf16.mxu1 %v5715_v24  ;;  %3421 = vmatpush3.bf16.msra.mxu1 %v3765_v29 }
 0x2d1   :  { %v5177_v42 = vpop.f32.mrf.mxu1  ;;  %3422 = vmatprep.subr.bf16.mxu1 %v3766_v18 }
 0x2d2   :  { %v2309_v7 = vadd.f32 %v5177_v42, %v5306_v46 }
 0x2d4   :  { %3423 = vmatpush3.bf16.msra.mxu1 %v3767_v59 }
 0x2d5   :  { %3424 = vmatprep.subr.bf16.mxu1 %v3768_v62 }
 0x2d7   :  { %2557 = vmatmul.mubr.bf16.gmra.mxu1 %v5015_v6  ;;  %v5179_v26 = vpop.f32.mrf.mxu1  ;;  %v3748_v6 = vld [vmem:[%s5500_s5 + $0x58] sm:$0xff]  }
 0x2d8   :  { %2566 = vmatprep.mubr.bf16.mxu1 %v5715_v24  ;;  %3398 = vmatprep.subr.bf16.mxu0 %v3748_v6 }
 0x2d9   :  { %v5181_v34 = vpop.f32.mrf.mxu1  ;;  %3425 = vmatpush3.bf16.msra.mxu1 %v3769_v53 }
 0x2db   :  { %v5191_v28 = vpop.f32.mrf.mxu1 }
 0x2dc   :  { %v2317_v19 = vadd.f32 %v5191_v28, %v5300_v22 }
 0x2dd   :  { %v5193_v57 = vpop.f32.mrf.mxu1 }
 0x2de   :  { %v2319_v37 = vadd.f32 %v5193_v57, %v5306_v46 }
 0x2df   :  { %2567 = vmatmul.mubr.bf16.gmra.mxu1 %v5051_v20  ;;  %v3749_v20 = vld [vmem:[%s5500_s5 + $0x18] sm:$0xff]  }
 0x2e0   :  { %2576 = vmatprep.mubr.bf16.mxu1 %v5715_v24  ;;  %3399 = vmatpush3.bf16.msra.mxu0 %v3749_v20  ;;  %v2307_v20 = vadd.f32 %v5173_v51, %v5300_v22  ;;  %v2313_v51 = vadd.f32 %v5179_v26, %v5300_v22 }
 0x2e1   :  { %3400 = vmatprep.subr.bf16.mxu0 %v3750_v61 }
 0x2e4   :  { %3401 = vmatpush3.bf16.msra.mxu0 %v3751_v45  ;;  %v3770_v45 = vld [vmem:[%s5500_s5 + $0xc0] sm:$0xff]  }
 0x2e5   :  { %3402 = vmatprep.subr.bf16.mxu0 %v3756_v12  ;;  %3426 = vmatprep.subr.bf16.mxu1 %v3770_v45 }
 0x2e6   :  { %3427 = vmatpush3.bf16.msra.mxu1 %v3771_v54 }
 0x2e7   :  { %2577 = vmatmul.mubr.bf16.gmra.mxu1 %v5090_v44  ;;  %v5197_v44 = vpop.f32.mrf.mxu1 }
 0x2e8   :  { %2586 = vmatprep.mubr.bf16.mxu1 %v5715_v24  ;;  %3403 = vmatpush3.bf16.msra.mxu0 %v3757_v35  ;;  %v2315_v35 = vadd.f32 %v5181_v34, %v5306_v46  ;;  %v2323_v58 = vadd.f32 %v5197_v44, %v5300_v22 }
 0x2e9   :  { %v5199_v31 = vpop.f32.mrf.mxu1  ;;  %3404 = vmatprep.subr.bf16.mxu0 %v3762_v0 }
 0x2ea   :  { %v2325_v18 = vadd.f32 %v5199_v31, %v5306_v46 }
 0x2eb   :  { %v5201_v15 = vpop.f32.mrf.mxu1 }
 0x2ec   :  { %3405 = vmatpush3.bf16.msra.mxu0 %v3763_v23  ;;  %v2327_v56 = vadd.f32 %v5201_v15, %v5300_v22 }
 0x2ed   :  { %v5203_v25 = vpop.f32.mrf.mxu1 }
 0x2ee   :  { %v2329_v4 = vadd.f32 %v5203_v25, %v5306_v46 }
 0x2ef   :  { %2587 = vmatmul.mubr.bf16.gmra.mxu1 %v5127_v16 }
 0x2f0   :  { %2596 = vmatprep.mubr.bf16.mxu1 %v5715_v24 }
 0x2f7   :  { %2597 = vmatmul.mubr.bf16.gmra.mxu1 %v1775_v14  ;;  %v5205_v63 = vpop.f32.mrf.mxu1  ;;  %v2303_v14 = vadd.f32 %v5167_v9, %v5300_v22 }
 0x2f9   :  { %v5213_v55 = vpop.f32.mrf.mxu1 }
 0x2fa   :  { %v2335_v62 = vadd.f32 %v5213_v55, %v5306_v46 }
 0x2fb   :  { %v5215_v33 = vpop.f32.mrf.mxu1 }
 0x2fc   :  { %v2337_v53 = vadd.f32 %v5215_v33, %v5300_v22 }
 0x2fd   :  { %v5217_v21 = vpop.f32.mrf.mxu1 }
 0x307   :  { %v5219_v16 = vpop.f32.mrf.mxu1 }
 0x309   :  { %v5227_v49 = vpop.f32.mrf.mxu1 }
 0x30a   :  { %v2345_v55 = vadd.f32 %v5227_v49, %v5306_v46 }
 0x30b   :  { %v5229_v17 = vpop.f32.mrf.mxu1 }
 0x30c   :  { %v2347_v33 = vadd.f32 %v5229_v17, %v5300_v22 }
 0x30d   :  { %v5237_v8 = vpop.f32.mrf.mxu1 }
 0x317   :  { %v5239_v47 = vpop.f32.mrf.mxu1 }
 0x319   :  { %v5247_v1 = vpop.f32.mrf.mxu1 }
 0x31b   :  { %v5255_v38 = vpop.f32.mrf.mxu1 }
 0x31d   :  { %v5269_v11 = vpop.f32.mrf.mxu1 }
 0x327   :  { %v5271_v39 = vpop.f32.mrf.mxu1 }
 0x329   :  { %v5273_v10 = vpop.f32.mrf.mxu1 }
 0x32b   :  { %v5281_v52 = vpop.f32.mrf.mxu1 }
 0x32d   :  { %v5283_v2 = vpop.f32.mrf.mxu1 }
 0x337   :  { %v5294_v50 = vpop.f32.mrf.mxu1 }
 0x339   :  { %v5296_v27 = vpop.f32.mrf.mxu1 }
 0x33b   :  { %v5302_v36 = vpop.f32.mrf.mxu1 }
 0x33d   :  { %v5308_v60 = vpop.f32.mrf.mxu1 }
 0x33f   :  { %v2415_v24 = vpop.f32.mrf.mxu1 }
 0x340   :  { %v5317_v30 = vadd.f32 %v2415_v24, %v2303_v14  ;;  %v2333_v14 = vadd.f32 %v5205_v63, %v5300_v22  ;;  %v2343_v63 = vadd.f32 %v5219_v16, %v5300_v22  ;;  %v2353_v16 = vadd.f32 %v5239_v47, %v5300_v22 }
 0x341   :  { %v2417_v6 = vpop.f32.mrf.mxu1 }
 0x342   :  { %v5324_v9 = vadd.f32 %v2417_v6, %v2305_v5 }
 0x343   :  { %v2419_v61 = vpop.f32.mrf.mxu1 }
 0x344   :  { %v5331_v32 = vadd.f32 %v2419_v61, %v2307_v20 }
 0x345   :  { %v2421_v41 = vpop.f32.mrf.mxu1 }
 0x346   :  { %v5338_v43 = vadd.f32 %v2421_v41, %v2309_v7 }
 0x347   :  { %v2425_v12 = vpop.f32.mrf.mxu1 }
 0x348   :  { %v5342_v40 = vadd.f32 %v2425_v12, %v2313_v51  ;;  %v2349_v12 = vadd.f32 %v5237_v8, %v5306_v46 }
 0x349   :  { %v2427_v42 = vpop.f32.mrf.mxu1 }
 0x34a   :  { %v5346_v0 = vadd.f32 %v2427_v42, %v2315_v35 }
 0x34b   :  { %v2429_v13 = vpop.f32.mrf.mxu1 }
 0x34c   :  { %v5350_v26 = vadd.f32 %v2429_v13, %v2317_v19  ;;  %v2355_v13 = vadd.f32 %v5247_v1, %v5306_v46 }
 0x34d   :  { %v2431_v23 = vpop.f32.mrf.mxu1 }
 0x34e   :  { %v5354_v29 = vadd.f32 %v2431_v23, %v2319_v37  ;;  %v2357_v23 = vadd.f32 %v5255_v38, %v5300_v22 }
 0x34f   :  { %v2435_v34 = vpop.f32.mrf.mxu1 }
 0x350   :  { %v5358_v59 = vadd.f32 %v2435_v34, %v2323_v58  ;;  %v2359_v34 = vadd.f32 %v5269_v11, %v5306_v46 }
 0x351   :  { %v2437_v28 = vpop.f32.mrf.mxu1 }
 0x352   :  { %v5362_v3 = vadd.f32 %v2437_v28, %v2325_v18  ;;  %v2363_v28 = vadd.f32 %v5271_v39, %v5300_v22 }
 0x353   :  { %v2439_v57 = vpop.f32.mrf.mxu1 }
 0x354   :  { %v5366_v48 = vadd.f32 %v2439_v57, %v2327_v56  ;;  %v2365_v57 = vadd.f32 %v5273_v10, %v5306_v46 }
 0x355   :  { %v2441_v44 = vpop.f32.mrf.mxu1 }
 0x356   :  { %v5370_v24 = vadd.f32 %v2441_v44, %v2329_v4  ;;  %v2367_v44 = vadd.f32 %v5281_v52, %v5300_v22 }
 0x357   :  { %v2445_v31 = vpop.f32.mrf.mxu1 }
 0x358   :  { %v5374_v5 = vadd.f32 %v2445_v31, %v2333_v14  ;;  %v2369_v31 = vadd.f32 %v5283_v2, %v5306_v46 }
 0x359   :  { %v2447_v15 = vpop.f32.mrf.mxu1 }
 0x35a   :  { %v5378_v6 = vadd.f32 %v2447_v15, %v2335_v62  ;;  %v2373_v15 = vadd.f32 %v5294_v50, %v5300_v22 }
 0x35b   :  { %v2449_v25 = vpop.f32.mrf.mxu1 }
 0x35c   :  { %v5380_v20 = vadd.f32 %v2449_v25, %v2337_v53  ;;  %v2375_v25 = vadd.f32 %v5296_v27, %v5306_v46 }
 0x35d   :  { %v5382_v61 = vpop.f32.mrf.mxu1 }
 0x35f   :  { %v2455_v45 = vpop.f32.mrf.mxu1 }
 0x360   :  { %v5388_v7 = vadd.f32 %v2455_v45, %v2343_v63  ;;  %v2377_v45 = vadd.f32 %v5302_v36, %v5300_v22 }
 0x361   :  { %v2457_v54 = vpop.f32.mrf.mxu1 }
 0x362   :  { %v5392_v41 = vadd.f32 %v2457_v54, %v2345_v55 }
 0x363   :  { %v2459_v51 = vpop.f32.mrf.mxu1 }
 0x364   :  { %v5396_v35 = vadd.f32 %v2459_v51, %v2347_v33 }
 0x365   :  { %v2461_v42 = vpop.f32.mrf.mxu1 }
 0x366   :  { %v5400_v19 = vadd.f32 %v2461_v42, %v2349_v12 }
 0x367   :  { %v2465_v49 = vpop.f32.mrf.mxu1 }
 0x368   :  { %v5404_v37 = vadd.f32 %v2465_v49, %v2353_v16 }
 0x369   :  { %v2467_v17 = vpop.f32.mrf.mxu1 }
 0x36a   :  { %v5408_v58 = vadd.f32 %v2467_v17, %v2355_v13 }
 0x36b   :  { %v2469_v8 = vpop.f32.mrf.mxu1 }
 0x36c   :  { %v5412_v18 = vadd.f32 %v2469_v8, %v2357_v23 }
 0x36d   :  { %v2471_v47 = vpop.f32.mrf.mxu1 }
 0x36e   :  { %v5416_v56 = vadd.f32 %v2471_v47, %v2359_v34 }
 0x36f   :  { %v2475_v1 = vpop.f32.mrf.mxu1 }
 0x370   :  { %v5420_v4 = vadd.f32 %v2475_v1, %v2363_v28 }
 0x371   :  { %v2477_v38 = vpop.f32.mrf.mxu1 }
 0x372   :  { %v5424_v14 = vadd.f32 %v2477_v38, %v2365_v57 }
 0x373   :  { %v2479_v11 = vpop.f32.mrf.mxu1 }
 0x374   :  { %v5428_v62 = vadd.f32 %v2479_v11, %v2367_v44 }
 0x375   :  { %v2481_v39 = vpop.f32.mrf.mxu1 }
 0x376   :  { %v5432_v53 = vadd.f32 %v2481_v39, %v2369_v31 }
 0x377   :  { %v2485_v10 = vpop.f32.mrf.mxu1 }
 0x378   :  { %v5436_v63 = vadd.f32 %v2485_v10, %v2373_v15 }
 0x379   :  { %v2487_v52 = vpop.f32.mrf.mxu1 }
 0x37a   :  { %v5440_v55 = vadd.f32 %v2487_v52, %v2375_v25 }
 0x37b   :  { %v2489_v2 = vpop.f32.mrf.mxu1 }
 0x37c   :  { %v5442_v54 = vadd.f32 %v2489_v2, %v2377_v45 }
 0x37d   :  { %v5444_v33 = vpop.f32.mrf.mxu1 }
 0x37f   :  { %v2528_v50 = vpop.f32.mrf.mxu1 }
 0x380   :  { %v2529_v16 = vadd.f32 %v2528_v50, %v5317_v30 }
 0x381   :  { %v2530_v51 = vpop.f32.mrf.mxu1 }
 0x382   :  { %v2531_v27 = vadd.f32 %v2530_v51, %v5324_v9  ;;  %v2607_v22 = vmax.f32 %v2529_v16, 0.0 }
 0x383   :  { %v2532_v12 = vpop.f32.mrf.mxu1 }
 0x384   :  { %v2533_v36 = vadd.f32 %v2532_v12, %v5331_v32  ;;  %v2608_v34 = vmax.f32 %v2531_v27, 0.0 }
 0x385   :  { %v2534_v42 = vpop.f32.mrf.mxu1 }
 0x386   :  { %v2535_v28 = vadd.f32 %v2534_v42, %v5338_v43  ;;  %v2609_v9 = vmax.f32 %v2533_v36, 0.0 }
 0x387   :  { %v2538_v49 = vpop.f32.mrf.mxu1 }
 0x388   :  { %v2539_v13 = vadd.f32 %v2538_v49, %v5342_v40  ;;  %v2610_v39 = vmax.f32 %v2535_v28, 0.0 }
 0x389   :  { %v2540_v17 = vpop.f32.mrf.mxu1 }
 0x38a   :  { %v2611_v23 = vmax.f32 %v2539_v13, 0.0  ;;  %v2541_v8 = vadd.f32 %v2540_v17, %v5346_v0 }
 0x38b   :  { %v2542_v47 = vpop.f32.mrf.mxu1 }
 0x38c   :  { %v2639_v1 = vmax.f32 %v2607_v22, %v2611_v23  ;;  %v2612_v57 = vmax.f32 %v2541_v8, 0.0  ;;  %v2543_v30 = vadd.f32 %v2542_v47, %v5350_v26 }
 0x38d   :  { %v2544_v38 = vpop.f32.mrf.mxu1 }
 0x38e   :  { %v2640_v44 = vmax.f32 %v2608_v34, %v2612_v57  ;;  %v2613_v11 = vmax.f32 %v2543_v30, 0.0  ;;  %v2545_v40 = vadd.f32 %v2544_v38, %v5354_v29  ;;  %v2339_v29 = vadd.f32 %v5217_v21, %v5306_v46 }
 0x38f   :  { %v2548_v31 = vpop.f32.mrf.mxu1 }
 0x390   :  { %v2655_v32 = vmax.f32 %v2639_v1, %v2640_v44  ;;  %v2641_v15 = vmax.f32 %v2609_v9, %v2613_v11  ;;  %v2614_v10 = vmax.f32 %v2545_v40, 0.0  ;;  %v2549_v50 = vadd.f32 %v2548_v31, %v5358_v59 }
 0x391   :  { %v2550_v0 = vpop.f32.mrf.mxu1  ;;  %v2452_v17 = vadd.f32 %v5382_v61, %v2339_v29 }
 0x392   :  { %v2642_v25 = vmax.f32 %v2610_v39, %v2614_v10  ;;  %v2551_v26 = vadd.f32 %v2550_v0, %v5362_v3  ;;  %v2615_v16 = vmax.f32 %v2549_v50, 0.0 }
 0x393   :  { %v2552_v52 = vpop.f32.mrf.mxu1 }
 0x394   :  { %v2656_v45 = vmax.f32 %v2641_v15, %v2642_v25  ;;  %v2553_v27 = vadd.f32 %v2552_v52, %v5366_v48  ;;  %v2616_v22 = vmax.f32 %v2551_v26, 0.0 }
 0x395   :  { %v2554_v43 = vpop.f32.mrf.mxu1 }
 0x396   :  { %v2663_v2 = vpack.c.bf16 %v2656_v45, %v2655_v32  ;;  %v2555_v59 = vadd.f32 %v2554_v43, %v5370_v24  ;;  %v2617_v34 = vmax.f32 %v2553_v27, 0.0 }
 0x397   :  { %v2558_v51 = vpop.f32.mrf.mxu1 }
 0x398   :  { %v2559_v12 = vadd.f32 %v2558_v51, %v5374_v5  ;;  %v2618_v48 = vmax.f32 %v2555_v59, 0.0 }
 0x399   :  { %v2560_v42 = vpop.f32.mrf.mxu1 }
 0x39a   :  { %v2619_v49 = vmax.f32 %v2559_v12, 0.0  ;;  %v2561_v13 = vadd.f32 %v2560_v42, %v5378_v6 }
 0x39b   :  { %v2562_v36 = vpop.f32.mrf.mxu1 }
 0x39c   :  { %v2643_v3 = vmax.f32 %v2615_v16, %v2619_v49  ;;  %v2620_v23 = vmax.f32 %v2561_v13, 0.0  ;;  %v2563_v5 = vadd.f32 %v2562_v36, %v5380_v20 }
 0x39d   :  { %v2564_v8 = vpop.f32.mrf.mxu1 }
 0x39e   :  { %v2644_v21 = vmax.f32 %v2616_v22, %v2620_v23  ;;  %v2621_v47 = vmax.f32 %v2563_v5, 0.0  ;;  %v2565_v28 = vadd.f32 %v2564_v8, %v2452_v17 }
 0x39f   :  { %v2568_v1 = vpop.f32.mrf.mxu1 }
 0x3a0   :  { %v2657_v57 = vmax.f32 %v2643_v3, %v2644_v21  ;;  %v2645_v30 = vmax.f32 %v2617_v34, %v2621_v47  ;;  %v2622_v6 = vmax.f32 %v2565_v28, 0.0  ;;  %v2569_v24 = vadd.f32 %v2568_v1, %v5388_v7 }
 0x3a1   :  { %v2570_v38 = vpop.f32.mrf.mxu1 }
 0x3a2   :  { %v2646_v61 = vmax.f32 %v2618_v48, %v2622_v6  ;;  %v2571_v20 = vadd.f32 %v2570_v38, %v5392_v41  ;;  %v2623_v15 = vmax.f32 %v2569_v24, 0.0  ;;  %v3773_v24 = vld [vmem:[#allocation4 + $0x30] sm:$0xff]  }
 0x3a3   :  { %v2572_v9 = vpop.f32.mrf.mxu1 }
 0x3a4   :  { %v2658_v44 = vmax.f32 %v2645_v30, %v2646_v61  ;;  %v2573_v10 = vadd.f32 %v2572_v9, %v5396_v35  ;;  %v2624_v52 = vmax.f32 %v2571_v20, 0.0  ;;  %v3776_v20 = vld [vmem:[#allocation4 + $0x18] sm:$0xff]  }
 0x3a5   :  { %v2574_v11 = vpop.f32.mrf.mxu1 }
 0x3a6   :  { %v2664_v40 = vpack.c.bf16 %v2658_v44, %v2657_v57  ;;  %v2575_v43 = vadd.f32 %v2574_v11, %v5400_v19  ;;  %v2625_v51 = vmax.f32 %v2573_v10, 0.0  ;;  %v3772_v11 = vld [vmem:[#allocation4 + $0x38] sm:$0xff]  }
 0x3a7   :  { %v2578_v31 = vpop.f32.mrf.mxu1 }
 0x3a8   :  { %v2579_v39 = vadd.f32 %v2578_v31, %v5404_v37  ;;  %2962 = vmatprep.mubr.bf16.mxu0 %v2664_v40  ;;  %v2626_v42 = vmax.f32 %v2575_v43, 0.0  ;;  %v3775_v40 = vld [vmem:[#allocation4 + $0x20] sm:$0xff]   ;;  %v3777_v31 = vld [vmem:[#allocation4 + $0x10] sm:$0xff]  }
 0x3a9   :  { %v2580_v32 = vpop.f32.mrf.mxu1  ;;  %2963 = vmatmul.mubr.bf16.vlgmr.msra.gmra.mxu0 %v2663_v2  ;;  %v3348_v43 = vld [vmem:[%s5501_s6] ss:$0 sm:$0xff] }
 0x3aa   :  { %v2627_v0 = vmax.f32 %v2579_v39, 0.0  ;;  %v2581_v25 = vadd.f32 %v2580_v32, %v5408_v58  ;;  %v3778_v39 = vld [vmem:[#allocation4 + $0x8] sm:$0xff]   ;;  %v3779_v32 = vld [vmem:[#allocation4] sm:$0xff]  }
 0x3ab   :  { %v2582_v45 = vpop.f32.mrf.mxu1 }
 0x3ac   :  { %v2647_v7 = vmax.f32 %v2623_v15, %v2627_v0  ;;  %v2628_v50 = vmax.f32 %v2581_v25, 0.0  ;;  %v2583_v41 = vadd.f32 %v2582_v45, %v5412_v18 }
 0x3ad   :  { %v2584_v26 = vpop.f32.mrf.mxu1 }
 0x3ae   :  { %v2648_v37 = vmax.f32 %v2624_v52, %v2628_v50  ;;  %v2629_v12 = vmax.f32 %v2583_v41, 0.0  ;;  %v2585_v2 = vadd.f32 %v2584_v26, %v5416_v56  ;;  %v2379_v56 = vadd.f32 %v5308_v60, %v5306_v46 }
 0x3af   :  { %v2588_v29 = vpop.f32.mrf.mxu1 }
 0x3b0   :  { %v2659_v35 = vmax.f32 %v2647_v7, %v2648_v37  ;;  %v2649_v16 = vmax.f32 %v2625_v51, %v2629_v12  ;;  %v2630_v27 = vmax.f32 %v2585_v2, 0.0  ;;  %v2589_v36 = vadd.f32 %v2588_v29, %v5420_v4 }
 0x3b1   :  { %v2590_v58 = vpop.f32.mrf.mxu1  ;;  %v2492_v47 = vadd.f32 %v5444_v33, %v2379_v56 }
 0x3b2   :  { %v2650_v49 = vmax.f32 %v2626_v42, %v2630_v27  ;;  %v2591_v18 = vadd.f32 %v2590_v58, %v5424_v14  ;;  %v2631_v5 = vmax.f32 %v2589_v36, 0.0  ;;  %v5719_v58 = vlaneseq }
 0x3b3   :  { %v2592_v13 = vpop.f32.mrf.mxu1 }
 0x3b4   :  { %v2660_v17 = vmax.f32 %v2649_v16, %v2650_v49  ;;  %v2593_v8 = vadd.f32 %v2592_v13, %v5428_v62  ;;  %v2632_v28 = vmax.f32 %v2591_v18, 0.0  ;;  %v3128_v49 = vand.u32 127, %v5719_v58  ;;  %v3381_v13 = vld [vmem:[%s5503_s8] ss:$0 sm:$0xff] }
 0x3b5   :  { %v2594_v19 = vpop.f32.mrf.mxu1 }
 0x3b6   :  { %v2665_v22 = vpack.c.bf16 %v2660_v17, %v2659_v35  ;;  %v2595_v4 = vadd.f32 %v2594_v19, %v5432_v53  ;;  %v2633_v30 = vmax.f32 %v2593_v8, 0.0  ;;  %v3839_v53 = vmov 0.0  }
 0x3b7   :  { %v2598_v59 = vpop.f32.mrf.mxu1  ;;  %3443 = vmatprep.subr.bf16.mxu0 %v3839_v53  ;;  %3459 = vmatprep.mubr.msk.bf16.mxu0 %vm3840_vm0, %v3839_v53  ;;  %vm3129_vm1 = vcmp.lt.s32.totalorder %v3128_v49, 10 }
 0x3b8   :  { %v2599_v3 = vadd.f32 %v2598_v59, %v5436_v63  ;;  %v2634_v38 = vmax.f32 %v2595_v4, 0.0  ;;  %3444 = vmatpush3.bf16.msra.mxu0 %v3772_v11 }
 0x3b9   :  { %v2600_v23 = vpop.f32.mrf.mxu1  ;;  %3445 = vmatprep.subr.bf16.mxu0 %v3839_v53 }
 0x3ba   :  { %v2635_v34 = vmax.f32 %v2599_v3, 0.0  ;;  %v2601_v21 = vadd.f32 %v2600_v23, %v5440_v55 }
 0x3bb   :  { %v2602_v1 = vpop.f32.mrf.mxu1 }
 0x3bc   :  { %v2651_v14 = vmax.f32 %v2631_v5, %v2635_v34  ;;  %v2636_v48 = vmax.f32 %v2601_v21, 0.0  ;;  %v2603_v63 = vadd.f32 %v2602_v1, %v5442_v54  ;;  %3446 = vmatpush3.bf16.msra.mxu0 %v3773_v24  ;;  %v3774_v54 = vld [vmem:[#allocation4 + $0x28] sm:$0xff]  }
 0x3bd   :  { %v2604_v57 = vpop.f32.mrf.mxu1  ;;  %3447 = vmatprep.subr.bf16.mxu0 %v3839_v53 }
 0x3be   :  { %v2652_v46 = vmax.f32 %v2632_v28, %v2636_v48  ;;  %v2637_v60 = vmax.f32 %v2603_v63, 0.0  ;;  %v2605_v6 = vadd.f32 %v2604_v57, %v2492_v47 }
 0x3c0   :  { %v2661_v62 = vmax.f32 %v2651_v14, %v2652_v46  ;;  %v2653_v61 = vmax.f32 %v2633_v30, %v2637_v60  ;;  %v2638_v9 = vmax.f32 %v2605_v6, 0.0  ;;  %3448 = vmatpush3.bf16.msra.mxu0 %v3774_v54 }
 0x3c1   :  { %3449 = vmatprep.subr.bf16.mxu0 %v3839_v53 }
 0x3c2   :  { %v2654_v55 = vmax.f32 %v2634_v38, %v2638_v9 }
 0x3c4   :  { %v2662_v44 = vmax.f32 %v2653_v61, %v2654_v55  ;;  %3450 = vmatpush3.bf16.msra.mxu0 %v3775_v40 }
 0x3c5   :  { %3451 = vmatprep.subr.bf16.mxu0 %v3839_v53 }
 0x3c6   :  { %v2666_v33 = vpack.c.bf16 %v2662_v44, %v2661_v62 }
 0x3c8   :  { %3003 = vmatprep.mubr.bf16.mxu1 %v2666_v33  ;;  %3452 = vmatpush3.bf16.msra.mxu0 %v3776_v20 }
 0x3c9   :  { %3004 = vmatmul.mubr.bf16.vlgmr.msra.gmra.mxu1 %v2665_v22  ;;  %3453 = vmatprep.subr.bf16.mxu0 %v3839_v53 }
 0x3cc   :  { %3454 = vmatpush3.bf16.msra.mxu0 %v3777_v31 }
 0x3cd   :  { %3455 = vmatprep.subr.bf16.mxu0 %v3839_v53 }
 0x3d0   :  { %3456 = vmatpush3.bf16.msra.mxu0 %v3778_v39 }
 0x3d1   :  { %3457 = vmatprep.subr.bf16.mxu0 %v3839_v53 }
 0x3d4   :  { %3458 = vmatpush3.bf16.msra.mxu0 %v3779_v32 }
 0x469   :  { %v3406_v15 = vpop.f32.mrf.mxu0 }
 0x46b   :  { %v3407_v10 = vpop.f32.mrf.mxu0 }
 0x46c   :  { %v3408_v45 = vadd.f32 %v3407_v10, %v3406_v15 }
 0x46d   :  { %v3409_v0 = vpop.f32.mrf.mxu0 }
 0x46e   :  { %v2965_v51 = vadd.f32 %v3408_v45, %v3348_v43 }
 0x46f   :  { %v3410_v25 = vpop.f32.mrf.mxu0 }
 0x470   :  { %v3411_v50 = vadd.f32 %v3410_v25, %v3409_v0 }
 0x472   :  { %v2968_v12 = vadd.f32 %v3411_v50, %v3348_v43 }
 0x489   :  { %v3428_v52 = vpop.f32.mrf.mxu1 }
 0x48b   :  { %v3429_v7 = vpop.f32.mrf.mxu1 }
 0x48c   :  { %v3430_v41 = vadd.f32 %v3429_v7, %v3428_v52 }
 0x48d   :  { %v3431_v26 = vpop.f32.mrf.mxu1 }
 0x48e   :  { %v3006_v2 = vadd.f32 %v3430_v41, %v2965_v51 }
 0x48f   :  { %v3432_v37 = vpop.f32.mrf.mxu1 }
 0x490   :  { %v3433_v29 = vadd.f32 %v3432_v37, %v3431_v26  ;;  %v3012_v35 = vmax.f32 %v3006_v2, 0.0 }
 0x492   :  { %v3009_v42 = vadd.f32 %v3433_v29, %v2968_v12 }
 0x494   :  { %v3013_v16 = vmax.f32 %v3009_v42, 0.0 }
 0x496   :  { %v3014_v27 = vpack.c.bf16 %v3013_v16, %v3012_v35 }
 0x498   :  { %3460 = vmatmul.mubr.bf16.vlgmr.msra.gmra.mxu0 %v3014_v27 }
 0x558   :  { %v3120_v17 = vpop.f32.mrf.mxu0 }
 0x559   :  { %v3121_v19 = vadd.f32 %v3381_v13, %v3120_v17 }
 0x55a   :  { %v3461_v22 = vpop.f32.mrf.mxu0 }
 0x55b   :  { %v3130_v36 = vsel %vm3129_vm1, %v3121_v19, -1e+30 }
 0x55c   :  { %3132 = vmax.xlane.f32.xlu0 %v3130_v36  ;;  %v3123_v18 = vpop.f32.mrf.mxu0 }
 0x55d   :  { %v3124_v59 = vadd.f32 %v3381_v13, %v3123_v18 }
 0x55e   :  { %v3462_v3 = vpop.f32.mrf.mxu0 }
 0x55f   :  { %v3131_v56 = vsel %vm3129_vm1, %v3124_v59, -1e+30 }
 0x560   :  { %3134 = vmax.xlane.f32.xlu0 %v3131_v56 }
 0x5e5   :  { %v3133_v23 = vpop.xlane.xlu0 %3132 }
 0x5e6   :  { %v3136_v5 = vsub.f32 %v3130_v36, %v3133_v23 }
 0x5e8   :  { %v3138_v8 = vmul.f32 1.442695, %v3136_v5 }
 0x5e9   :  { %v3135_v34 = vpop.xlane.xlu0 %3134 }
 0x5ea   :  { %v3137_v21 = vsub.f32 %v3131_v56, %v3135_v34  ;;  %3780 = vpow2.f32 %v3138_v8 }
 0x5ec   :  { %v3140_v47 = vmul.f32 1.442695, %v3137_v21 }
 0x5ee   :  { %3782 = vpow2.f32 %v3140_v47 }
 0x5f7   :  { %v3781_v28 = vpop.eup %3780 }
 0x5f8   :  { %3142 = vadd.xlane.f32.xlu1 %v3781_v28 }
 0x5fb   :  { %v3783_v1 = vpop.eup %3782 }
 0x5fc   :  { %3144 = vadd.xlane.f32.xlu1 %v3783_v1 }
 0x681   :  { %v3143_v4 = vpop.xlane.xlu1 %3142 }
 0x682   :  { %3784 = vlog2.f32 %v3143_v4 }
 0x685   :  { %v3145_v14 = vpop.xlane.xlu1 %3144 }
 0x686   :  { %3786 = vlog2.f32 %v3145_v14 }
 0x68f   :  { %v3785_v48 = vpop.eup %3784 }
 0x690   :  { %v3147_v63 = vmul.f32 0.6931472, %v3785_v48 }
 0x692   :  { %v3150_v57 = vsub.f32 %v3136_v5, %v3147_v63 }
 0x693   :  { %v3787_v30 = vpop.eup %3786 }
 0x694   :  { %3152 = vst [vmem:[%s5504_s9] sm:$0xff] %v3150_v57  ;;  %v3149_v46 = vmul.f32 0.6931472, %v3787_v30 }
 0x696   :  { %v3151_v60 = vsub.f32 %v3137_v21, %v3149_v46 }
 0x698   :  { %3153 = vst [vmem:[%s5504_s9 + $0x8] sm:$0xff] %v3151_v60 }
 0x699   :  { %3158 = vsyncpa [#allocation3], 1 }
 0x69a   :  { %3159 = vsyncpa [#allocation5], 1 }

</bundles_post_ra>
